<compile_context>
chip_gen: v7x
topology: tpu7x:2x2x1
jax: 0.10.0
libtpu: 0.0.40
codegen_flags: <defaults>
</compile_context>

<pallas_src>
import jax
import jax.numpy as jnp
from jax import lax
from jax.experimental import pallas as pl
from jax.experimental.pallas import tpu as pltpu
import numpy as np

BN_EPS = 1e-5


# -------------------------------- BN folding -----------------------------------
def fold_bn(conv_bias, gamma, beta, mean, var, eps=BN_EPS):
    # eval-mode BN(conv(x)+b) == conv(x)*scale + shift
    scale = gamma / jnp.sqrt(var + eps)
    shift = beta + (conv_bias - mean) * scale
    return scale, shift


# ------------------------------ fused forward -----------------------------------
def upsample_forward(x, params):
    """x: NCHW (N, Cin, H, W) -> NCHW (N, C, 2H, 2W)."""
    N, Cin, H, W = x.shape
    C = params["up_w"].shape[1]                  # out_channel
    H2, W2 = 2 * H, 2 * W
    L = H2 * W2
    NTAP = 9

    # ---- layout plumbing (tiny XLA ops, outside the kernel) ----------------------
    # NN-upsample x so the deconv becomes one matmul + phase select inside the kernel.
    x_exp = jnp.repeat(jnp.repeat(x, 2, axis=2), 2, axis=3).reshape(N, Cin, L)

    # ConvTranspose2d weight (Cin, Cout, 2, 2) -> (4C, Cin); row = (di*2+dj)*C + cout.
    w_up = jnp.transpose(params["up_w"], (2, 3, 1, 0)).reshape(4 * C, Cin)
    b_up = params["up_b"].reshape(C, 1)

    # 3x3 conv weights HWIO (3,3,C,C) -> (C, 9C); column = (dy*3+dx)*C + cin.
    conv_w, scales, shifts = [], [], []
    for name in ("block1", "block2"):
        p = params[name]
        for i in ("1", "2"):
            conv_w.append(jnp.transpose(p["w" + i], (3, 0, 1, 2)).reshape(C, NTAP * C))
            s, sh = fold_bn(p["b" + i], p["g" + i], p["be" + i], p["m" + i], p["v" + i])
            scales.append(s)
            shifts.append(sh)
    conv_w = jnp.stack(conv_w)                               # (4, C, 9C)
    scales = jnp.stack(scales).reshape(4, C, 1)
    shifts = jnp.stack(shifts).reshape(4, C, 1)

    # Static masks over the flattened (H2*W2) lane dim, pre-broadcast over channels
    # so the kernel does plain (C, L) elementwise multiplies (no in-kernel broadcasts).
    pp = np.arange(L)
    ii, jj = pp // W2, pp % W2
    pmask = np.stack([((ii % 2) == di) & ((jj % 2) == dj)
                      for di in range(2) for dj in range(2)]).astype(np.float32)   # (4, L)
    cmask = np.stack([((ii + dy - 1) >= 0) & ((ii + dy - 1) < H2)
                      & ((jj + dx - 1) >= 0) & ((jj + dx - 1) < W2)
                      for dy in range(3) for dx in range(3)]).astype(np.float32)   # (9, L)
    pmask = jnp.asarray(np.repeat(pmask[:, None, :], C, axis=1))   # (4, C, L)
    cmask = jnp.asarray(np.repeat(cmask[:, None, :], C, axis=1))   # (9, C, L)

    # Tap offsets in the flattened lane index: act[:, p + d] is the (dy, dx) neighbour.
    shift_of_tap = [(dy - 1) * W2 + (dx - 1) for dy in range(3) for dx in range(3)]

    def kernel(x_ref, wup_ref, bup_ref, pm_ref, wc_ref, cm_ref, sc_ref, sh_ref,
               o_ref, patches_ref):
        # x_ref      : (1, Cin, L)  NN-upsampled input, channel-major, flat spatial
        # wup_ref    : (4C, Cin)    deconv weight, rows ordered (di, dj, cout)
        # bup_ref    : (C, 1)       deconv bias
        # pm_ref     : (4, C, L)    deconv phase masks (one-hot over the 2x2 phase)
        # wc_ref     : (4, C, 9C)   flattened 3x3 conv weights (4 layers)
        # cm_ref     : (9, C, L)    conv zero-padding masks per tap
        # sc_ref/sh_ref: (4, C, 1)  folded eval-BN scale / shift (conv bias included)
        # o_ref      : (1, C, L)
        # patches_ref: (9C, L)      im2col scratch (VMEM)

        # ---- ConvTranspose2d(k=2, s=2): one matmul + 4-way phase select -----------
        xe = x_ref[0]                                                       # (Cin, L)
        y = jnp.dot(wup_ref[...], xe, preferred_element_type=jnp.float32)   # (4C, L)
        act = bup_ref[...] + (y[0 * C:1 * C] * pm_ref[0] + y[1 * C:2 * C] * pm_ref[1]
                              + y[2 * C:3 * C] * pm_ref[2] + y[3 * C:4 * C] * pm_ref[3])

        # ---- 4 x (Conv3x3 SAME + eval-BN + ReLU), ONE matmul per layer ------------
        for layer in range(4):
            for t in range(NTAP):
                d = shift_of_tap[t]
                shifted = act if d == 0 else pltpu.roll(act, shift=(-d) % L, axis=1)
                # sublane-aligned (multiple-of-8 rows), full-lane store
                patches_ref[t * C:(t + 1) * C, :] = shifted * cm_ref[t]
            z = jnp.dot(wc_ref[layer], patches_ref[...],
                        preferred_element_type=jnp.float32)                 # (C, L)
            act = jnp.maximum(z * sc_ref[layer] + sh_ref[layer], 0.0)

        o_ref[0] = act.astype(o_ref.dtype)

    out = pl.pallas_call(
        kernel,
        out_shape=jax.ShapeDtypeStruct((N, C, L), x.dtype),
        grid=(N,),
        in_specs=[
            pl.BlockSpec((1, Cin, L), lambda n: (n, 0, 0)),       # NN-upsampled input
            pl.BlockSpec((4 * C, Cin), lambda n: (0, 0)),         # deconv weight
            pl.BlockSpec((C, 1), lambda n: (0, 0)),               # deconv bias
            pl.BlockSpec((4, C, L), lambda n: (0, 0, 0)),         # deconv phase masks
            pl.BlockSpec((4, C, NTAP * C), lambda n: (0, 0, 0)),  # conv weights (flat)
            pl.BlockSpec((NTAP, C, L), lambda n: (0, 0, 0)),      # conv padding masks
            pl.BlockSpec((4, C, 1), lambda n: (0, 0, 0)),         # folded BN scale
            pl.BlockSpec((4, C, 1), lambda n: (0, 0, 0)),         # folded BN shift
        ],
        out_specs=pl.BlockSpec((1, C, L), lambda n: (n, 0, 0)),
        scratch_shapes=[pltpu.VMEM((NTAP * C, L), jnp.float32)],  # im2col patches
        compiler_params=pltpu.CompilerParams(
            dimension_semantics=("parallel",),                    # v7x: one image per core
        ),
    )(x_exp, w_up, b_up, pmask, conv_w, cmask, scales, shifts)

    return out.reshape(N, C, H2, W2)                              # NCHW


# ------------------------- deterministic parameters ----------------------------
def init_params(key, cin, cout):
    k_up_w, k_up_b, k_b1, k_b2 = jax.random.split(key, 4)

    def rnd(k, shape, std):
        return (std * jax.random.normal(k, shape)).astype(jnp.float32)

    def conv_block(k, ch):
        ks = jax.random.split(k, 12)
        std = 1.0 / np.sqrt(ch * 9)
        blk = {}
        for i, off in (("1", 0), ("2", 6)):
            blk["w" + i] = rnd(ks[off + 0], (3, 3, ch, ch), std)     # HWIO
            blk["b" + i] = rnd(ks[off + 1], (ch,), std)
            blk["g" + i] = (1.0 + 0.1 * jax.random.normal(ks[off + 2], (ch,))).astype(jnp.float32)
            blk["be" + i] = rnd(ks[off + 3], (ch,), 0.1)
            blk["m" + i] = rnd(ks[off + 4], (ch,), 0.1)
            blk["v" + i] = (0.5 + jax.random.uniform(ks[off + 5], (ch,))).astype(jnp.float32)
        return blk

    std_up = 1.0 / np.sqrt(cin * 4)
    return {
        "up_w": rnd(k_up_w, (cin, cout, 2, 2), std_up),   # torch layout (Cin, Cout, kH, kW)
        "up_b": rnd(k_up_b, (cout,), std_up),
        "block1": conv_block(k_b1, cout),
        "block2": conv_block(k_b2, cout),
    }


# ------------------------------ pure-JAX reference -----------------------------
def ref_forward(x, params):
    up_w, up_b = params["up_w"], params["up_b"]
    N, Cin, H, W = x.shape
    Cout = up_w.shape[1]
    y = jnp.zeros((N, Cout, 2 * H, 2 * W), x.dtype)
    for di in range(2):
        for dj in range(2):
            tap = jnp.einsum("nihw,io->nohw", x, up_w[:, :, di, dj]) + up_b[None, :, None, None]
            y = y.at[:, :, di::2, dj::2].set(tap)
    for name in ("block1", "block2"):
        p = params[name]
        for i in ("1", "2"):
            z = lax.conv_general_dilated(
                y, p["w" + i], window_strides=(1, 1), padding="SAME",
                dimension_numbers=("NCHW", "HWIO", "NCHW")) + p["b" + i][None, :, None, None]
            inv = (1.0 / jnp.sqrt(p["v" + i] + BN_EPS))
            z = (z - p["m" + i][None, :, None, None]) * inv[None, :, None, None] \
                * p["g" + i][None, :, None, None] + p["be" + i][None, :, None, None]
            y = jnp.maximum(z, 0.0)
    return y


# ----------------------------------- main ---------------------------------------
if __name__ == "__main__":
    in_channel, out_channel = 4, 8
    N, H, W = 2, 16, 16

    key = jax.random.PRNGKey(0)
    k_x, k_p = jax.random.split(key)
    x = jax.random.normal(k_x, (N, in_channel, H, W), jnp.float32)   # NCHW, same as torch
    params = init_params(k_p, in_channel, out_channel)

    fwd = jax.jit(upsample_forward)
    out = jax.block_until_ready(fwd(x, params))
    ref = jax.block_until_ready(ref_forward(x, params))

    assert out.shape == (N, out_channel, 2 * H, 2 * W), out.shape
    np.testing.assert_allclose(np.asarray(out), np.asarray(ref), rtol=1e-4, atol=1e-4)
    print("KERNEL_OK")
</pallas_src>

<mosaic_0001>
module attributes {stable_mosaic.version = 11 : i64} {
  func.func @kernel(%arg0: i32, %arg1: memref<1x4x1024xf32, #tpu.memory_space<vmem>>, %arg2: memref<32x4xf32, #tpu.memory_space<vmem>>, %arg3: memref<8x1xf32, #tpu.memory_space<vmem>>, %arg4: memref<4x8x1024xf32, #tpu.memory_space<vmem>>, %arg5: memref<4x8x72xf32, #tpu.memory_space<vmem>>, %arg6: memref<9x8x1024xf32, #tpu.memory_space<vmem>>, %arg7: memref<4x8x1xf32, #tpu.memory_space<vmem>>, %arg8: memref<4x8x1xf32, #tpu.memory_space<vmem>>, %arg9: memref<1x8x1024xf32, #tpu.memory_space<vmem>>, %arg10: memref<72x1024xf32, #tpu.memory_space<vmem>>) attributes {dimension_semantics = [#tpu.dimension_semantics<parallel>], iteration_bounds = array<i64: 2>, scalar_prefetch = 0 : i64, scratch_operands = 1 : i64, tpu.core_type = #tpu.core_type<tc>, window_params = [{transform_indices = @transform_0, window_bounds = array<i64: 1, 4, 1024>}, {pipeline_mode = #tpu.pipeline_mode<synchronous>, transform_indices = @transform_1, window_bounds = array<i64: 32, 4>}, {pipeline_mode = #tpu.pipeline_mode<synchronous>, transform_indices = @transform_2, window_bounds = array<i64: 8, 1>}, {pipeline_mode = #tpu.pipeline_mode<synchronous>, transform_indices = @transform_3, window_bounds = array<i64: 4, 8, 1024>}, {pipeline_mode = #tpu.pipeline_mode<synchronous>, transform_indices = @transform_4, window_bounds = array<i64: 4, 8, 72>}, {pipeline_mode = #tpu.pipeline_mode<synchronous>, transform_indices = @transform_5, window_bounds = array<i64: 9, 8, 1024>}, {pipeline_mode = #tpu.pipeline_mode<synchronous>, transform_indices = @transform_6, window_bounds = array<i64: 4, 8, 1>}, {pipeline_mode = #tpu.pipeline_mode<synchronous>, transform_indices = @transform_7, window_bounds = array<i64: 4, 8, 1>}, {transform_indices = @transform_8, window_bounds = array<i64: 1, 8, 1024>}]} {
    %c0 = arith.constant 0 : index
    %c0_0 = arith.constant 0 : index
    %c0_1 = arith.constant 0 : index
    %0 = vector.load %arg1[%c0, %c0_0, %c0_1] : memref<1x4x1024xf32, #tpu.memory_space<vmem>>, vector<1x4x1024xf32>
    %1 = vector.shape_cast %0 : vector<1x4x1024xf32> to vector<4x1024xf32>
    %c0_2 = arith.constant 0 : index
    %c0_3 = arith.constant 0 : index
    %2 = vector.load %arg2[%c0_2, %c0_3] : memref<32x4xf32, #tpu.memory_space<vmem>>, vector<32x4xf32>
    %cst = arith.constant dense<0.000000e+00> : vector<32x1024xf32>
    %3 = tpu.matmul %2, %1, %cst {dimension_numbers = #tpu.dot_dimension_numbers<[1], [0], [0], [1], [0, 0, 1, 1], [], []>} : vector<32x4xf32>, vector<4x1024xf32>, vector<32x1024xf32> -> vector<32x1024xf32>
    %c0_4 = arith.constant 0 : index
    %c0_5 = arith.constant 0 : index
    %4 = vector.load %arg3[%c0_4, %c0_5] : memref<8x1xf32, #tpu.memory_space<vmem>>, vector<8x1xf32>
    %5 = vector.extract_strided_slice %3 {offsets = [0, 0], sizes = [8, 1024], strides = [1, 1]} : vector<32x1024xf32> to vector<8x1024xf32>
    %c0_6 = arith.constant 0 : index
    %c0_7 = arith.constant 0 : index
    %c0_8 = arith.constant 0 : index
    %6 = vector.load %arg4[%c0_6, %c0_7, %c0_8] : memref<4x8x1024xf32, #tpu.memory_space<vmem>>, vector<1x8x1024xf32>
    %7 = vector.shape_cast %6 : vector<1x8x1024xf32> to vector<8x1024xf32>
    %8 = arith.mulf %5, %7 : vector<8x1024xf32>
    %9 = vector.extract_strided_slice %3 {offsets = [8, 0], sizes = [8, 1024], strides = [1, 1]} : vector<32x1024xf32> to vector<8x1024xf32>
    %c1 = arith.constant 1 : index
    %c0_9 = arith.constant 0 : index
    %c0_10 = arith.constant 0 : index
    %10 = vector.load %arg4[%c1, %c0_9, %c0_10] : memref<4x8x1024xf32, #tpu.memory_space<vmem>>, vector<1x8x1024xf32>
    %11 = vector.shape_cast %10 : vector<1x8x1024xf32> to vector<8x1024xf32>
    %12 = arith.mulf %9, %11 : vector<8x1024xf32>
    %13 = arith.addf %8, %12 : vector<8x1024xf32>
    %14 = vector.extract_strided_slice %3 {offsets = [16, 0], sizes = [8, 1024], strides = [1, 1]} : vector<32x1024xf32> to vector<8x1024xf32>
    %c2 = arith.constant 2 : index
    %c0_11 = arith.constant 0 : index
    %c0_12 = arith.constant 0 : index
    %15 = vector.load %arg4[%c2, %c0_11, %c0_12] : memref<4x8x1024xf32, #tpu.memory_space<vmem>>, vector<1x8x1024xf32>
    %16 = vector.shape_cast %15 : vector<1x8x1024xf32> to vector<8x1024xf32>
    %17 = arith.mulf %14, %16 : vector<8x1024xf32>
    %18 = arith.addf %13, %17 : vector<8x1024xf32>
    %19 = vector.extract_strided_slice %3 {offsets = [24, 0], sizes = [8, 1024], strides = [1, 1]} : vector<32x1024xf32> to vector<8x1024xf32>
    %c3 = arith.constant 3 : index
    %c0_13 = arith.constant 0 : index
    %c0_14 = arith.constant 0 : index
    %20 = vector.load %arg4[%c3, %c0_13, %c0_14] : memref<4x8x1024xf32, #tpu.memory_space<vmem>>, vector<1x8x1024xf32>
    %21 = vector.shape_cast %20 : vector<1x8x1024xf32> to vector<8x1024xf32>
    %22 = arith.mulf %19, %21 : vector<8x1024xf32>
    %23 = arith.addf %18, %22 : vector<8x1024xf32>
    %24 = vector.broadcast %4 : vector<8x1xf32> to vector<8x1024xf32>
    %25 = arith.addf %24, %23 : vector<8x1024xf32>
    %c33_i32 = arith.constant 33 : i32
    %26 = tpu.dynamic_rotate %25 by %c33_i32 dim 1 : vector<8x1024xf32>, i32 -> vector<8x1024xf32>
    %c0_15 = arith.constant 0 : index
    %c0_16 = arith.constant 0 : index
    %c0_17 = arith.constant 0 : index
    %27 = vector.load %arg6[%c0_15, %c0_16, %c0_17] : memref<9x8x1024xf32, #tpu.memory_space<vmem>>, vector<1x8x1024xf32>
    %28 = vector.shape_cast %27 : vector<1x8x1024xf32> to vector<8x1024xf32>
    %29 = arith.mulf %26, %28 : vector<8x1024xf32>
    %c0_18 = arith.constant 0 : index
    %c0_19 = arith.constant 0 : index
    %30 = vector.load %arg10[%c0_18, %c0_19] : memref<72x1024xf32, #tpu.memory_space<vmem>>, vector<8x1024xf32>
    tpu.vector_store %arg10[%c0_18, %c0_19], %29 {strides = array<i32>} : memref<72x1024xf32, #tpu.memory_space<vmem>>, vector<8x1024xf32>,
    %c32_i32 = arith.constant 32 : i32
    %31 = tpu.dynamic_rotate %25 by %c32_i32 dim 1 : vector<8x1024xf32>, i32 -> vector<8x1024xf32>
    %c1_20 = arith.constant 1 : index
    %c0_21 = arith.constant 0 : index
    %c0_22 = arith.constant 0 : index
    %32 = vector.load %arg6[%c1_20, %c0_21, %c0_22] : memref<9x8x1024xf32, #tpu.memory_space<vmem>>, vector<1x8x1024xf32>
    %33 = vector.shape_cast %32 : vector<1x8x1024xf32> to vector<8x1024xf32>
    %34 = arith.mulf %31, %33 : vector<8x1024xf32>
    %c8 = arith.constant 8 : index
    %c0_23 = arith.constant 0 : index
    %35 = vector.load %arg10[%c8, %c0_23] : memref<72x1024xf32, #tpu.memory_space<vmem>>, vector<8x1024xf32>
    tpu.vector_store %arg10[%c8, %c0_23], %34 {strides = array<i32>} : memref<72x1024xf32, #tpu.memory_space<vmem>>, vector<8x1024xf32>,
    %c31_i32 = arith.constant 31 : i32
    %36 = tpu.dynamic_rotate %25 by %c31_i32 dim 1 : vector<8x1024xf32>, i32 -> vector<8x1024xf32>
    %c2_24 = arith.constant 2 : index
    %c0_25 = arith.constant 0 : index
    %c0_26 = arith.constant 0 : index
    %37 = vector.load %arg6[%c2_24, %c0_25, %c0_26] : memref<9x8x1024xf32, #tpu.memory_space<vmem>>, vector<1x8x1024xf32>
    %38 = vector.shape_cast %37 : vector<1x8x1024xf32> to vector<8x1024xf32>
    %39 = arith.mulf %36, %38 : vector<8x1024xf32>
    %c16 = arith.constant 16 : index
    %c0_27 = arith.constant 0 : index
    %40 = vector.load %arg10[%c16, %c0_27] : memref<72x1024xf32, #tpu.memory_space<vmem>>, vector<8x1024xf32>
    tpu.vector_store %arg10[%c16, %c0_27], %39 {strides = array<i32>} : memref<72x1024xf32, #tpu.memory_space<vmem>>, vector<8x1024xf32>,
    %c1_i32 = arith.constant 1 : i32
    %41 = tpu.dynamic_rotate %25 by %c1_i32 dim 1 : vector<8x1024xf32>, i32 -> vector<8x1024xf32>
    %c3_28 = arith.constant 3 : index
    %c0_29 = arith.constant 0 : index
    %c0_30 = arith.constant 0 : index
    %42 = vector.load %arg6[%c3_28, %c0_29, %c0_30] : memref<9x8x1024xf32, #tpu.memory_space<vmem>>, vector<1x8x1024xf32>
    %43 = vector.shape_cast %42 : vector<1x8x1024xf32> to vector<8x1024xf32>
    %44 = arith.mulf %41, %43 : vector<8x1024xf32>
    %c24 = arith.constant 24 : index
    %c0_31 = arith.constant 0 : index
    %45 = vector.load %arg10[%c24, %c0_31] : memref<72x1024xf32, #tpu.memory_space<vmem>>, vector<8x1024xf32>
    tpu.vector_store %arg10[%c24, %c0_31], %44 {strides = array<i32>} : memref<72x1024xf32, #tpu.memory_space<vmem>>, vector<8x1024xf32>,
    %c4 = arith.constant 4 : index
    %c0_32 = arith.constant 0 : index
    %c0_33 = arith.constant 0 : index
    %46 = vector.load %arg6[%c4, %c0_32, %c0_33] : memref<9x8x1024xf32, #tpu.memory_space<vmem>>, vector<1x8x1024xf32>
    %47 = vector.shape_cast %46 : vector<1x8x1024xf32> to vector<8x1024xf32>
    %48 = arith.mulf %25, %47 : vector<8x1024xf32>
    %c32 = arith.constant 32 : index
    %c0_34 = arith.constant 0 : index
    %49 = vector.load %arg10[%c32, %c0_34] : memref<72x1024xf32, #tpu.memory_space<vmem>>, vector<8x1024xf32>
    tpu.vector_store %arg10[%c32, %c0_34], %48 {strides = array<i32>} : memref<72x1024xf32, #tpu.memory_space<vmem>>, vector<8x1024xf32>,
    %c1023_i32 = arith.constant 1023 : i32
    %50 = tpu.dynamic_rotate %25 by %c1023_i32 dim 1 : vector<8x1024xf32>, i32 -> vector<8x1024xf32>
    %c5 = arith.constant 5 : index
    %c0_35 = arith.constant 0 : index
    %c0_36 = arith.constant 0 : index
    %51 = vector.load %arg6[%c5, %c0_35, %c0_36] : memref<9x8x1024xf32, #tpu.memory_space<vmem>>, vector<1x8x1024xf32>
    %52 = vector.shape_cast %51 : vector<1x8x1024xf32> to vector<8x1024xf32>
    %53 = arith.mulf %50, %52 : vector<8x1024xf32>
    %c40 = arith.constant 40 : index
    %c0_37 = arith.constant 0 : index
    %54 = vector.load %arg10[%c40, %c0_37] : memref<72x1024xf32, #tpu.memory_space<vmem>>, vector<8x1024xf32>
    tpu.vector_store %arg10[%c40, %c0_37], %53 {strides = array<i32>} : memref<72x1024xf32, #tpu.memory_space<vmem>>, vector<8x1024xf32>,
    %c993_i32 = arith.constant 993 : i32
    %55 = tpu.dynamic_rotate %25 by %c993_i32 dim 1 : vector<8x1024xf32>, i32 -> vector<8x1024xf32>
    %c6 = arith.constant 6 : index
    %c0_38 = arith.constant 0 : index
    %c0_39 = arith.constant 0 : index
    %56 = vector.load %arg6[%c6, %c0_38, %c0_39] : memref<9x8x1024xf32, #tpu.memory_space<vmem>>, vector<1x8x1024xf32>
    %57 = vector.shape_cast %56 : vector<1x8x1024xf32> to vector<8x1024xf32>
    %58 = arith.mulf %55, %57 : vector<8x1024xf32>
    %c48 = arith.constant 48 : index
    %c0_40 = arith.constant 0 : index
    %59 = vector.load %arg10[%c48, %c0_40] : memref<72x1024xf32, #tpu.memory_space<vmem>>, vector<8x1024xf32>
    tpu.vector_store %arg10[%c48, %c0_40], %58 {strides = array<i32>} : memref<72x1024xf32, #tpu.memory_space<vmem>>, vector<8x1024xf32>,
    %c992_i32 = arith.constant 992 : i32
    %60 = tpu.dynamic_rotate %25 by %c992_i32 dim 1 : vector<8x1024xf32>, i32 -> vector<8x1024xf32>
    %c7 = arith.constant 7 : index
    %c0_41 = arith.constant 0 : index
    %c0_42 = arith.constant 0 : index
    %61 = vector.load %arg6[%c7, %c0_41, %c0_42] : memref<9x8x1024xf32, #tpu.memory_space<vmem>>, vector<1x8x1024xf32>
    %62 = vector.shape_cast %61 : vector<1x8x1024xf32> to vector<8x1024xf32>
    %63 = arith.mulf %60, %62 : vector<8x1024xf32>
    %c56 = arith.constant 56 : index
    %c0_43 = arith.constant 0 : index
    %64 = vector.load %arg10[%c56, %c0_43] : memref<72x1024xf32, #tpu.memory_space<vmem>>, vector<8x1024xf32>
    tpu.vector_store %arg10[%c56, %c0_43], %63 {strides = array<i32>} : memref<72x1024xf32, #tpu.memory_space<vmem>>, vector<8x1024xf32>,
    %c991_i32 = arith.constant 991 : i32
    %65 = tpu.dynamic_rotate %25 by %c991_i32 dim 1 : vector<8x1024xf32>, i32 -> vector<8x1024xf32>
    %c8_44 = arith.constant 8 : index
    %c0_45 = arith.constant 0 : index
    %c0_46 = arith.constant 0 : index
    %66 = vector.load %arg6[%c8_44, %c0_45, %c0_46] : memref<9x8x1024xf32, #tpu.memory_space<vmem>>, vector<1x8x1024xf32>
    %67 = vector.shape_cast %66 : vector<1x8x1024xf32> to vector<8x1024xf32>
    %68 = arith.mulf %65, %67 : vector<8x1024xf32>
    %c64 = arith.constant 64 : index
    %c0_47 = arith.constant 0 : index
    %69 = vector.load %arg10[%c64, %c0_47] : memref<72x1024xf32, #tpu.memory_space<vmem>>, vector<8x1024xf32>
    tpu.vector_store %arg10[%c64, %c0_47], %68 {strides = array<i32>} : memref<72x1024xf32, #tpu.memory_space<vmem>>, vector<8x1024xf32>,
    %c0_48 = arith.constant 0 : index
    %c0_49 = arith.constant 0 : index
    %c0_50 = arith.constant 0 : index
    %70 = vector.load %arg5[%c0_48, %c0_49, %c0_50] : memref<4x8x72xf32, #tpu.memory_space<vmem>>, vector<1x8x72xf32>
    %71 = vector.shape_cast %70 : vector<1x8x72xf32> to vector<8x72xf32>
    %c0_51 = arith.constant 0 : index
    %c0_52 = arith.constant 0 : index
    %72 = vector.load %arg10[%c0_51, %c0_52] : memref<72x1024xf32, #tpu.memory_space<vmem>>, vector<72x1024xf32>
    %cst_53 = arith.constant dense<0.000000e+00> : vector<8x1024xf32>
    %73 = tpu.matmul %71, %72, %cst_53 {dimension_numbers = #tpu.dot_dimension_numbers<[1], [0], [0], [1], [0, 0, 1, 1], [], []>} : vector<8x72xf32>, vector<72x1024xf32>, vector<8x1024xf32> -> vector<8x1024xf32>
    %c0_54 = arith.constant 0 : index
    %c0_55 = arith.constant 0 : index
    %c0_56 = arith.constant 0 : index
    %74 = vector.load %arg7[%c0_54, %c0_55, %c0_56] : memref<4x8x1xf32, #tpu.memory_space<vmem>>, vector<1x8x1xf32>
    %75 = vector.shape_cast %74 : vector<1x8x1xf32> to vector<8x1xf32>
    %76 = vector.broadcast %75 : vector<8x1xf32> to vector<8x1024xf32>
    %77 = arith.mulf %73, %76 : vector<8x1024xf32>
    %c0_57 = arith.constant 0 : index
    %c0_58 = arith.constant 0 : index
    %c0_59 = arith.constant 0 : index
    %78 = vector.load %arg8[%c0_57, %c0_58, %c0_59] : memref<4x8x1xf32, #tpu.memory_space<vmem>>, vector<1x8x1xf32>
    %79 = vector.shape_cast %78 : vector<1x8x1xf32> to vector<8x1xf32>
    %80 = vector.broadcast %79 : vector<8x1xf32> to vector<8x1024xf32>
    %81 = arith.addf %77, %80 : vector<8x1024xf32>
    %cst_60 = arith.constant 0.000000e+00 : f32
    %82 = vector.broadcast %cst_60 : f32 to vector<8x1024xf32>
    %83 = arith.maximumf %81, %82 : vector<8x1024xf32>
    %c33_i32_61 = arith.constant 33 : i32
    %84 = tpu.dynamic_rotate %83 by %c33_i32_61 dim 1 : vector<8x1024xf32>, i32 -> vector<8x1024xf32>
    %c0_62 = arith.constant 0 : index
    %c0_63 = arith.constant 0 : index
    %c0_64 = arith.constant 0 : index
    %85 = vector.load %arg6[%c0_62, %c0_63, %c0_64] : memref<9x8x1024xf32, #tpu.memory_space<vmem>>, vector<1x8x1024xf32>
    %86 = vector.shape_cast %85 : vector<1x8x1024xf32> to vector<8x1024xf32>
    %87 = arith.mulf %84, %86 : vector<8x1024xf32>
    %c0_65 = arith.constant 0 : index
    %c0_66 = arith.constant 0 : index
    %88 = vector.load %arg10[%c0_65, %c0_66] : memref<72x1024xf32, #tpu.memory_space<vmem>>, vector<8x1024xf32>
    tpu.vector_store %arg10[%c0_65, %c0_66], %87 {strides = array<i32>} : memref<72x1024xf32, #tpu.memory_space<vmem>>, vector<8x1024xf32>,
    %c32_i32_67 = arith.constant 32 : i32
    %89 = tpu.dynamic_rotate %83 by %c32_i32_67 dim 1 : vector<8x1024xf32>, i32 -> vector<8x1024xf32>
    %c1_68 = arith.constant 1 : index
    %c0_69 = arith.constant 0 : index
    %c0_70 = arith.constant 0 : index
    %90 = vector.load %arg6[%c1_68, %c0_69, %c0_70] : memref<9x8x1024xf32, #tpu.memory_space<vmem>>, vector<1x8x1024xf32>
    %91 = vector.shape_cast %90 : vector<1x8x1024xf32> to vector<8x1024xf32>
    %92 = arith.mulf %89, %91 : vector<8x1024xf32>
    %c8_71 = arith.constant 8 : index
    %c0_72 = arith.constant 0 : index
    %93 = vector.load %arg10[%c8_71, %c0_72] : memref<72x1024xf32, #tpu.memory_space<vmem>>, vector<8x1024xf32>
    tpu.vector_store %arg10[%c8_71, %c0_72], %92 {strides = array<i32>} : memref<72x1024xf32, #tpu.memory_space<vmem>>, vector<8x1024xf32>,
    %c31_i32_73 = arith.constant 31 : i32
    %94 = tpu.dynamic_rotate %83 by %c31_i32_73 dim 1 : vector<8x1024xf32>, i32 -> vector<8x1024xf32>
    %c2_74 = arith.constant 2 : index
    %c0_75 = arith.constant 0 : index
    %c0_76 = arith.constant 0 : index
    %95 = vector.load %arg6[%c2_74, %c0_75, %c0_76] : memref<9x8x1024xf32, #tpu.memory_space<vmem>>, vector<1x8x1024xf32>
    %96 = vector.shape_cast %95 : vector<1x8x1024xf32> to vector<8x1024xf32>
    %97 = arith.mulf %94, %96 : vector<8x1024xf32>
    %c16_77 = arith.constant 16 : index
    %c0_78 = arith.constant 0 : index
    %98 = vector.load %arg10[%c16_77, %c0_78] : memref<72x1024xf32, #tpu.memory_space<vmem>>, vector<8x1024xf32>
    tpu.vector_store %arg10[%c16_77, %c0_78], %97 {strides = array<i32>} : memref<72x1024xf32, #tpu.memory_space<vmem>>, vector<8x1024xf32>,
    %c1_i32_79 = arith.constant 1 : i32
    %99 = tpu.dynamic_rotate %83 by %c1_i32_79 dim 1 : vector<8x1024xf32>, i32 -> vector<8x1024xf32>
    %c3_80 = arith.constant 3 : index
    %c0_81 = arith.constant 0 : index
    %c0_82 = arith.constant 0 : index
    %100 = vector.load %arg6[%c3_80, %c0_81, %c0_82] : memref<9x8x1024xf32, #tpu.memory_space<vmem>>, vector<1x8x1024xf32>
    %101 = vector.shape_cast %100 : vector<1x8x1024xf32> to vector<8x1024xf32>
    %102 = arith.mulf %99, %101 : vector<8x1024xf32>
    %c24_83 = arith.constant 24 : index
    %c0_84 = arith.constant 0 : index
    %103 = vector.load %arg10[%c24_83, %c0_84] : memref<72x1024xf32, #tpu.memory_space<vmem>>, vector<8x1024xf32>
    tpu.vector_store %arg10[%c24_83, %c0_84], %102 {strides = array<i32>} : memref<72x1024xf32, #tpu.memory_space<vmem>>, vector<8x1024xf32>,
    %c4_85 = arith.constant 4 : index
    %c0_86 = arith.constant 0 : index
    %c0_87 = arith.constant 0 : index
    %104 = vector.load %arg6[%c4_85, %c0_86, %c0_87] : memref<9x8x1024xf32, #tpu.memory_space<vmem>>, vector<1x8x1024xf32>
    %105 = vector.shape_cast %104 : vector<1x8x1024xf32> to vector<8x1024xf32>
    %106 = arith.mulf %83, %105 : vector<8x1024xf32>
    %c32_88 = arith.constant 32 : index
    %c0_89 = arith.constant 0 : index
    %107 = vector.load %arg10[%c32_88, %c0_89] : memref<72x1024xf32, #tpu.memory_space<vmem>>, vector<8x1024xf32>
    tpu.vector_store %arg10[%c32_88, %c0_89], %106 {strides = array<i32>} : memref<72x1024xf32, #tpu.memory_space<vmem>>, vector<8x1024xf32>,
    %c1023_i32_90 = arith.constant 1023 : i32
    %108 = tpu.dynamic_rotate %83 by %c1023_i32_90 dim 1 : vector<8x1024xf32>, i32 -> vector<8x1024xf32>
    %c5_91 = arith.constant 5 : index
    %c0_92 = arith.constant 0 : index
    %c0_93 = arith.constant 0 : index
    %109 = vector.load %arg6[%c5_91, %c0_92, %c0_93] : memref<9x8x1024xf32, #tpu.memory_space<vmem>>, vector<1x8x1024xf32>
    %110 = vector.shape_cast %109 : vector<1x8x1024xf32> to vector<8x1024xf32>
    %111 = arith.mulf %108, %110 : vector<8x1024xf32>
    %c40_94 = arith.constant 40 : index
    %c0_95 = arith.constant 0 : index
    %112 = vector.load %arg10[%c40_94, %c0_95] : memref<72x1024xf32, #tpu.memory_space<vmem>>, vector<8x1024xf32>
    tpu.vector_store %arg10[%c40_94, %c0_95], %111 {strides = array<i32>} : memref<72x1024xf32, #tpu.memory_space<vmem>>, vector<8x1024xf32>,
    %c993_i32_96 = arith.constant 993 : i32
    %113 = tpu.dynamic_rotate %83 by %c993_i32_96 dim 1 : vector<8x1024xf32>, i32 -> vector<8x1024xf32>
    %c6_97 = arith.constant 6 : index
    %c0_98 = arith.constant 0 : index
    %c0_99 = arith.constant 0 : index
    %114 = vector.load %arg6[%c6_97, %c0_98, %c0_99] : memref<9x8x1024xf32, #tpu.memory_space<vmem>>, vector<1x8x1024xf32>
    %115 = vector.shape_cast %114 : vector<1x8x1024xf32> to vector<8x1024xf32>
    %116 = arith.mulf %113, %115 : vector<8x1024xf32>
    %c48_100 = arith.constant 48 : index
    %c0_101 = arith.constant 0 : index
    %117 = vector.load %arg10[%c48_100, %c0_101] : memref<72x1024xf32, #tpu.memory_space<vmem>>, vector<8x1024xf32>
    tpu.vector_store %arg10[%c48_100, %c0_101], %116 {strides = array<i32>} : memref<72x1024xf32, #tpu.memory_space<vmem>>, vector<8x1024xf32>,
    %c992_i32_102 = arith.constant 992 : i32
    %118 = tpu.dynamic_rotate %83 by %c992_i32_102 dim 1 : vector<8x1024xf32>, i32 -> vector<8x1024xf32>
    %c7_103 = arith.constant 7 : index
    %c0_104 = arith.constant 0 : index
    %c0_105 = arith.constant 0 : index
    %119 = vector.load %arg6[%c7_103, %c0_104, %c0_105] : memref<9x8x1024xf32, #tpu.memory_space<vmem>>, vector<1x8x1024xf32>
    %120 = vector.shape_cast %119 : vector<1x8x1024xf32> to vector<8x1024xf32>
    %121 = arith.mulf %118, %120 : vector<8x1024xf32>
    %c56_106 = arith.constant 56 : index
    %c0_107 = arith.constant 0 : index
    %122 = vector.load %arg10[%c56_106, %c0_107] : memref<72x1024xf32, #tpu.memory_space<vmem>>, vector<8x1024xf32>
    tpu.vector_store %arg10[%c56_106, %c0_107], %121 {strides = array<i32>} : memref<72x1024xf32, #tpu.memory_space<vmem>>, vector<8x1024xf32>,
    %c991_i32_108 = arith.constant 991 : i32
    %123 = tpu.dynamic_rotate %83 by %c991_i32_108 dim 1 : vector<8x1024xf32>, i32 -> vector<8x1024xf32>
    %c8_109 = arith.constant 8 : index
    %c0_110 = arith.constant 0 : index
    %c0_111 = arith.constant 0 : index
    %124 = vector.load %arg6[%c8_109, %c0_110, %c0_111] : memref<9x8x1024xf32, #tpu.memory_space<vmem>>, vector<1x8x1024xf32>
    %125 = vector.shape_cast %124 : vector<1x8x1024xf32> to vector<8x1024xf32>
    %126 = arith.mulf %123, %125 : vector<8x1024xf32>
    %c64_112 = arith.constant 64 : index
    %c0_113 = arith.constant 0 : index
    %127 = vector.load %arg10[%c64_112, %c0_113] : memref<72x1024xf32, #tpu.memory_space<vmem>>, vector<8x1024xf32>
    tpu.vector_store %arg10[%c64_112, %c0_113], %126 {strides = array<i32>} : memref<72x1024xf32, #tpu.memory_space<vmem>>, vector<8x1024xf32>,
    %c1_114 = arith.constant 1 : index
    %c0_115 = arith.constant 0 : index
    %c0_116 = arith.constant 0 : index
    %128 = vector.load %arg5[%c1_114, %c0_115, %c0_116] : memref<4x8x72xf32, #tpu.memory_space<vmem>>, vector<1x8x72xf32>
    %129 = vector.shape_cast %128 : vector<1x8x72xf32> to vector<8x72xf32>
    %c0_117 = arith.constant 0 : index
    %c0_118 = arith.constant 0 : index
    %130 = vector.load %arg10[%c0_117, %c0_118] : memref<72x1024xf32, #tpu.memory_space<vmem>>, vector<72x1024xf32>
    %cst_119 = arith.constant dense<0.000000e+00> : vector<8x1024xf32>
    %131 = tpu.matmul %129, %130, %cst_119 {dimension_numbers = #tpu.dot_dimension_numbers<[1], [0], [0], [1], [0, 0, 1, 1], [], []>} : vector<8x72xf32>, vector<72x1024xf32>, vector<8x1024xf32> -> vector<8x1024xf32>
    %c1_120 = arith.constant 1 : index
    %c0_121 = arith.constant 0 : index
    %c0_122 = arith.constant 0 : index
    %132 = vector.load %arg7[%c1_120, %c0_121, %c0_122] : memref<4x8x1xf32, #tpu.memory_space<vmem>>, vector<1x8x1xf32>
    %133 = vector.shape_cast %132 : vector<1x8x1xf32> to vector<8x1xf32>
    %134 = vector.broadcast %133 : vector<8x1xf32> to vector<8x1024xf32>
    %135 = arith.mulf %131, %134 : vector<8x1024xf32>
    %c1_123 = arith.constant 1 : index
    %c0_124 = arith.constant 0 : index
    %c0_125 = arith.constant 0 : index
    %136 = vector.load %arg8[%c1_123, %c0_124, %c0_125] : memref<4x8x1xf32, #tpu.memory_space<vmem>>, vector<1x8x1xf32>
    %137 = vector.shape_cast %136 : vector<1x8x1xf32> to vector<8x1xf32>
    %138 = vector.broadcast %137 : vector<8x1xf32> to vector<8x1024xf32>
    %139 = arith.addf %135, %138 : vector<8x1024xf32>
    %cst_126 = arith.constant 0.000000e+00 : f32
    %140 = vector.broadcast %cst_126 : f32 to vector<8x1024xf32>
    %141 = arith.maximumf %139, %140 : vector<8x1024xf32>
    %c33_i32_127 = arith.constant 33 : i32
    %142 = tpu.dynamic_rotate %141 by %c33_i32_127 dim 1 : vector<8x1024xf32>, i32 -> vector<8x1024xf32>
    %c0_128 = arith.constant 0 : index
    %c0_129 = arith.constant 0 : index
    %c0_130 = arith.constant 0 : index
    %143 = vector.load %arg6[%c0_128, %c0_129, %c0_130] : memref<9x8x1024xf32, #tpu.memory_space<vmem>>, vector<1x8x1024xf32>
    %144 = vector.shape_cast %143 : vector<1x8x1024xf32> to vector<8x1024xf32>
    %145 = arith.mulf %142, %144 : vector<8x1024xf32>
    %c0_131 = arith.constant 0 : index
    %c0_132 = arith.constant 0 : index
    %146 = vector.load %arg10[%c0_131, %c0_132] : memref<72x1024xf32, #tpu.memory_space<vmem>>, vector<8x1024xf32>
    tpu.vector_store %arg10[%c0_131, %c0_132], %145 {strides = array<i32>} : memref<72x1024xf32, #tpu.memory_space<vmem>>, vector<8x1024xf32>,
    %c32_i32_133 = arith.constant 32 : i32
    %147 = tpu.dynamic_rotate %141 by %c32_i32_133 dim 1 : vector<8x1024xf32>, i32 -> vector<8x1024xf32>
    %c1_134 = arith.constant 1 : index
    %c0_135 = arith.constant 0 : index
    %c0_136 = arith.constant 0 : index
    %148 = vector.load %arg6[%c1_134, %c0_135, %c0_136] : memref<9x8x1024xf32, #tpu.memory_space<vmem>>, vector<1x8x1024xf32>
    %149 = vector.shape_cast %148 : vector<1x8x1024xf32> to vector<8x1024xf32>
    %150 = arith.mulf %147, %149 : vector<8x1024xf32>
    %c8_137 = arith.constant 8 : index
    %c0_138 = arith.constant 0 : index
    %151 = vector.load %arg10[%c8_137, %c0_138] : memref<72x1024xf32, #tpu.memory_space<vmem>>, vector<8x1024xf32>
    tpu.vector_store %arg10[%c8_137, %c0_138], %150 {strides = array<i32>} : memref<72x1024xf32, #tpu.memory_space<vmem>>, vector<8x1024xf32>,
    %c31_i32_139 = arith.constant 31 : i32
    %152 = tpu.dynamic_rotate %141 by %c31_i32_139 dim 1 : vector<8x1024xf32>, i32 -> vector<8x1024xf32>
    %c2_140 = arith.constant 2 : index
    %c0_141 = arith.constant 0 : index
    %c0_142 = arith.constant 0 : index
    %153 = vector.load %arg6[%c2_140, %c0_141, %c0_142] : memref<9x8x1024xf32, #tpu.memory_space<vmem>>, vector<1x8x1024xf32>
    %154 = vector.shape_cast %153 : vector<1x8x1024xf32> to vector<8x1024xf32>
    %155 = arith.mulf %152, %154 : vector<8x1024xf32>
    %c16_143 = arith.constant 16 : index
    %c0_144 = arith.constant 0 : index
    %156 = vector.load %arg10[%c16_143, %c0_144] : memref<72x1024xf32, #tpu.memory_space<vmem>>, vector<8x1024xf32>
    tpu.vector_store %arg10[%c16_143, %c0_144], %155 {strides = array<i32>} : memref<72x1024xf32, #tpu.memory_space<vmem>>, vector<8x1024xf32>,
    %c1_i32_145 = arith.constant 1 : i32
    %157 = tpu.dynamic_rotate %141 by %c1_i32_145 dim 1 : vector<8x1024xf32>, i32 -> vector<8x1024xf32>
    %c3_146 = arith.constant 3 : index
    %c0_147 = arith.constant 0 : index
    %c0_148 = arith.constant 0 : index
    %158 = vector.load %arg6[%c3_146, %c0_147, %c0_148] : memref<9x8x1024xf32, #tpu.memory_space<vmem>>, vector<1x8x1024xf32>
    %159 = vector.shape_cast %158 : vector<1x8x1024xf32> to vector<8x1024xf32>
    %160 = arith.mulf %157, %159 : vector<8x1024xf32>
    %c24_149 = arith.constant 24 : index
    %c0_150 = arith.constant 0 : index
    %161 = vector.load %arg10[%c24_149, %c0_150] : memref<72x1024xf32, #tpu.memory_space<vmem>>, vector<8x1024xf32>
    tpu.vector_store %arg10[%c24_149, %c0_150], %160 {strides = array<i32>} : memref<72x1024xf32, #tpu.memory_space<vmem>>, vector<8x1024xf32>,
    %c4_151 = arith.constant 4 : index
    %c0_152 = arith.constant 0 : index
    %c0_153 = arith.constant 0 : index
    %162 = vector.load %arg6[%c4_151, %c0_152, %c0_153] : memref<9x8x1024xf32, #tpu.memory_space<vmem>>, vector<1x8x1024xf32>
    %163 = vector.shape_cast %162 : vector<1x8x1024xf32> to vector<8x1024xf32>
    %164 = arith.mulf %141, %163 : vector<8x1024xf32>
    %c32_154 = arith.constant 32 : index
    %c0_155 = arith.constant 0 : index
    %165 = vector.load %arg10[%c32_154, %c0_155] : memref<72x1024xf32, #tpu.memory_space<vmem>>, vector<8x1024xf32>
    tpu.vector_store %arg10[%c32_154, %c0_155], %164 {strides = array<i32>} : memref<72x1024xf32, #tpu.memory_space<vmem>>, vector<8x1024xf32>,
    %c1023_i32_156 = arith.constant 1023 : i32
    %166 = tpu.dynamic_rotate %141 by %c1023_i32_156 dim 1 : vector<8x1024xf32>, i32 -> vector<8x1024xf32>
    %c5_157 = arith.constant 5 : index
    %c0_158 = arith.constant 0 : index
    %c0_159 = arith.constant 0 : index
    %167 = vector.load %arg6[%c5_157, %c0_158, %c0_159] : memref<9x8x1024xf32, #tpu.memory_space<vmem>>, vector<1x8x1024xf32>
    %168 = vector.shape_cast %167 : vector<1x8x1024xf32> to vector<8x1024xf32>
    %169 = arith.mulf %166, %168 : vector<8x1024xf32>
    %c40_160 = arith.constant 40 : index
    %c0_161 = arith.constant 0 : index
    %170 = vector.load %arg10[%c40_160, %c0_161] : memref<72x1024xf32, #tpu.memory_space<vmem>>, vector<8x1024xf32>
    tpu.vector_store %arg10[%c40_160, %c0_161], %169 {strides = array<i32>} : memref<72x1024xf32, #tpu.memory_space<vmem>>, vector<8x1024xf32>,
    %c993_i32_162 = arith.constant 993 : i32
    %171 = tpu.dynamic_rotate %141 by %c993_i32_162 dim 1 : vector<8x1024xf32>, i32 -> vector<8x1024xf32>
    %c6_163 = arith.constant 6 : index
    %c0_164 = arith.constant 0 : index
    %c0_165 = arith.constant 0 : index
    %172 = vector.load %arg6[%c6_163, %c0_164, %c0_165] : memref<9x8x1024xf32, #tpu.memory_space<vmem>>, vector<1x8x1024xf32>
    %173 = vector.shape_cast %172 : vector<1x8x1024xf32> to vector<8x1024xf32>
    %174 = arith.mulf %171, %173 : vector<8x1024xf32>
    %c48_166 = arith.constant 48 : index
    %c0_167 = arith.constant 0 : index
    %175 = vector.load %arg10[%c48_166, %c0_167] : memref<72x1024xf32, #tpu.memory_space<vmem>>, vector<8x1024xf32>
    tpu.vector_store %arg10[%c48_166, %c0_167], %174 {strides = array<i32>} : memref<72x1024xf32, #tpu.memory_space<vmem>>, vector<8x1024xf32>,
    %c992_i32_168 = arith.constant 992 : i32
    %176 = tpu.dynamic_rotate %141 by %c992_i32_168 dim 1 : vector<8x1024xf32>, i32 -> vector<8x1024xf32>
    %c7_169 = arith.constant 7 : index
    %c0_170 = arith.constant 0 : index
    %c0_171 = arith.constant 0 : index
    %177 = vector.load %arg6[%c7_169, %c0_170, %c0_171] : memref<9x8x1024xf32, #tpu.memory_space<vmem>>, vector<1x8x1024xf32>
    %178 = vector.shape_cast %177 : vector<1x8x1024xf32> to vector<8x1024xf32>
    %179 = arith.mulf %176, %178 : vector<8x1024xf32>
    %c56_172 = arith.constant 56 : index
    %c0_173 = arith.constant 0 : index
    %180 = vector.load %arg10[%c56_172, %c0_173] : memref<72x1024xf32, #tpu.memory_space<vmem>>, vector<8x1024xf32>
    tpu.vector_store %arg10[%c56_172, %c0_173], %179 {strides = array<i32>} : memref<72x1024xf32, #tpu.memory_space<vmem>>, vector<8x1024xf32>,
    %c991_i32_174 = arith.constant 991 : i32
    %181 = tpu.dynamic_rotate %141 by %c991_i32_174 dim 1 : vector<8x1024xf32>, i32 -> vector<8x1024xf32>
    %c8_175 = arith.constant 8 : index
    %c0_176 = arith.constant 0 : index
    %c0_177 = arith.constant 0 : index
    %182 = vector.load %arg6[%c8_175, %c0_176, %c0_177] : memref<9x8x1024xf32, #tpu.memory_space<vmem>>, vector<1x8x1024xf32>
    %183 = vector.shape_cast %182 : vector<1x8x1024xf32> to vector<8x1024xf32>
    %184 = arith.mulf %181, %183 : vector<8x1024xf32>
    %c64_178 = arith.constant 64 : index
    %c0_179 = arith.constant 0 : index
    %185 = vector.load %arg10[%c64_178, %c0_179] : memref<72x1024xf32, #tpu.memory_space<vmem>>, vector<8x1024xf32>
    tpu.vector_store %arg10[%c64_178, %c0_179], %184 {strides = array<i32>} : memref<72x1024xf32, #tpu.memory_space<vmem>>, vector<8x1024xf32>,
    %c2_180 = arith.constant 2 : index
    %c0_181 = arith.constant 0 : index
    %c0_182 = arith.constant 0 : index
    %186 = vector.load %arg5[%c2_180, %c0_181, %c0_182] : memref<4x8x72xf32, #tpu.memory_space<vmem>>, vector<1x8x72xf32>
    %187 = vector.shape_cast %186 : vector<1x8x72xf32> to vector<8x72xf32>
    %c0_183 = arith.constant 0 : index
    %c0_184 = arith.constant 0 : index
    %188 = vector.load %arg10[%c0_183, %c0_184] : memref<72x1024xf32, #tpu.memory_space<vmem>>, vector<72x1024xf32>
    %cst_185 = arith.constant dense<0.000000e+00> : vector<8x1024xf32>
    %189 = tpu.matmul %187, %188, %cst_185 {dimension_numbers = #tpu.dot_dimension_numbers<[1], [0], [0], [1], [0, 0, 1, 1], [], []>} : vector<8x72xf32>, vector<72x1024xf32>, vector<8x1024xf32> -> vector<8x1024xf32>
    %c2_186 = arith.constant 2 : index
    %c0_187 = arith.constant 0 : index
    %c0_188 = arith.constant 0 : index
    %190 = vector.load %arg7[%c2_186, %c0_187, %c0_188] : memref<4x8x1xf32, #tpu.memory_space<vmem>>, vector<1x8x1xf32>
    %191 = vector.shape_cast %190 : vector<1x8x1xf32> to vector<8x1xf32>
    %192 = vector.broadcast %191 : vector<8x1xf32> to vector<8x1024xf32>
    %193 = arith.mulf %189, %192 : vector<8x1024xf32>
    %c2_189 = arith.constant 2 : index
    %c0_190 = arith.constant 0 : index
    %c0_191 = arith.constant 0 : index
    %194 = vector.load %arg8[%c2_189, %c0_190, %c0_191] : memref<4x8x1xf32, #tpu.memory_space<vmem>>, vector<1x8x1xf32>
    %195 = vector.shape_cast %194 : vector<1x8x1xf32> to vector<8x1xf32>
    %196 = vector.broadcast %195 : vector<8x1xf32> to vector<8x1024xf32>
    %197 = arith.addf %193, %196 : vector<8x1024xf32>
    %cst_192 = arith.constant 0.000000e+00 : f32
    %198 = vector.broadcast %cst_192 : f32 to vector<8x1024xf32>
    %199 = arith.maximumf %197, %198 : vector<8x1024xf32>
    %c33_i32_193 = arith.constant 33 : i32
    %200 = tpu.dynamic_rotate %199 by %c33_i32_193 dim 1 : vector<8x1024xf32>, i32 -> vector<8x1024xf32>
    %c0_194 = arith.constant 0 : index
    %c0_195 = arith.constant 0 : index
    %c0_196 = arith.constant 0 : index
    %201 = vector.load %arg6[%c0_194, %c0_195, %c0_196] : memref<9x8x1024xf32, #tpu.memory_space<vmem>>, vector<1x8x1024xf32>
    %202 = vector.shape_cast %201 : vector<1x8x1024xf32> to vector<8x1024xf32>
    %203 = arith.mulf %200, %202 : vector<8x1024xf32>
    %c0_197 = arith.constant 0 : index
    %c0_198 = arith.constant 0 : index
    %204 = vector.load %arg10[%c0_197, %c0_198] : memref<72x1024xf32, #tpu.memory_space<vmem>>, vector<8x1024xf32>
    tpu.vector_store %arg10[%c0_197, %c0_198], %203 {strides = array<i32>} : memref<72x1024xf32, #tpu.memory_space<vmem>>, vector<8x1024xf32>,
    %c32_i32_199 = arith.constant 32 : i32
    %205 = tpu.dynamic_rotate %199 by %c32_i32_199 dim 1 : vector<8x1024xf32>, i32 -> vector<8x1024xf32>
    %c1_200 = arith.constant 1 : index
    %c0_201 = arith.constant 0 : index
    %c0_202 = arith.constant 0 : index
    %206 = vector.load %arg6[%c1_200, %c0_201, %c0_202] : memref<9x8x1024xf32, #tpu.memory_space<vmem>>, vector<1x8x1024xf32>
    %207 = vector.shape_cast %206 : vector<1x8x1024xf32> to vector<8x1024xf32>
    %208 = arith.mulf %205, %207 : vector<8x1024xf32>
    %c8_203 = arith.constant 8 : index
    %c0_204 = arith.constant 0 : index
    %209 = vector.load %arg10[%c8_203, %c0_204] : memref<72x1024xf32, #tpu.memory_space<vmem>>, vector<8x1024xf32>
    tpu.vector_store %arg10[%c8_203, %c0_204], %208 {strides = array<i32>} : memref<72x1024xf32, #tpu.memory_space<vmem>>, vector<8x1024xf32>,
    %c31_i32_205 = arith.constant 31 : i32
    %210 = tpu.dynamic_rotate %199 by %c31_i32_205 dim 1 : vector<8x1024xf32>, i32 -> vector<8x1024xf32>
    %c2_206 = arith.constant 2 : index
    %c0_207 = arith.constant 0 : index
    %c0_208 = arith.constant 0 : index
    %211 = vector.load %arg6[%c2_206, %c0_207, %c0_208] : memref<9x8x1024xf32, #tpu.memory_space<vmem>>, vector<1x8x1024xf32>
    %212 = vector.shape_cast %211 : vector<1x8x1024xf32> to vector<8x1024xf32>
    %213 = arith.mulf %210, %212 : vector<8x1024xf32>
    %c16_209 = arith.constant 16 : index
    %c0_210 = arith.constant 0 : index
    %214 = vector.load %arg10[%c16_209, %c0_210] : memref<72x1024xf32, #tpu.memory_space<vmem>>, vector<8x1024xf32>
    tpu.vector_store %arg10[%c16_209, %c0_210], %213 {strides = array<i32>} : memref<72x1024xf32, #tpu.memory_space<vmem>>, vector<8x1024xf32>,
    %c1_i32_211 = arith.constant 1 : i32
    %215 = tpu.dynamic_rotate %199 by %c1_i32_211 dim 1 : vector<8x1024xf32>, i32 -> vector<8x1024xf32>
    %c3_212 = arith.constant 3 : index
    %c0_213 = arith.constant 0 : index
    %c0_214 = arith.constant 0 : index
    %216 = vector.load %arg6[%c3_212, %c0_213, %c0_214] : memref<9x8x1024xf32, #tpu.memory_space<vmem>>, vector<1x8x1024xf32>
    %217 = vector.shape_cast %216 : vector<1x8x1024xf32> to vector<8x1024xf32>
    %218 = arith.mulf %215, %217 : vector<8x1024xf32>
    %c24_215 = arith.constant 24 : index
    %c0_216 = arith.constant 0 : index
    %219 = vector.load %arg10[%c24_215, %c0_216] : memref<72x1024xf32, #tpu.memory_space<vmem>>, vector<8x1024xf32>
    tpu.vector_store %arg10[%c24_215, %c0_216], %218 {strides = array<i32>} : memref<72x1024xf32, #tpu.memory_space<vmem>>, vector<8x1024xf32>,
    %c4_217 = arith.constant 4 : index
    %c0_218 = arith.constant 0 : index
    %c0_219 = arith.constant 0 : index
    %220 = vector.load %arg6[%c4_217, %c0_218, %c0_219] : memref<9x8x1024xf32, #tpu.memory_space<vmem>>, vector<1x8x1024xf32>
    %221 = vector.shape_cast %220 : vector<1x8x1024xf32> to vector<8x1024xf32>
    %222 = arith.mulf %199, %221 : vector<8x1024xf32>
    %c32_220 = arith.constant 32 : index
    %c0_221 = arith.constant 0 : index
    %223 = vector.load %arg10[%c32_220, %c0_221] : memref<72x1024xf32, #tpu.memory_space<vmem>>, vector<8x1024xf32>
    tpu.vector_store %arg10[%c32_220, %c0_221], %222 {strides = array<i32>} : memref<72x1024xf32, #tpu.memory_space<vmem>>, vector<8x1024xf32>,
    %c1023_i32_222 = arith.constant 1023 : i32
    %224 = tpu.dynamic_rotate %199 by %c1023_i32_222 dim 1 : vector<8x1024xf32>, i32 -> vector<8x1024xf32>
    %c5_223 = arith.constant 5 : index
    %c0_224 = arith.constant 0 : index
    %c0_225 = arith.constant 0 : index
    %225 = vector.load %arg6[%c5_223, %c0_224, %c0_225] : memref<9x8x1024xf32, #tpu.memory_space<vmem>>, vector<1x8x1024xf32>
    %226 = vector.shape_cast %225 : vector<1x8x1024xf32> to vector<8x1024xf32>
    %227 = arith.mulf %224, %226 : vector<8x1024xf32>
    %c40_226 = arith.constant 40 : index
    %c0_227 = arith.constant 0 : index
    %228 = vector.load %arg10[%c40_226, %c0_227] : memref<72x1024xf32, #tpu.memory_space<vmem>>, vector<8x1024xf32>
    tpu.vector_store %arg10[%c40_226, %c0_227], %227 {strides = array<i32>} : memref<72x1024xf32, #tpu.memory_space<vmem>>, vector<8x1024xf32>,
    %c993_i32_228 = arith.constant 993 : i32
    %229 = tpu.dynamic_rotate %199 by %c993_i32_228 dim 1 : vector<8x1024xf32>, i32 -> vector<8x1024xf32>
    %c6_229 = arith.constant 6 : index
    %c0_230 = arith.constant 0 : index
    %c0_231 = arith.constant 0 : index
    %230 = vector.load %arg6[%c6_229, %c0_230, %c0_231] : memref<9x8x1024xf32, #tpu.memory_space<vmem>>, vector<1x8x1024xf32>
    %231 = vector.shape_cast %230 : vector<1x8x1024xf32> to vector<8x1024xf32>
    %232 = arith.mulf %229, %231 : vector<8x1024xf32>
    %c48_232 = arith.constant 48 : index
    %c0_233 = arith.constant 0 : index
    %233 = vector.load %arg10[%c48_232, %c0_233] : memref<72x1024xf32, #tpu.memory_space<vmem>>, vector<8x1024xf32>
    tpu.vector_store %arg10[%c48_232, %c0_233], %232 {strides = array<i32>} : memref<72x1024xf32, #tpu.memory_space<vmem>>, vector<8x1024xf32>,
    %c992_i32_234 = arith.constant 992 : i32
    %234 = tpu.dynamic_rotate %199 by %c992_i32_234 dim 1 : vector<8x1024xf32>, i32 -> vector<8x1024xf32>
    %c7_235 = arith.constant 7 : index
    %c0_236 = arith.constant 0 : index
    %c0_237 = arith.constant 0 : index
    %235 = vector.load %arg6[%c7_235, %c0_236, %c0_237] : memref<9x8x1024xf32, #tpu.memory_space<vmem>>, vector<1x8x1024xf32>
    %236 = vector.shape_cast %235 : vector<1x8x1024xf32> to vector<8x1024xf32>
    %237 = arith.mulf %234, %236 : vector<8x1024xf32>
    %c56_238 = arith.constant 56 : index
    %c0_239 = arith.constant 0 : index
    %238 = vector.load %arg10[%c56_238, %c0_239] : memref<72x1024xf32, #tpu.memory_space<vmem>>, vector<8x1024xf32>
    tpu.vector_store %arg10[%c56_238, %c0_239], %237 {strides = array<i32>} : memref<72x1024xf32, #tpu.memory_space<vmem>>, vector<8x1024xf32>,
    %c991_i32_240 = arith.constant 991 : i32
    %239 = tpu.dynamic_rotate %199 by %c991_i32_240 dim 1 : vector<8x1024xf32>, i32 -> vector<8x1024xf32>
    %c8_241 = arith.constant 8 : index
    %c0_242 = arith.constant 0 : index
    %c0_243 = arith.constant 0 : index
    %240 = vector.load %arg6[%c8_241, %c0_242, %c0_243] : memref<9x8x1024xf32, #tpu.memory_space<vmem>>, vector<1x8x1024xf32>
    %241 = vector.shape_cast %240 : vector<1x8x1024xf32> to vector<8x1024xf32>
    %242 = arith.mulf %239, %241 : vector<8x1024xf32>
    %c64_244 = arith.constant 64 : index
    %c0_245 = arith.constant 0 : index
    %243 = vector.load %arg10[%c64_244, %c0_245] : memref<72x1024xf32, #tpu.memory_space<vmem>>, vector<8x1024xf32>
    tpu.vector_store %arg10[%c64_244, %c0_245], %242 {strides = array<i32>} : memref<72x1024xf32, #tpu.memory_space<vmem>>, vector<8x1024xf32>,
    %c3_246 = arith.constant 3 : index
    %c0_247 = arith.constant 0 : index
    %c0_248 = arith.constant 0 : index
    %244 = vector.load %arg5[%c3_246, %c0_247, %c0_248] : memref<4x8x72xf32, #tpu.memory_space<vmem>>, vector<1x8x72xf32>
    %245 = vector.shape_cast %244 : vector<1x8x72xf32> to vector<8x72xf32>
    %c0_249 = arith.constant 0 : index
    %c0_250 = arith.constant 0 : index
    %246 = vector.load %arg10[%c0_249, %c0_250] : memref<72x1024xf32, #tpu.memory_space<vmem>>, vector<72x1024xf32>
    %cst_251 = arith.constant dense<0.000000e+00> : vector<8x1024xf32>
    %247 = tpu.matmul %245, %246, %cst_251 {dimension_numbers = #tpu.dot_dimension_numbers<[1], [0], [0], [1], [0, 0, 1, 1], [], []>} : vector<8x72xf32>, vector<72x1024xf32>, vector<8x1024xf32> -> vector<8x1024xf32>
    %c3_252 = arith.constant 3 : index
    %c0_253 = arith.constant 0 : index
    %c0_254 = arith.constant 0 : index
    %248 = vector.load %arg7[%c3_252, %c0_253, %c0_254] : memref<4x8x1xf32, #tpu.memory_space<vmem>>, vector<1x8x1xf32>
    %249 = vector.shape_cast %248 : vector<1x8x1xf32> to vector<8x1xf32>
    %250 = vector.broadcast %249 : vector<8x1xf32> to vector<8x1024xf32>
    %251 = arith.mulf %247, %250 : vector<8x1024xf32>
    %c3_255 = arith.constant 3 : index
    %c0_256 = arith.constant 0 : index
    %c0_257 = arith.constant 0 : index
    %252 = vector.load %arg8[%c3_255, %c0_256, %c0_257] : memref<4x8x1xf32, #tpu.memory_space<vmem>>, vector<1x8x1xf32>
    %253 = vector.shape_cast %252 : vector<1x8x1xf32> to vector<8x1xf32>
    %254 = vector.broadcast %253 : vector<8x1xf32> to vector<8x1024xf32>
    %255 = arith.addf %251, %254 : vector<8x1024xf32>
    %cst_258 = arith.constant 0.000000e+00 : f32
    %256 = vector.broadcast %cst_258 : f32 to vector<8x1024xf32>
    %257 = arith.maximumf %255, %256 : vector<8x1024xf32>
    %c0_259 = arith.constant 0 : index
    %c0_260 = arith.constant 0 : index
    %c0_261 = arith.constant 0 : index
    %258 = vector.load %arg9[%c0_259, %c0_260, %c0_261] : memref<1x8x1024xf32, #tpu.memory_space<vmem>>, vector<1x8x1024xf32>
    %259 = vector.shape_cast %258 : vector<1x8x1024xf32> to vector<8x1024xf32>
    %260 = vector.shape_cast %257 : vector<8x1024xf32> to vector<1x8x1024xf32>
    tpu.vector_store %arg9[%c0_259, %c0_260, %c0_261], %260 {strides = array<i32>} : memref<1x8x1024xf32, #tpu.memory_space<vmem>>, vector<1x8x1024xf32>,
    return
  }
  func.func @transform_0(%arg0: i32) -> (i32, i32, i32) {
    %c0_i32 = arith.constant 0 : i32
    %c0_i32_0 = arith.constant 0 : i32
    %c0_i32_1 = arith.constant 0 : i32
    return %arg0, %c0_i32, %c0_i32_0 : i32, i32, i32
  }
  func.func @transform_1(%arg0: i32) -> (i32, i32) {
    %c0_i32 = arith.constant 0 : i32
    %c0_i32_0 = arith.constant 0 : i32
    %c0_i32_1 = arith.constant 0 : i32
    return %c0_i32, %c0_i32_0 : i32, i32
  }
  func.func @transform_2(%arg0: i32) -> (i32, i32) {
    %c0_i32 = arith.constant 0 : i32
    %c0_i32_0 = arith.constant 0 : i32
    %c0_i32_1 = arith.constant 0 : i32
    return %c0_i32, %c0_i32_0 : i32, i32
  }
  func.func @transform_3(%arg0: i32) -> (i32, i32, i32) {
    %c0_i32 = arith.constant 0 : i32
    %c0_i32_0 = arith.constant 0 : i32
    %c0_i32_1 = arith.constant 0 : i32
    %c0_i32_2 = arith.constant 0 : i32
    return %c0_i32, %c0_i32_0, %c0_i32_1 : i32, i32, i32
  }
  func.func @transform_4(%arg0: i32) -> (i32, i32, i32) {
    %c0_i32 = arith.constant 0 : i32
    %c0_i32_0 = arith.constant 0 : i32
    %c0_i32_1 = arith.constant 0 : i32
    %c0_i32_2 = arith.constant 0 : i32
    return %c0_i32, %c0_i32_0, %c0_i32_1 : i32, i32, i32
  }
  func.func @transform_5(%arg0: i32) -> (i32, i32, i32) {
    %c0_i32 = arith.constant 0 : i32
    %c0_i32_0 = arith.constant 0 : i32
    %c0_i32_1 = arith.constant 0 : i32
    %c0_i32_2 = arith.constant 0 : i32
    return %c0_i32, %c0_i32_0, %c0_i32_1 : i32, i32, i32
  }
  func.func @transform_6(%arg0: i32) -> (i32, i32, i32) {
    %c0_i32 = arith.constant 0 : i32
    %c0_i32_0 = arith.constant 0 : i32
    %c0_i32_1 = arith.constant 0 : i32
    %c0_i32_2 = arith.constant 0 : i32
    return %c0_i32, %c0_i32_0, %c0_i32_1 : i32, i32, i32
  }
  func.func @transform_7(%arg0: i32) -> (i32, i32, i32) {
    %c0_i32 = arith.constant 0 : i32
    %c0_i32_0 = arith.constant 0 : i32
    %c0_i32_1 = arith.constant 0 : i32
    %c0_i32_2 = arith.constant 0 : i32
    return %c0_i32, %c0_i32_0, %c0_i32_1 : i32, i32, i32
  }
  func.func @transform_8(%arg0: i32) -> (i32, i32, i32) {
    %c0_i32 = arith.constant 0 : i32
    %c0_i32_0 = arith.constant 0 : i32
    %c0_i32_1 = arith.constant 0 : i32
    return %arg0, %c0_i32, %c0_i32_0 : i32, i32, i32
  }
}

</mosaic_0001>

<bundles_post_ra>
// kernel: upsample_forward.1
= control target key start
LH: loop header
LB: loop body
LE: loop exit
PB: predicated region body
PF: predicated region fallthrough
CT: control target
= control target key end

     0   :  { %s4805_s27 = smov 0   ;;  %s7868_s0 = inlined_call_operand.vmem [shape: f32[2,4,1024], index: 0, kind: input, shape index: {}]   ;;  %s7869_s1 = inlined_call_operand.vmem [shape: f32[32,4], index: 1, kind: input, shape index: {}]   ;;  %s7870_s2 = inlined_call_operand.vmem [shape: f32[8,1], index: 2, kind: input, shape index: {}]   ;;  %s7871_s3 = inlined_call_operand.vmem [shape: f32[4,8,1024], index: 3, kind: input, shape index: {}]   ;;  %s7872_s4 = inlined_call_operand.vmem [shape: f32[4,8,72], index: 4, kind: input, shape index: {}]   ;;  %s7873_s5 = inlined_call_operand.vmem [shape: f32[9,8,1024], index: 5, kind: input, shape index: {}]   ;;  %s7874_s6 = inlined_call_operand.vmem [shape: f32[4,8,1], index: 6, kind: input, shape index: {}]   ;;  %s7875_s7 = inlined_call_operand.vmem [shape: f32[4,8,1], index: 7, kind: input, shape index: {}]   ;;  %s7876_s8 = inlined_call_operand.vmem [shape: f32[2,8,1024], index: 8, kind: output, shape index: {}]  }
   0x1 LB: > { %s4120_s28 = sadd.s32 4294967295, %s4748_s27   ;;  %p4124_p0 = scmp.ge.s32.totalorder %s4748_s27, 1  ;;  %s4748_s27 = sphi %s4805_s27, %s18_s27  }
   0x2   : > { %p262_p1 = scmp.lt.s32.totalorder %s4748_s27, 3 }
   0x4   : > { %p263_p2 = pnand %p4124_p0, %p262_p1 }
   0x6   : > { %266 = sbr.rel (%p263_p2) target bundleno = 1994 (0x7ca), region = 52 }
   0xd   : > { %p296_p3 = scmp.lt.s32.totalorder %s4120_s28, 1  ;;  %v7877_v0 = vmov 0.0   ;;  %v708_v1 = vld [vmem:[%s7870_s2] sm:$0xff]  ;;  %v4751_v2 = vmov 0   ;;  %vm335_vm0 = vcmask 1043456   ;;  %vm322_vm1 = vcmask 31744  }
   0xe   : > { %416 = vmatprep.mubr.f32.mxu0 %v7877_v0  ;;  %505 = vmatprep.mubr.f32.mxu1 %v7877_v0  ;;  %v310_v9 = vld [vmem:[%s7869_s1] sm:$0xff]  ;;  %v311_v12 = vld [vmem:[%s7869_s1 + $0x8] sm:$0xff]  ;;  %v312_v13 = vld [vmem:[%s7869_s1 + $0x10] sm:$0xff]  ;;  %s4752_s25 = smov 32   ;;  %s4753_s26 = smov 33   ;;  %vm1312_vm10 = vcmask 588800  }
   0xf   : > { %s8222_s28 = smov (!%p296_p3, %s4120_s28), 1  ;;  %4736 = vset.pattern.permute.xlu0 %v4751_v2  ;;  %4737 = vset.pattern.permute.xlu1 %v4751_v2  ;;  %v313_v14 = vld [vmem:[%s7869_s1 + $0x18] sm:$0xff]  ;;  %v709_v17 = vld [vmem:[%s7871_s3] sm:$0xff]  ;;  %v710_v20 = vld [vmem:[%s7871_s3 + $0x8] sm:$0xff]  ;;  %s4754_s15 = smov 31  }
  0x10   : > { %802 = vperm.xlu0 %4736, %v708_v1   ;;  %s4460_s9 = sshll.u32 %s8222_s28, 5  ;;  %v711_v21 = vld [vmem:[%s7871_s3 + $0x10] sm:$0xff]  ;;  %v4153_v22 = vld [vmem:[%s7871_s3 + $0x40] sm:$0xff]  ;;  %v712_v24 = vld [vmem:[%s7871_s3 + $0x18] sm:$0xff]  ;;  %s4755_s24 = smov 1  }
  0x11   : > { %s300_s12 = scalar_lea.vmem %s7868_s0, %s4460_s9  ;;  %v4155_v23 = vld [vmem:[%s7871_s3 + $0x50] sm:$0xff]  ;;  %v4154_v26 = vld [vmem:[%s7871_s3 + $0x48] sm:$0xff]  ;;  %v4156_v27 = vld [vmem:[%s7871_s3 + $0x58] sm:$0xff]  ;;  %s4756_s11 = smov 97  }
  0x12   : > { %v306_v3 = vld [vmem:[%s300_s12] sm:$0xff]  ;;  %v307_v4 = vld [vmem:[%s300_s12 + $0x8] sm:$0xff]  ;;  %v308_v5 = vld [vmem:[%s300_s12 + $0x10] sm:$0xff]  ;;  %s4758_s13 = smov 127   ;;  %s4759_s14 = smov 96  }
  0x13   : > { %v318_v6 = vcombine.high %v306_v3, %v306_v3  ;;  %v319_v7 = vcombine.high %v307_v4, %v307_v4  ;;  %v309_v8 = vld [vmem:[%s300_s12 + $0x18] sm:$0xff]  ;;  %v320_v10 = vcombine.high %v308_v5, %v308_v5  ;;  %v4161_v39 = vld [vmem:[%s7871_s3 + $0x80] sm:$0xff]  ;;  %v4163_v40 = vld [vmem:[%s7871_s3 + $0x90] sm:$0xff]  ;;  %s4757_s12 = smov 95   ;;  %s4461_s22 = sshll.u32 %s8222_s28, 6 }
  0x14   : > { %v321_v11 = vcombine.high %v309_v8, %v309_v8  ;;  %v4162_v43 = vld [vmem:[%s7871_s3 + $0x88] sm:$0xff]  ;;  %v4164_v44 = vld [vmem:[%s7871_s3 + $0x98] sm:$0xff]  ;;  %v4169_v55 = vld [vmem:[%s7871_s3 + $0xc0] sm:$0xff]  ;;  %s7855_s30 = scalar_lea.vmem %s7876_s8, %s4461_s22 }
  0x15   : > { %4129 = vmatprep.subr.msk.mxu0 %vm335_vm0, %v318_v6  ;;  %4135 = vmatprep.subr.msk.mxu1 %vm335_vm0, %v319_v7  ;;  %v4171_v56 = vld [vmem:[%s7871_s3 + $0xd0] sm:$0xff]  ;;  %v4170_v59 = vld [vmem:[%s7871_s3 + $0xc8] sm:$0xff]  ;;  %v4172_v60 = vld [vmem:[%s7871_s3 + $0xd8] sm:$0xff] }
  0x16   : > { %4130 = vmatpush1.msk.msra.mxu0 %vm335_vm0, %v306_v3  ;;  %4136 = vmatpush1.msk.msra.mxu1 %vm335_vm0, %v307_v4 }
  0x17   : > { %4131 = vmatmul.mubr.msk.f32.vlgmr.msra.gmra.mrb[0].mxu0 %vm322_vm1, %v310_v9  ;;  %4137 = vmatmul.mubr.msk.f32.vlgmr.msra.gmra.mrb[0].mxu1 %vm322_vm1, %v310_v9 }
  0x18   : > { %422 = vmatprep.mubr.f32.mxu0 %v7877_v0  ;;  %511 = vmatprep.mubr.f32.mxu1 %v7877_v0 }
  0x19   : > { %4141 = vmatprep.subr.msk.mxu0 %vm335_vm0, %v320_v10  ;;  %4147 = vmatprep.subr.msk.mxu1 %vm335_vm0, %v321_v11 }
  0x1a   : > { %4142 = vmatpush1.msk.msra.mxu0 %vm335_vm0, %v308_v5  ;;  %4148 = vmatpush1.msk.msra.mxu1 %vm335_vm0, %v309_v8 }
  0x1b   : > { %4132 = vmatmul.mubr.msk.f32.gmra.mrb[2].mxu0 %vm322_vm1, %v311_v12  ;;  %4138 = vmatmul.mubr.msk.f32.gmra.mrb[2].mxu1 %vm322_vm1, %v311_v12 }
  0x1c   : > { %428 = vmatprep.mubr.f32.mxu0 %v7877_v0  ;;  %517 = vmatprep.mubr.f32.mxu1 %v7877_v0 }
  0x1f   : > { %4133 = vmatmul.mubr.msk.f32.gmra.mrb[4].mxu0 %vm322_vm1, %v312_v13  ;;  %4139 = vmatmul.mubr.msk.f32.gmra.mrb[4].mxu1 %vm322_vm1, %v312_v13 }
  0x20   : > { %434 = vmatprep.mubr.f32.mxu0 %v7877_v0  ;;  %523 = vmatprep.mubr.f32.mxu1 %v7877_v0 }
  0x23   : > { %4134 = vmatmul.mubr.msk.f32.gmra.mrb[6].mxu0 %vm322_vm1, %v313_v14  ;;  %4140 = vmatmul.mubr.msk.f32.gmra.mrb[6].mxu1 %vm322_vm1, %v313_v14 }
  0x24   : > { %594 = vmatprep.mubr.f32.mxu0 %v7877_v0  ;;  %683 = vmatprep.mubr.f32.mxu1 %v7877_v0 }
  0x27   : > { %4143 = vmatmul.mubr.msk.f32.vlgmr.msra.gmra.mrb[8].mxu0 %vm322_vm1, %v310_v9  ;;  %4149 = vmatmul.mubr.msk.f32.vlgmr.msra.gmra.mrb[8].mxu1 %vm322_vm1, %v310_v9 }
  0x28   : > { %600 = vmatprep.mubr.f32.mxu0 %v7877_v0  ;;  %689 = vmatprep.mubr.f32.mxu1 %v7877_v0 }
  0x2b   : > { %4144 = vmatmul.mubr.msk.f32.gmra.mrb[10].mxu0 %vm322_vm1, %v311_v12  ;;  %4150 = vmatmul.mubr.msk.f32.gmra.mrb[10].mxu1 %vm322_vm1, %v311_v12 }
  0x2c   : > { %606 = vmatprep.mubr.f32.mxu0 %v7877_v0  ;;  %695 = vmatprep.mubr.f32.mxu1 %v7877_v0 }
  0x2f   : > { %4145 = vmatmul.mubr.msk.f32.gmra.mrb[12].mxu0 %vm322_vm1, %v312_v13  ;;  %4151 = vmatmul.mubr.msk.f32.gmra.mrb[12].mxu1 %vm322_vm1, %v312_v13 }
  0x30   : > { %612 = vmatprep.mubr.f32.mxu0 %v7877_v0  ;;  %701 = vmatprep.mubr.f32.mxu1 %v7877_v0 }
  0x33   : > { %4146 = vmatmul.mubr.msk.f32.gmra.mrb[14].mxu0 %vm322_vm1, %v313_v14  ;;  %4152 = vmatmul.mubr.msk.f32.gmra.mrb[14].mxu1 %vm322_vm1, %v313_v14  ;;  %v713_v14 = vld [vmem:[%s7871_s3 + $0x20] sm:$0xff] }
  0x34   : > { %1451 = vmatprep.mubr.f32.mxu1 %v7877_v0  ;;  %1380 = vmatprep.mubr.f32.mxu0 %v7877_v0 }
  0x8f   : > { %v4924_v8 = vpop.permute.xlu0 %802 }
  0xea   : > { %v507_v15 = vpop.f32.mrb[0].mxu1  ;;  %v418_v16 = vpop.f32.mrb[0].mxu0 }
  0xeb   : > { %v509_v18 = vpop.f32.mrb[1].mxu1  ;;  %v420_v19 = vpop.f32.mrb[1].mxu0  ;;  %v717_v25 = vmul.f32 %v709_v17, %v418_v16  ;;  %v719_v31 = vmul.f32 %v711_v21, %v507_v15  ;;  %v715_v16 = vld [vmem:[%s7871_s3 + $0x30] sm:$0xff]  ;;  %v714_v21 = vld [vmem:[%s7871_s3 + $0x28] sm:$0xff] }
  0xec   : > { %v718_v28 = vmul.f32 %v710_v20, %v420_v19  ;;  %v720_v36 = vmul.f32 %v712_v24, %v509_v18  ;;  %v716_v19 = vld [vmem:[%s7871_s3 + $0x38] sm:$0xff] }
  0xee   : > { %v424_v29 = vpop.f32.mrb[2].mxu0  ;;  %v513_v30 = vpop.f32.mrb[2].mxu1 }
  0xef   : > { %v734_v32 = vmul.f32 %v4153_v22, %v424_v29  ;;  %v736_v33 = vmul.f32 %v4155_v23, %v513_v30  ;;  %v426_v34 = vpop.f32.mrb[3].mxu0  ;;  %v515_v35 = vpop.f32.mrb[3].mxu1  ;;  %v4157_v22 = vld [vmem:[%s7871_s3 + $0x60] sm:$0xff]  ;;  %v4159_v23 = vld [vmem:[%s7871_s3 + $0x70] sm:$0xff] }
  0xf0   : > { %v735_v37 = vmul.f32 %v4154_v26, %v426_v34  ;;  %v737_v38 = vmul.f32 %v4156_v27, %v515_v35  ;;  %v4158_v26 = vld [vmem:[%s7871_s3 + $0x68] sm:$0xff]  ;;  %v4160_v27 = vld [vmem:[%s7871_s3 + $0x78] sm:$0xff] }
  0xf1   : > { %v742_v41 = vadd.f32 %v734_v32, %v717_v25  ;;  %v744_v42 = vadd.f32 %v736_v33, %v719_v31 }
  0xf2   : > { %v743_v45 = vadd.f32 %v735_v37, %v718_v28  ;;  %v745_v46 = vadd.f32 %v737_v38, %v720_v36  ;;  %v430_v47 = vpop.f32.mrb[4].mxu0  ;;  %v519_v48 = vpop.f32.mrb[4].mxu1 }
  0xf3   : > { %v759_v49 = vmul.f32 %v4161_v39, %v430_v47  ;;  %v761_v50 = vmul.f32 %v4163_v40, %v519_v48  ;;  %v432_v51 = vpop.f32.mrb[5].mxu0  ;;  %v521_v52 = vpop.f32.mrb[5].mxu1  ;;  %v4165_v39 = vld [vmem:[%s7871_s3 + $0xa0] sm:$0xff]  ;;  %v4167_v40 = vld [vmem:[%s7871_s3 + $0xb0] sm:$0xff] }
  0xf4   : > { %v760_v53 = vmul.f32 %v4162_v43, %v432_v51  ;;  %v762_v54 = vmul.f32 %v4164_v44, %v521_v52  ;;  %v4168_v43 = vld [vmem:[%s7871_s3 + $0xb8] sm:$0xff]  ;;  %v4166_v44 = vld [vmem:[%s7871_s3 + $0xa8] sm:$0xff] }
  0xf5   : > { %v767_v57 = vadd.f32 %v759_v49, %v742_v41  ;;  %v769_v58 = vadd.f32 %v761_v50, %v744_v42 }
  0xf6   : > { %v768_v61 = vadd.f32 %v760_v53, %v743_v45  ;;  %v770_v62 = vadd.f32 %v762_v54, %v745_v46  ;;  %v436_v63 = vpop.f32.mrb[6].mxu0  ;;  %v525_v1 = vpop.f32.mrb[6].mxu1 }
  0xf7   : > { %v784_v2 = vmul.f32 %v4169_v55, %v436_v63  ;;  %v786_v3 = vmul.f32 %v4171_v56, %v525_v1  ;;  %v438_v4 = vpop.f32.mrb[7].mxu0  ;;  %v527_v5 = vpop.f32.mrb[7].mxu1  ;;  %v4173_v55 = vld [vmem:[%s7871_s3 + $0xe0] sm:$0xff]  ;;  %v4175_v56 = vld [vmem:[%s7871_s3 + $0xf0] sm:$0xff] }
  0xf8   : > { %v785_v6 = vmul.f32 %v4170_v59, %v438_v4  ;;  %v787_v7 = vmul.f32 %v4172_v60, %v527_v5  ;;  %v4174_v59 = vld [vmem:[%s7871_s3 + $0xe8] sm:$0xff]  ;;  %v4176_v60 = vld [vmem:[%s7871_s3 + $0xf8] sm:$0xff] }
  0xf9   : > { %v792_v9 = vadd.f32 %v784_v2, %v767_v57  ;;  %v794_v10 = vadd.f32 %v786_v3, %v769_v58 }
  0xfa   : > { %v4926_v11 = vadd.f32 %v785_v6, %v768_v61  ;;  %v4928_v12 = vadd.f32 %v787_v7, %v770_v62  ;;  %v596_v13 = vpop.f32.mrb[8].mxu0  ;;  %v685_v15 = vpop.f32.mrb[8].mxu1 }
  0xfb   : > { %v4937_v17 = vadd.f32 %v4924_v8, %v794_v10  ;;  %v687_v18 = vpop.f32.mrb[9].mxu1  ;;  %v598_v20 = vpop.f32.mrb[9].mxu0  ;;  %v721_v24 = vmul.f32 %v713_v14, %v596_v13  ;;  %v723_v25 = vmul.f32 %v715_v16, %v685_v15  ;;  %v4962_v32 = vadd.f32 %v4924_v8, %v792_v9 }
  0xfc   : > { %v724_v28 = vmul.f32 %v716_v19, %v687_v18  ;;  %v722_v29 = vmul.f32 %v714_v21, %v598_v20  ;;  %v5014_v15 = vadd.f32 %v4924_v8, %v4928_v12  ;;  %v5022_v16 = vadd.f32 %v4924_v8, %v4926_v11 }
  0xfd   : > { %868 = vrot.lane.b32.xlu1 %v4937_v17, %s4752_s25  ;;  %817 = vrot.lane.b32.xlu0 %v4937_v17, %s4753_s26 }
  0xfe   : > { %v602_v30 = vpop.f32.mrb[10].mxu0  ;;  %v691_v31 = vpop.f32.mrb[10].mxu1 }
  0xff   : > { %v738_v33 = vmul.f32 %v4157_v22, %v602_v30  ;;  %v740_v34 = vmul.f32 %v4159_v23, %v691_v31  ;;  %v604_v35 = vpop.f32.mrb[11].mxu0  ;;  %v693_v36 = vpop.f32.mrb[11].mxu1 }
 0x100   : > { %v739_v37 = vmul.f32 %v4158_v26, %v604_v35  ;;  %v741_v38 = vmul.f32 %v4160_v27, %v693_v36  ;;  %v829_v36 = vlaneseq }
 0x101   : > { %918 = vrot.lane.b32.xlu1 %v4937_v17, %s4754_s15  ;;  %864 = vrot.lane.b32.xlu0 %v4962_v32, %s4752_s25  ;;  %v746_v41 = vadd.f32 %v738_v33, %v721_v24  ;;  %v748_v42 = vadd.f32 %v740_v34, %v723_v25  ;;  %v1614_v25 = vld [vmem:[%s7875_s7] sm:$0xff] }
 0x102   : > { %v747_v45 = vadd.f32 %v739_v37, %v722_v29  ;;  %v749_v46 = vadd.f32 %v741_v38, %v724_v28  ;;  %v608_v47 = vpop.f32.mrb[12].mxu0  ;;  %v697_v48 = vpop.f32.mrb[12].mxu1  ;;  %v1600_v28 = vld [vmem:[%s7874_s6] sm:$0xff]  ;;  %v5162_v37 = vand.u32 127, %v829_v36 }
 0x103   : > { %v763_v49 = vmul.f32 %v4165_v39, %v608_v47  ;;  %v765_v50 = vmul.f32 %v4167_v40, %v697_v48  ;;  %v699_v51 = vpop.f32.mrb[13].mxu1  ;;  %v610_v52 = vpop.f32.mrb[13].mxu0  ;;  %v5193_v47 = vld [vmem:[%s7873_s5 + $0x48] sm:$0xff] }
 0x104   : > { %v766_v53 = vmul.f32 %v4168_v43, %v699_v51  ;;  %v764_v54 = vmul.f32 %v4166_v44, %v610_v52  ;;  %vm880_vm2 = vcmp.lt.s32.totalorder %v5162_v37, 32  ;;  %vm831_vm3 = vcmp.lt.s32.totalorder %v5162_v37, 33  ;;  %v5183_v44 = vld [vmem:[%s7873_s5 + $0x18] sm:$0xff]  ;;  %7992 = vst [vmem:[#allocation3_spill] sm:$0xff] %v5193_v47  ;;  %v5205_v51 = vld [vmem:[%s7873_s5 + $0x50] sm:$0xff] }
 0x105   : > { %v771_v57 = vadd.f32 %v763_v49, %v746_v41  ;;  %v773_v58 = vadd.f32 %v765_v50, %v748_v42  ;;  %968 = vrot.lane.b32.xlu1 %v4937_v17, %s4755_s24  ;;  %914 = vrot.lane.b32.xlu0 %v4962_v32, %s4754_s15  ;;  %v5175_v42 = vld [vmem:[%s7873_s5 + $0x58] sm:$0xff]  ;;  %vm930_vm4 = vcmp.lt.s32.totalorder %v5162_v37, 31  ;;  %7993 = vst [vmem:[#allocation4_spill] sm:$0xff] %v5205_v51  ;;  %vm980_vm5 = vcmp.lt.s32.totalorder %v5162_v37, 1 }
 0x106   : > { %v774_v61 = vadd.f32 %v766_v53, %v749_v46  ;;  %v772_v62 = vadd.f32 %v764_v54, %v747_v45  ;;  %v614_v63 = vpop.f32.mrb[14].mxu0  ;;  %v703_v1 = vpop.f32.mrb[14].mxu1  ;;  %v5213_v54 = vld [vmem:[%s7873_s5 + $0x98] sm:$0xff]  ;;  %vm1055_vm6 = vcmp.lt.s32.totalorder %v5162_v37, 127  ;;  %vm1155_vm7 = vcmp.lt.s32.totalorder %v5162_v37, 96 }
 0x107   : > { %v788_v2 = vmul.f32 %v4173_v55, %v614_v63  ;;  %v790_v3 = vmul.f32 %v4175_v56, %v703_v1  ;;  %v616_v4 = vpop.f32.mrb[15].mxu0  ;;  %v705_v5 = vpop.f32.mrb[15].mxu1  ;;  %7994 = vst [vmem:[#allocation5_spill] sm:$0xff] %v5213_v54  ;;  %v5223_v56 = vld [vmem:[%s7873_s5 + $0xd8] sm:$0xff]  ;;  %vm1105_vm8 = vcmp.lt.s32.totalorder %v5162_v37, 97  ;;  %vm1205_vm9 = vcmp.lt.s32.totalorder %v5162_v37, 95 }
 0x108   : > { %v789_v6 = vmul.f32 %v4174_v59, %v616_v4  ;;  %v791_v7 = vmul.f32 %v4176_v60, %v705_v5 }
 0x109   : > { %v796_v9 = vadd.f32 %v788_v2, %v771_v57  ;;  %v798_v10 = vadd.f32 %v790_v3, %v773_v58  ;;  %1093 = vrot.lane.b32.xlu0 %v4937_v17, %s4756_s11  ;;  %813 = vrot.lane.b32.xlu1 %v4962_v32, %s4753_s26  ;;  %v5228_v57 = vld [vmem:[%s7873_s5 + $0x8] sm:$0xff]  ;;  %v5233_v58 = vld [vmem:[%s7873_s5 + $0x10] sm:$0xff] }
 0x10a   : > { %v797_v13 = vadd.f32 %v789_v6, %v772_v62  ;;  %v799_v14 = vadd.f32 %v791_v7, %v774_v61  ;;  %7995 = vst [vmem:[#allocation6_spill] sm:$0xff] %v5233_v58 }
 0x10b   : > { %v5049_v11 = vadd.f32 %v4924_v8, %v796_v9  ;;  %v5060_v12 = vadd.f32 %v4924_v8, %v798_v10  ;;  %v5255_v9 = vld [vmem:[%s7873_s5 + $0xd0] sm:$0xff] }
 0x10c   : > { %v5087_v18 = vadd.f32 %v4924_v8, %v799_v14  ;;  %v5102_v19 = vadd.f32 %v4924_v8, %v797_v13  ;;  %7996 = vst [vmem:[#allocation7_spill] sm:$0xff] %v5255_v9  ;;  %v5260_v10 = vld [vmem:[%s7873_s5 + $0x90] sm:$0xff] }
 0x10d   : > { %1193 = vrot.lane.b32.xlu0 %v4937_v17, %s4757_s12  ;;  %1043 = vrot.lane.b32.xlu1 %v4937_v17, %s4758_s13  ;;  %7997 = vst [vmem:[#allocation8_spill] sm:$0xff] %v5260_v10 }
 0x111   : > { %1139 = vrot.lane.b32.xlu0 %v4962_v32, %s4759_s14  ;;  %964 = vrot.lane.b32.xlu1 %v4962_v32, %s4755_s24 }
 0x115   : > { %1189 = vrot.lane.b32.xlu0 %v4962_v32, %s4757_s12  ;;  %1143 = vrot.lane.b32.xlu1 %v4937_v17, %s4759_s14 }
 0x119   : > { %870 = vrot.lane.b32.xlu0 %v5014_v15, %s4752_s25  ;;  %1039 = vrot.lane.b32.xlu1 %v4962_v32, %s4758_s13 }
 0x11d   : > { %1089 = vrot.lane.b32.xlu1 %v4962_v32, %s4756_s11  ;;  %866 = vrot.lane.b32.xlu0 %v5022_v16, %s4752_s25 }
 0x121   : > { %819 = vrot.lane.b32.xlu1 %v5014_v15, %s4753_s26  ;;  %920 = vrot.lane.b32.xlu0 %v5014_v15, %s4754_s15 }
 0x125   : > { %970 = vrot.lane.b32.xlu0 %v5014_v15, %s4755_s24  ;;  %815 = vrot.lane.b32.xlu1 %v5022_v16, %s4753_s26 }
 0x129   : > { %966 = vrot.lane.b32.xlu0 %v5022_v16, %s4755_s24  ;;  %916 = vrot.lane.b32.xlu1 %v5022_v16, %s4754_s15 }
 0x12d   : > { %1095 = vrot.lane.b32.xlu0 %v5014_v15, %s4756_s11  ;;  %1045 = vrot.lane.b32.xlu1 %v5014_v15, %s4758_s13 }
 0x131   : > { %1145 = vrot.lane.b32.xlu0 %v5014_v15, %s4759_s14  ;;  %1091 = vrot.lane.b32.xlu1 %v5022_v16, %s4756_s11 }
 0x135   : > { %1041 = vrot.lane.b32.xlu0 %v5022_v16, %s4758_s13  ;;  %1097 = vrot.lane.b32.xlu1 %v5049_v11, %s4756_s11 }
 0x139   : > { %1195 = vrot.lane.b32.xlu0 %v5014_v15, %s4757_s12  ;;  %1147 = vrot.lane.b32.xlu1 %v5049_v11, %s4759_s14 }
 0x13d   : > { %1141 = vrot.lane.b32.xlu0 %v5022_v16, %s4759_s14  ;;  %876 = vrot.lane.b32.xlu1 %v5060_v12, %s4752_s25 }
 0x141   : > { %1191 = vrot.lane.b32.xlu0 %v5022_v16, %s4757_s12  ;;  %1197 = vrot.lane.b32.xlu1 %v5049_v11, %s4757_s12 }
 0x145   : > { %926 = vrot.lane.b32.xlu1 %v5060_v12, %s4754_s15  ;;  %1047 = vrot.lane.b32.xlu0 %v5049_v11, %s4758_s13 }
 0x149   : > { %821 = vrot.lane.b32.xlu1 %v5049_v11, %s4753_s26  ;;  %825 = vrot.lane.b32.xlu0 %v5060_v12, %s4753_s26 }
 0x14d   : > { %1051 = vrot.lane.b32.xlu1 %v5060_v12, %s4758_s13  ;;  %976 = vrot.lane.b32.xlu0 %v5060_v12, %s4755_s24 }
 0x151   : > { %922 = vrot.lane.b32.xlu1 %v5049_v11, %s4754_s15  ;;  %872 = vrot.lane.b32.xlu0 %v5049_v11, %s4752_s25 }
 0x155   : > { %827 = vrot.lane.b32.xlu1 %v5087_v18, %s4753_s26  ;;  %878 = vrot.lane.b32.xlu0 %v5087_v18, %s4752_s25 }
 0x159   : > { %1101 = vrot.lane.b32.xlu1 %v5060_v12, %s4756_s11  ;;  %928 = vrot.lane.b32.xlu0 %v5087_v18, %s4754_s15 }
 0x15d   : > { %978 = vrot.lane.b32.xlu1 %v5087_v18, %s4755_s24  ;;  %972 = vrot.lane.b32.xlu0 %v5049_v11, %s4755_s24 }
 0x161   : > { %874 = vrot.lane.b32.xlu1 %v5102_v19, %s4752_s25  ;;  %823 = vrot.lane.b32.xlu0 %v5102_v19, %s4753_s26 }
 0x165   : > { %924 = vrot.lane.b32.xlu1 %v5102_v19, %s4754_s15  ;;  %974 = vrot.lane.b32.xlu0 %v5102_v19, %s4755_s24 }
 0x169   : > { %1201 = vrot.lane.b32.xlu1 %v5060_v12, %s4757_s12  ;;  %1151 = vrot.lane.b32.xlu0 %v5060_v12, %s4759_s14 }
 0x16d   : > { %1053 = vrot.lane.b32.xlu1 %v5087_v18, %s4758_s13  ;;  %1153 = vrot.lane.b32.xlu0 %v5087_v18, %s4759_s14 }
 0x16f   : > { %v869_v8 = vpop.permute.xlu1 %868  ;;  %v818_v20 = vpop.permute.xlu0 %817 }
 0x171   : > { %1103 = vrot.lane.b32.xlu1 %v5087_v18, %s4756_s11  ;;  %1203 = vrot.lane.b32.xlu0 %v5087_v18, %s4757_s12 }
 0x173   : > { %v5124_v21 = vpop.permute.xlu1 %918  ;;  %v5126_v22 = vpop.permute.xlu0 %864 }
 0x175   : > { %1049 = vrot.lane.b32.xlu1 %v5102_v19, %s4758_s13  ;;  %1099 = vrot.lane.b32.xlu0 %v5102_v19, %s4756_s11 }
 0x177   : > { %v5132_v23 = vpop.permute.xlu1 %968  ;;  %v5134_v24 = vpop.permute.xlu0 %914 }
 0x179   : > { %1149 = vrot.lane.b32.xlu1 %v5102_v19, %s4759_s14  ;;  %1199 = vrot.lane.b32.xlu0 %v5102_v19, %s4757_s12 }
 0x17b   : > { %v5143_v26 = vpop.permute.xlu0 %1093  ;;  %v5145_v27 = vpop.permute.xlu1 %813 }
 0x17d   : > { %1617 = vperm.xlu0 %4736, %v1614_v25   ;;  %1603 = vperm.xlu1 %4737, %v1600_v28  }
 0x17f   : > { %v5150_v29 = vpop.permute.xlu0 %1193  ;;  %v5152_v30 = vpop.permute.xlu1 %1043 }
 0x183   : > { %v5154_v31 = vpop.permute.xlu0 %1139  ;;  %v5156_v33 = vpop.permute.xlu1 %964 }
 0x187   : > { %v5158_v34 = vpop.permute.xlu0 %1189  ;;  %v5160_v35 = vpop.permute.xlu1 %1143 }
 0x18b   : > { %v5164_v38 = vpop.permute.xlu0 %870  ;;  %v5166_v39 = vpop.permute.xlu1 %1039 }
 0x18c   : > { %v885_v43 = vsel %vm880_vm2, %v869_v8, %v5164_v38 }
 0x18d   : > { %v901_v50 = vmul.f32 %v5175_v42, %v885_v43 }
 0x18f   : > { %v5169_v40 = vpop.permute.xlu1 %1089  ;;  %v867_v41 = vpop.permute.xlu0 %866 }
 0x190   : > { %v887_v48 = vsel %vm880_vm2, %v5126_v22, %v867_v41  ;;  %v886_v52 = vsel %vm880_vm2, %v867_v41, %v869_v8 }
 0x191   : > { %v899_v59 = vmul.f32 %v5193_v47, %v887_v48  ;;  %v900_v63 = vmul.f32 %v5205_v51, %v886_v52 }
 0x193   : > { %v5185_v45 = vpop.permute.xlu1 %819  ;;  %v5188_v46 = vpop.permute.xlu0 %920 }
 0x194   : > { %v836_v49 = vsel %vm831_vm3, %v818_v20, %v5185_v45  ;;  %v935_v55 = vsel %vm930_vm4, %v5124_v21, %v5188_v46 }
 0x195   : > { %v851_v53 = vmul.f32 %v5183_v44, %v836_v49  ;;  %v951_v4 = vmul.f32 %v5213_v54, %v935_v55 }
 0x197   : > { %v5236_v60 = vpop.permute.xlu0 %970  ;;  %v816_v61 = vpop.permute.xlu1 %815  ;;  %v4478_v62 = vpack.c.bf16 %v901_v50, %v851_v53 }
 0x198   : > { %v985_v1 = vsel %vm980_vm5, %v5132_v23, %v5236_v60  ;;  %v837_v2 = vsel %vm831_vm3, %v816_v61, %v818_v20  ;;  %v838_v3 = vsel %vm831_vm3, %v5145_v27, %v816_v61 }
 0x199   : > { %v1001_v5 = vmul.f32 %v5223_v56, %v985_v1  ;;  %v849_v6 = vmul.f32 %v5228_v57, %v838_v3  ;;  %v850_v7 = vmul.f32 %v5233_v58, %v837_v2  ;;  %4479 = vmatprep.subr.bf16.mxu1 %v4478_v62  ;;  %v5296_v2 = vld [vmem:[%s7873_s5 + $0x150] sm:$0xff] }
 0x19a   : > { %7998 = vst [vmem:[#allocation9_spill] sm:$0xff] %v5296_v2 }
 0x19b   : > { %v4480_v13 = vpack.c.bf16 %v900_v63, %v850_v7  ;;  %v5262_v14 = vpop.permute.xlu0 %966  ;;  %v5264_v8 = vpop.permute.xlu1 %916  ;;  %v4462_v20 = vpack.c.bf16 %v899_v59, %v849_v6  ;;  %v4482_v25 = vpack.c.bf16 %v1001_v5, %v951_v4  ;;  %v4228_v4 = vld [vmem:[%s7873_s5 + $0x1d8] sm:$0xff] }
 0x19c   : > { %v986_v28 = vsel %vm980_vm5, %v5262_v14, %v5132_v23  ;;  %v936_v36 = vsel %vm930_vm4, %v5264_v8, %v5124_v21  ;;  %v4212_v6 = vld [vmem:[%s7873_s5 + $0x158] sm:$0xff] }
 0x19d   : > { %v1000_v41 = vmul.f32 %v5255_v9, %v986_v28  ;;  %v950_v43 = vmul.f32 %v5260_v10, %v936_v36  ;;  %4463 = vmatprep.subr.bf16.mxu0 %v4462_v20  ;;  %4481 = vmatpush1.bf16.msra.mxu1 %v4480_v13  ;;  %v4204_v7 = vld [vmem:[%s7873_s5 + $0x118] sm:$0xff]  ;;  %v5318_v13 = vld [vmem:[%s7873_s5 + $0x110] sm:$0xff] }
 0x19e   : > { %4483 = vmatprep.subr.bf16.mxu1 %v4482_v25  ;;  %7999 = vst [vmem:[#allocation10_spill] sm:$0xff] %v5318_v13  ;;  %v4220_v36 = vld [vmem:[%s7873_s5 + $0x198] sm:$0xff]  ;;  %v1026_v9 = vmul.f32 %v4204_v7, %v5014_v15  ;;  %v1025_v10 = vmul.f32 %v5318_v13, %v4937_v17 }
 0x19f   : > { %v4484_v48 = vpack.c.bf16 %v1000_v41, %v950_v43  ;;  %v1096_v49 = vpop.permute.xlu0 %1095  ;;  %v1046_v50 = vpop.permute.xlu1 %1045 }
 0x1a0   : > { %v1060_v3 = vsel %vm1055_vm6, %v5152_v30, %v1046_v50  ;;  %v1110_v54 = vsel %vm1105_vm8, %v5143_v26, %v1096_v49 }
 0x1a1   : > { %4485 = vmatpush1.bf16.msra.mxu1 %v4484_v48  ;;  %v1075_v28 = vmul.f32 %v5296_v2, %v1060_v3  ;;  %v5337_v48 = vld [vmem:[%s7873_s5 + $0x1d0] sm:$0xff] }
 0x1a2   : > { %8000 = vst [vmem:[#allocation11_spill] sm:$0xff] %v5337_v48 }
 0x1a3   : > { %v1146_v52 = vpop.permute.xlu0 %1145  ;;  %v5276_v53 = vpop.permute.xlu1 %1091 }
 0x1a4   : > { %v1160_v3 = vsel %vm1155_vm7, %v5160_v35, %v1146_v52 }
 0x1a5   : > { %v1175_v15 = vmul.f32 %v5337_v48, %v1160_v3  ;;  %v937_v3 = vsel %vm930_vm4, %v5134_v24, %v5264_v8  ;;  %v5419_v8 = vld [vmem:[%s7873_s5 + $0x40] sm:$0xff] }
 0x1a6   : > { %8007 = vst [vmem:[#allocation18_spill] sm:$0xff] %v5419_v8 }
 0x1a7   : > { %v5278_v23 = vpop.permute.xlu0 %1041  ;;  %v5280_v55 = vpop.permute.xlu1 %1097 }
 0x1a8   : > { %v1109_v41 = vsel %vm1105_vm8, %v1096_v49, %v5280_v55  ;;  %v4236_v49 = vld [vmem:[%s7873_s5 + $0x218] sm:$0xff] }
 0x1a9   : > { %v1126_v51 = vmul.f32 %v4220_v36, %v1109_v41  ;;  %v5385_v41 = vld [vmem:[%s7873_s5 + $0xc8] sm:$0xff] }
 0x1aa   : > { %8003 = vst [vmem:[#allocation14_spill] sm:$0xff] %v5385_v41 }
 0x1ab   : > { %v1196_v59 = vpop.permute.xlu0 %1195  ;;  %v5282_v21 = vpop.permute.xlu1 %1147 }
 0x1ac   : > { %v1159_v5 = vsel %vm1155_vm7, %v1146_v52, %v5282_v21 }
 0x1ad   : > { %v1176_v0 = vmul.f32 %v4228_v4, %v1159_v5  ;;  %v4488_v5 = vpack.c.bf16 %v1075_v28, %v1025_v10 }
 0x1af   : > { %v5284_v61 = vpop.permute.xlu0 %1141  ;;  %v5286_v62 = vpop.permute.xlu1 %876  ;;  %v4490_v17 = vpack.c.bf16 %v1176_v0, %v1126_v51  ;;  %v5373_v0 = vld [vmem:[%s7873_s5 + $0x210] sm:$0xff]  ;;  %v1210_v51 = vsel %vm1205_vm9, %v5150_v29, %v1196_v59 }
 0x1b0   : > { %8002 = vst [vmem:[#allocation13_spill] sm:$0xff] %v5373_v0 }
 0x1b3   : > { %v5289_v63 = vpop.permute.xlu0 %1191  ;;  %v5291_v1 = vpop.permute.xlu1 %1197 }
 0x1b4   : > { %v1209_v7 = vsel %vm1205_vm9, %v1196_v59, %v5291_v1  ;;  %v5394_v59 = vld [vmem:[%s7873_s5 + $0x88] sm:$0xff] }
 0x1b5   : > { %8004 = vst [vmem:[#allocation15_spill] sm:$0xff] %v5394_v59 }
 0x1b7   : > { %v5320_v20 = vpop.permute.xlu1 %926  ;;  %v5322_v25 = vpop.permute.xlu0 %1047 }
 0x1b8   : > { %v1059_v43 = vsel %vm1055_vm6, %v1046_v50, %v5322_v25  ;;  %v5348_v50 = vld [vmem:[%s7873_s5 + $0x190] sm:$0xff] }
 0x1b9   : > { %v1076_v2 = vmul.f32 %v4212_v6, %v1059_v43  ;;  %8001 = vst [vmem:[#allocation12_spill] sm:$0xff] %v5348_v50  ;;  %v1125_v6 = vmul.f32 %v5348_v50, %v1110_v54  ;;  %v1226_v54 = vmul.f32 %v4236_v49, %v1209_v7  ;;  %v987_v43 = vsel %vm980_vm5, %v5156_v33, %v5262_v14  ;;  %v5409_v14 = vld [vmem:[%s7873_s5] sm:$0xff] }
 0x1ba   : > { %8005 = vst [vmem:[#allocation16_spill] sm:$0xff] %v5409_v14  ;;  %v949_v7 = vmul.f32 %v5394_v59, %v937_v3  ;;  %v8009_v3 = vmov 0.0  }
 0x1bb   : > { %v5353_v47 = vpop.permute.xlu1 %821  ;;  %v5355_v52 = vpop.permute.xlu0 %825  ;;  %v4486_v4 = vpack.c.bf16 %v1076_v2, %v1026_v9  ;;  %v4492_v10 = vpack.c.bf16 %v1175_v15, %v1125_v6  ;;  %v5414_v15 = vld [vmem:[%s7873_s5 + $0x38] sm:$0xff]  ;;  %v999_v6 = vmul.f32 %v5385_v41, %v987_v43 }
 0x1bc   : > { %8006 = vst [vmem:[#allocation17_spill] sm:$0xff] %v5414_v15 }
 0x1bd   : > { %4487 = vmatprep.subr.bf16.mxu1 %v4486_v4  ;;  %v1225_v4 = vmul.f32 %v5373_v0, %v1210_v51  ;;  %v4466_v58 = vpack.c.bf16 %v999_v6, %v949_v7  ;;  %v5491_v6 = vld [vmem:[%s7873_s5 + $0x1c8] sm:$0xff] }
 0x1be   : > { %4489 = vmatpush1.bf16.msra.mxu1 %v4488_v5  ;;  %v5404_v5 = vld [vmem:[%s7872_s4] sm:$0xff]  ;;  %8015 = vst [vmem:[#allocation25_spill] sm:$0xff] %v5491_v6 }
 0x1bf   : > { %v5366_v36 = vpop.permute.xlu1 %1051  ;;  %4491 = vmatprep.subr.bf16.mxu1 %v4490_v17  ;;  %v5368_v9 = vpop.permute.xlu0 %976  ;;  %v5424_v17 = vld [vmem:[%s7873_s5 + $0x78] sm:$0xff] }
 0x1c0   : > { %8008 = vst [vmem:[#allocation19_spill] sm:$0xff] %v5424_v17 }
 0x1c2   : > { %4493 = vmatpush1.bf16.msra.mxu1 %v4492_v10 }
 0x1c3   : > { %v5378_v2 = vpop.permute.xlu1 %922  ;;  %1403 = vmatprep.subr.mxu1 %v1226_v54  ;;  %v5380_v28 = vpop.permute.xlu0 %872 }
 0x1c6   : > { %1404 = vmatpush1.msra.mxu1 %v1225_v4 }
 0x1c7   : > { %v828_v49 = vpop.permute.xlu1 %827  ;;  %4242 = vmatmul.mubr.msk.f32.vlgmr.msra.gmra.mrb[16].mxu1 %vm1312_vm10, %v5404_v5  ;;  %v879_v10 = vpop.permute.xlu0 %878 }
 0x1c8   : > { %v832_v51 = vsel %vm831_vm3, %v5355_v52, %v828_v49  ;;  %v839_v54 = vsel %vm831_vm3, %v828_v49, %v5145_v27  ;;  %v881_v4 = vsel %vm880_vm2, %v5286_v62, %v879_v10  ;;  %v888_v43 = vsel %vm880_vm2, %v879_v10, %v5126_v22  ;;  %1593 = vmatprep.mubr.f32.mxu1 %v8009_v3  ;;  %v5452_v22 = vld [vmem:[%s7873_s5 + $0x148] sm:$0xff] }
 0x1c9   : > { %v848_v0 = vmul.f32 %v5409_v14, %v839_v54  ;;  %v855_v48 = vmul.f32 %v5414_v15, %v832_v51  ;;  %v898_v13 = vmul.f32 %v5419_v8, %v888_v43  ;;  %v905_v50 = vmul.f32 %v5424_v17, %v881_v4  ;;  %8010 = vst [vmem:[#allocation20_spill] sm:$0xff] %v5452_v22  ;;  %v5503_v51 = vld [vmem:[%s7873_s5 + $0x100] sm:$0xff]  ;;  %v5509_v4 = vld [vmem:[%s7873_s5 + $0xf8] sm:$0xff] }
 0x1ca   : > { %v1061_v10 = vsel %vm1055_vm6, %v5278_v23, %v5152_v30  ;;  %v5474_v30 = vld [vmem:[%s7873_s5 + $0x140] sm:$0xff]  ;;  %8016 = vst [vmem:[#allocation26_spill] sm:$0xff] %v5509_v4 }
 0x1cb   : > { %v4464_v59 = vpack.c.bf16 %v898_v13, %v848_v0  ;;  %v5447_v27 = vpop.permute.xlu1 %1101  ;;  %v929_v49 = vpop.permute.xlu0 %928  ;;  %v4510_v41 = vpack.c.bf16 %v905_v50, %v855_v48  ;;  %v5461_v13 = vld [vmem:[%s7873_s5 + $0x80] sm:$0xff]  ;;  %8013 = vst [vmem:[#allocation23_spill] sm:$0xff] %v5474_v30  ;;  %v1062_v0 = vsel %vm1055_vm6, %v5166_v39, %v5278_v23  ;;  %v1161_v23 = vsel %vm1155_vm7, %v5284_v61, %v5160_v35 }
 0x1cc   : > { %8011 = vst [vmem:[#allocation21_spill] sm:$0xff] %v5461_v13  ;;  %v938_v48 = vsel %vm930_vm4, %v929_v49, %v5134_v24  ;;  %v5469_v50 = vld [vmem:[%s7873_s5 + $0xc0] sm:$0xff]  ;;  %v5485_v24 = vld [vmem:[%s7873_s5 + $0x108] sm:$0xff]  ;;  %v1073_v15 = vmul.f32 %v5474_v30, %v1062_v0  ;;  %v1174_v0 = vmul.f32 %v5491_v6, %v1161_v23  ;;  %v5554_v30 = vld [vmem:[%s7873_s5 + $0xb8] sm:$0xff] }
 0x1cd   : > { %4465 = vmatpush1.bf16.msra.mxu0 %v4464_v59  ;;  %4511 = vmatprep.subr.bf16.mxu1 %v4510_v41  ;;  %8012 = vst [vmem:[#allocation22_spill] sm:$0xff] %v5469_v50  ;;  %8014 = vst [vmem:[#allocation24_spill] sm:$0xff] %v5485_v24  ;;  %v948_v54 = vmul.f32 %v5461_v13, %v938_v48  ;;  %v1112_v48 = vsel %vm1105_vm8, %v5169_v40, %v5276_v53  ;;  %v5544_v17 = vld [vmem:[%s7873_s5 + $0x1c0] sm:$0xff] }
 0x1ce   : > { %4467 = vmatprep.subr.bf16.mxu0 %v4466_v58  ;;  %v1074_v58 = vmul.f32 %v5452_v22, %v1061_v10  ;;  %v1111_v10 = vsel %vm1105_vm8, %v5276_v53, %v5143_v26  ;;  %v1024_v26 = vmul.f32 %v5485_v24, %v5022_v16  ;;  %v1162_v53 = vsel %vm1155_vm7, %v5154_v31, %v5284_v61  ;;  %v5562_v22 = vld [vmem:[%s7873_s5 + $0x180] sm:$0xff] }
 0x1cf   : > { %v979_v41 = vpop.permute.xlu1 %978  ;;  %v5480_v59 = vpop.permute.xlu0 %972  ;;  %v931_v16 = vsel %vm930_vm4, %v5320_v20, %v929_v49 }
 0x1d0   : > { %v988_v7 = vsel %vm980_vm5, %v979_v41, %v5156_v33  ;;  %v981_v35 = vsel %vm980_vm5, %v5368_v9, %v979_v41  ;;  %v5518_v33 = vld [vmem:[%s7873_s5 + $0x188] sm:$0xff]  ;;  %v5532_v41 = vld [vmem:[%s7873_s5 + $0x70] sm:$0xff]  ;;  %v4470_v8 = vpack.c.bf16 %v1074_v58, %v1024_v26 }
 0x1d1   : > { %v998_v43 = vmul.f32 %v5469_v50, %v988_v7  ;;  %8017 = vst [vmem:[#allocation27_spill] sm:$0xff] %v5532_v41  ;;  %v5537_v7 = vld [vmem:[%s7873_s5 + $0x30] sm:$0xff]  ;;  %v1005_v61 = vmul.f32 %v5509_v4, %v981_v35  ;;  %v1124_v49 = vmul.f32 %v5518_v33, %v1111_v10  ;;  %v1173_v35 = vmul.f32 %v5544_v17, %v1162_v53 }
 0x1d2   : > { %8018 = vst [vmem:[#allocation28_spill] sm:$0xff] %v5537_v7  ;;  %v955_v4 = vmul.f32 %v5554_v30, %v931_v16 }
 0x1d3   : > { %v4468_v24 = vpack.c.bf16 %v998_v43, %v948_v54  ;;  %v875_v50 = vpop.permute.xlu1 %874  ;;  %v824_v13 = vpop.permute.xlu0 %823  ;;  %v1023_v54 = vmul.f32 %v5503_v51, %v4962_v32  ;;  %v1123_v32 = vmul.f32 %v5562_v22, %v1112_v48  ;;  %v4474_v26 = vpack.c.bf16 %v1174_v0, %v1124_v49  ;;  %v5620_v48 = vld [vmem:[%s7873_s5 + $0x208] sm:$0xff]  ;;  %v5625_v0 = vld [vmem:[%s7873_s5 + $0x60] sm:$0xff] }
 0x1d4   : > { %v882_v23 = vsel %vm880_vm2, %v875_v50, %v5286_v62  ;;  %v833_v6 = vsel %vm831_vm3, %v824_v13, %v5355_v52  ;;  %v5581_v62 = vld [vmem:[%s7873_s5 + $0xb0] sm:$0xff]  ;;  %v5638_v49 = vld [vmem:[%s7873_s5 + $0xa8] sm:$0xff] }
 0x1d5   : > { %v904_v43 = vmul.f32 %v5532_v41, %v882_v23  ;;  %v854_v14 = vmul.f32 %v5537_v7, %v833_v6  ;;  %4469 = vmatpush1.bf16.msra.mxu0 %v4468_v24  ;;  %8019 = vst [vmem:[#allocation29_spill] sm:$0xff] %v5581_v62  ;;  %v5586_v52 = vld [vmem:[%s7873_s5 + $0xf0] sm:$0xff]  ;;  %v4472_v58 = vpack.c.bf16 %v1073_v15, %v1023_v54  ;;  %8022 = vst [vmem:[#allocation32_spill] sm:$0xff] %v5638_v49 }
 0x1d6   : > { %4471 = vmatprep.subr.bf16.mxu0 %v4470_v8  ;;  %8020 = vst [vmem:[#allocation30_spill] sm:$0xff] %v5586_v52  ;;  %v1211_v8 = vsel %vm1205_vm9, %v5289_v63, %v5150_v29  ;;  %v4514_v23 = vpack.c.bf16 %v1005_v61, %v955_v4  ;;  %v883_v15 = vsel %vm880_vm2, %v5380_v28, %v875_v50  ;;  %v5610_v29 = vld [vmem:[%s7873_s5 + $0x28] sm:$0xff] }
 0x1d7   : > { %v4512_v6 = vpack.c.bf16 %v904_v43, %v854_v14  ;;  %v925_v24 = vpop.permute.xlu1 %924  ;;  %v975_v10 = vpop.permute.xlu0 %974  ;;  %v5602_v14 = vld [vmem:[%s7873_s5 + $0x68] sm:$0xff]  ;;  %8021 = vst [vmem:[#allocation31_spill] sm:$0xff] %v5610_v29  ;;  %v4476_v50 = vpack.c.bf16 %v1173_v35, %v1123_v32  ;;  %v1212_v61 = vsel %vm1205_vm9, %v5158_v34, %v5289_v63  ;;  %v5658_v32 = vld [vmem:[%s7873_s5 + $0x130] sm:$0xff] }
 0x1d8   : > { %v932_v53 = vsel %vm930_vm4, %v925_v24, %v5320_v20  ;;  %v982_v16 = vsel %vm980_vm5, %v975_v10, %v5368_v9  ;;  %v834_v20 = vsel %vm831_vm3, %v5353_v47, %v824_v13  ;;  %v884_v13 = vsel %vm880_vm2, %v5164_v38, %v5380_v28  ;;  %v5646_v38 = vld [vmem:[%s7873_s5 + $0xe8] sm:$0xff]  ;;  %8024 = vst [vmem:[#allocation34_spill] sm:$0xff] %v5658_v32 }
 0x1d9   : > { %v954_v9 = vmul.f32 %v5581_v62, %v932_v53  ;;  %v1004_v4 = vmul.f32 %v5586_v52, %v982_v16  ;;  %4473 = vmatpush1.bf16.msra.mxu0 %v4472_v58  ;;  %4513 = vmatpush1.bf16.msra.mxu1 %v4512_v6  ;;  %v933_v54 = vsel %vm930_vm4, %v5378_v2, %v925_v24  ;;  %v5663_v58 = vld [vmem:[%s7873_s5 + $0x200] sm:$0xff]  ;;  %v5678_v16 = vld [vmem:[%s7873_s5 + $0x138] sm:$0xff] }
 0x1da   : > { %4475 = vmatprep.subr.bf16.mxu0 %v4474_v26  ;;  %8023 = vst [vmem:[#allocation33_spill] sm:$0xff] %v5646_v38  ;;  %v983_v28 = vsel %vm980_vm5, %v5480_v59, %v975_v10  ;;  %4515 = vmatprep.subr.bf16.mxu1 %v4514_v23  ;;  %v844_v6 = vld [vmem:[%s7873_s5 + $0x20] sm:$0xff]  ;;  %v835_v24 = vsel %vm831_vm3, %v5185_v45, %v5353_v47  ;;  %8025 = vst [vmem:[#allocation35_spill] sm:$0xff] %v5678_v16 }
 0x1db   : > { %v4516_v43 = vpack.c.bf16 %v1004_v4, %v954_v9  ;;  %v5651_v63 = vpop.permute.xlu1 %1201  ;;  %v5653_v35 = vpop.permute.xlu0 %1151  ;;  %v903_v10 = vmul.f32 %v5602_v14, %v883_v15  ;;  %v853_v26 = vmul.f32 %v5610_v29, %v834_v20  ;;  %v1224_v53 = vmul.f32 %v5620_v48, %v1211_v8  ;;  %v5684_v9 = vld [vmem:[%s7873_s5 + $0xe0] sm:$0xff] }
 0x1dc   : > { %v902_v23 = vmul.f32 %v5625_v0, %v884_v13  ;;  %8026 = vst [vmem:[#allocation36_spill] sm:$0xff] %v5684_v9  ;;  %v984_v45 = vsel %vm980_vm5, %v5236_v60, %v5480_v59  ;;  %v4189_v47 = vld [vmem:[%s7873_s5 + $0xa0] sm:$0xff]  ;;  %v934_v8 = vsel %vm930_vm4, %v5188_v46, %v5378_v2  ;;  %v953_v15 = vmul.f32 %v5638_v49, %v933_v54  ;;  %v5702_v60 = vld [vmem:[%s7873_s5 + $0x170] sm:$0xff]  ;;  %v5707_v59 = vld [vmem:[%s7873_s5 + $0x178] sm:$0xff] }
 0x1dd   : > { %4477 = vmatpush1.bf16.msra.mxu0 %v4476_v50  ;;  %v1003_v20 = vmul.f32 %v5646_v38, %v983_v28  ;;  %4517 = vmatpush1.bf16.msra.mxu1 %v4516_v43  ;;  %8027 = vst [vmem:[#allocation37_spill] sm:$0xff] %v5702_v60  ;;  %8028 = vst [vmem:[#allocation38_spill] sm:$0xff] %v5707_v59  ;;  %v1223_v4 = vmul.f32 %v5663_v58, %v1212_v61  ;;  %v8058_v49 = vld [vmem:[#allocation18_spill] sm:$0xff] }
 0x1de   : > { %1332 = vmatprep.subr.mxu0 %v1224_v53  ;;  %v852_v50 = vmul.f32 %v844_v6, %v835_v24  ;;  %v1029_v46 = vmul.f32 %v5658_v32, %v5060_v12  ;;  %v1030_v54 = vmul.f32 %v5678_v16, %v5087_v18  ;;  %v1002_v28 = vmul.f32 %v5684_v9, %v984_v45  ;;  %v5726_v18 = vld [vmem:[%s7873_s5 + $0x1f0] sm:$0xff]  ;;  %v5731_v45 = vld [vmem:[%s7873_s5 + $0x1f8] sm:$0xff]  ;;  %v8051_v16 = vld [vmem:[#allocation4_spill] sm:$0xff] }
 0x1df   : > { %v1054_v2 = vpop.permute.xlu1 %1053  ;;  %v1154_v13 = vpop.permute.xlu0 %1153  ;;  %v4494_v61 = vpack.c.bf16 %v903_v10, %v853_v26  ;;  %v952_v6 = vmul.f32 %v4189_v47, %v934_v8  ;;  %8029 = vst [vmem:[#allocation39_spill] sm:$0xff] %v5726_v18  ;;  %8030 = vst [vmem:[#allocation40_spill] sm:$0xff] %v5731_v45  ;;  %v5744_v26 = vld [vmem:[%s7873_s5 + $0x1b0] sm:$0xff]  ;;  %v4498_v47 = vpack.c.bf16 %v1003_v20, %v953_v15 }
 0x1e0   : > { %v1056_v43 = vsel %vm1055_vm6, %v5366_v36, %v1054_v2  ;;  %v1063_v53 = vsel %vm1055_vm6, %v1054_v2, %v5166_v39  ;;  %v4496_v24 = vpack.c.bf16 %v902_v23, %v852_v50  ;;  %v1156_v39 = vsel %vm1155_vm7, %v5653_v35, %v1154_v13  ;;  %8031 = vst [vmem:[#allocation41_spill] sm:$0xff] %v5744_v26  ;;  %v5749_v23 = vld [vmem:[%s7873_s5 + $0x1b8] sm:$0xff] }
 0x1e1   : > { %v1079_v12 = vmul.f32 %v5702_v60, %v1056_v43  ;;  %v1080_v32 = vmul.f32 %v5707_v59, %v1063_v53  ;;  %1333 = vmatpush1.msra.mxu0 %v1223_v4  ;;  %v1163_v10 = vsel %vm1155_vm7, %v1154_v13, %v5154_v31  ;;  %8032 = vst [vmem:[#allocation42_spill] sm:$0xff] %v5749_v23  ;;  %v8052_v60 = vld [vmem:[#allocation5_spill] sm:$0xff] }
 0x1e2   : > { %4241 = vmatmul.mubr.msk.f32.vlgmr.msra.gmra.mrb[16].mxu0 %vm1312_vm10, %v5404_v5  ;;  %4495 = vmatprep.subr.bf16.mxu0 %v4494_v61  ;;  %v4500_v2 = vpack.c.bf16 %v1002_v28, %v952_v6  ;;  %v1179_v53 = vmul.f32 %v5726_v18, %v1156_v39  ;;  %v1180_v15 = vmul.f32 %v5731_v45, %v1163_v10  ;;  %v5778_v28 = vld [vmem:[%s7873_s5 + $0x160] sm:$0xff]  ;;  %v5783_v61 = vld [vmem:[%s7873_s5 + $0x168] sm:$0xff]  ;;  %v5788_v6 = vld [vmem:[%s7873_s5 + $0x238] sm:$0xff] }
 0x1e3   : > { %v4520_v8 = vpack.c.bf16 %v1079_v12, %v1029_v46  ;;  %v1104_v4 = vpop.permute.xlu1 %1103  ;;  %4497 = vmatpush1.bf16.msra.mxu0 %v4496_v24  ;;  %v1204_v50 = vpop.permute.xlu0 %1203  ;;  %v4518_v31 = vpack.c.bf16 %v1080_v32, %v1030_v54  ;;  %1522 = vmatprep.mubr.f32.mxu0 %v8009_v3  ;;  %v5765_v46 = vld [vmem:[%s7873_s5 + $0x120] sm:$0xff]  ;;  %v5770_v54 = vld [vmem:[%s7873_s5 + $0x128] sm:$0xff]  ;;  %8035 = vst [vmem:[#allocation45_spill] sm:$0xff] %v5778_v28  ;;  %8036 = vst [vmem:[#allocation46_spill] sm:$0xff] %v5783_v61 }
 0x1e4   : > { %v1106_v13 = vsel %vm1105_vm8, %v5447_v27, %v1104_v4  ;;  %v1113_v43 = vsel %vm1105_vm8, %v1104_v4, %v5169_v40  ;;  %4499 = vmatprep.subr.bf16.mxu0 %v4498_v47  ;;  %8033 = vst [vmem:[#allocation43_spill] sm:$0xff] %v5765_v46  ;;  %8034 = vst [vmem:[#allocation44_spill] sm:$0xff] %v5770_v54  ;;  %v1213_v40 = vsel %vm1205_vm9, %v1204_v50, %v5158_v34 }
 0x1e5   : > { %v1129_v20 = vmul.f32 %v5744_v26, %v1106_v13  ;;  %v1130_v32 = vmul.f32 %v5749_v23, %v1113_v43  ;;  %4519 = vmatprep.subr.bf16.mxu1 %v4518_v31  ;;  %8037 = vst [vmem:[#allocation47_spill] sm:$0xff] %v5788_v6  ;;  %v1027_v10 = vmul.f32 %v5765_v46, %v5049_v11  ;;  %v5803_v31 = vld [vmem:[%s7873_s5 + $0x230] sm:$0xff]  ;;  %v5819_v13 = vld [vmem:[%s7873_s5 + $0x1a8] sm:$0xff] }
 0x1e6   : > { %4521 = vmatpush1.bf16.msra.mxu1 %v4520_v8  ;;  %v1028_v4 = vmul.f32 %v5770_v54, %v5102_v19  ;;  %8038 = vst [vmem:[#allocation48_spill] sm:$0xff] %v5803_v31  ;;  %v1206_v11 = vsel %vm1205_vm9, %v5651_v63, %v1204_v50  ;;  %v1230_v19 = vmul.f32 %v5788_v6, %v1213_v40  ;;  %8040 = vst [vmem:[#allocation50_spill] sm:$0xff] %v5819_v13 }
 0x1e7   : > { %v4524_v24 = vpack.c.bf16 %v1179_v53, %v1129_v20  ;;  %v1050_v12 = vpop.permute.xlu1 %1049  ;;  %4501 = vmatpush1.bf16.msra.mxu0 %v4500_v2  ;;  %v1100_v34 = vpop.permute.xlu0 %1099  ;;  %v4522_v39 = vpack.c.bf16 %v1180_v15, %v1130_v32  ;;  %v5830_v53 = vld [vmem:[%s7873_s5 + $0x1e0] sm:$0xff]  ;;  %v5835_v15 = vld [vmem:[%s7873_s5 + $0x1e8] sm:$0xff] }
 0x1e8   : > { %v1057_v47 = vsel %vm1055_vm6, %v1050_v12, %v5366_v36  ;;  %v1058_v8 = vsel %vm1055_vm6, %v5322_v25, %v1050_v12  ;;  %v5813_v25 = vld [vmem:[%s7873_s5 + $0x1a0] sm:$0xff]  ;;  %v1107_v50 = vsel %vm1105_vm8, %v1100_v34, %v5447_v27  ;;  %v1108_v43 = vsel %vm1105_vm8, %v5280_v55, %v1100_v34  ;;  %8041 = vst [vmem:[#allocation51_spill] sm:$0xff] %v5830_v53 }
 0x1e9   : > { %v1077_v2 = vmul.f32 %v5778_v28, %v1058_v8  ;;  %v1078_v36 = vmul.f32 %v5783_v61, %v1057_v47  ;;  %8039 = vst [vmem:[#allocation49_spill] sm:$0xff] %v5813_v25  ;;  %4523 = vmatprep.subr.bf16.mxu1 %v4522_v39  ;;  %8042 = vst [vmem:[#allocation52_spill] sm:$0xff] %v5835_v15  ;;  %v1229_v12 = vmul.f32 %v5803_v31, %v1206_v11  ;;  %v5862_v11 = vld [vmem:[%s7873_s5 + $0x220] sm:$0xff] }
 0x1ea   : > { %4525 = vmatpush1.bf16.msra.mxu1 %v4524_v24  ;;  %v1127_v34 = vmul.f32 %v5813_v25, %v1108_v43  ;;  %v1128_v39 = vmul.f32 %v5819_v13, %v1107_v50  ;;  %8044 = vst [vmem:[#allocation54_spill] sm:$0xff] %v5862_v11 }
 0x1eb   : > { %v4504_v20 = vpack.c.bf16 %v1077_v2, %v1027_v10  ;;  %v1150_v32 = vpop.permute.xlu1 %1149  ;;  %1545 = vmatprep.subr.mxu1 %v1230_v19  ;;  %v1200_v40 = vpop.permute.xlu0 %1199  ;;  %v4502_v27 = vpack.c.bf16 %v1078_v36, %v1028_v4 }
 0x1ec   : > { %v1157_v55 = vsel %vm1155_vm7, %v1150_v32, %v5653_v35  ;;  %v1158_v24 = vsel %vm1155_vm7, %v5282_v21, %v1150_v32  ;;  %v1207_v8 = vsel %vm1205_vm9, %v1200_v40, %v5651_v63  ;;  %v5854_v35 = vld [vmem:[%s7873_s5 + $0x228] sm:$0xff]  ;;  %v1208_v63 = vsel %vm1205_vm9, %v5291_v1, %v1200_v40 }
 0x1ed   : > { %v1177_v10 = vmul.f32 %v5830_v53, %v1158_v24  ;;  %v1178_v47 = vmul.f32 %v5835_v15, %v1157_v55  ;;  %4503 = vmatprep.subr.bf16.mxu0 %v4502_v27  ;;  %8043 = vst [vmem:[#allocation53_spill] sm:$0xff] %v5854_v35  ;;  %v1228_v2 = vmul.f32 %v5854_v35, %v1207_v8 }
 0x1ee   : > { %4505 = vmatpush1.bf16.msra.mxu0 %v4504_v20  ;;  %1546 = vmatpush1.msra.mxu1 %v1229_v12  ;;  %v1227_v36 = vmul.f32 %v5862_v11, %v1208_v63 }
 0x1ef   : > { %v4508_v21 = vpack.c.bf16 %v1177_v10, %v1127_v34  ;;  %4244 = vmatmul.mubr.msk.f32.vlgmr.msra.gmra.mrb[18].mxu1 %vm1312_vm10, %v5404_v5  ;;  %v4506_v4 = vpack.c.bf16 %v1178_v47, %v1128_v39 }
 0x1f0   : > { %2256 = vmatprep.mubr.f32.mxu1 %v8009_v3 }
 0x1f1   : > { %4507 = vmatprep.subr.bf16.mxu0 %v4506_v4 }
 0x1f2   : > { %4509 = vmatpush1.bf16.msra.mxu0 %v4508_v21 }
 0x1f3   : > { %1474 = vmatprep.subr.mxu0 %v1228_v2 }
 0x1f6   : > { %1475 = vmatpush1.msra.mxu0 %v1227_v36 }
 0x1f7   : > { %4243 = vmatmul.mubr.msk.f32.vlgmr.msra.gmra.mrb[18].mxu0 %vm1312_vm10, %v5404_v5 }
 0x1f8   : > { %2185 = vmatprep.mubr.f32.mxu0 %v8009_v3 }
 0x1fc   : > { %v5872_v19 = vpop.permute.xlu1 %1603  ;;  %v5875_v1 = vpop.permute.xlu0 %1617 }
 0x29a   : > { %v1453_v50 = vpop.f32.mrb[16].mxu1 }
 0x29b   : > { %v1608_v43 = vmul.f32 %v5872_v19, %v1453_v50  ;;  %v1455_v20 = vpop.f32.mrb[17].mxu1 }
 0x29c   : > { %v1609_v32 = vmul.f32 %v5872_v19, %v1455_v20 }
 0x29d   : > { %v1622_v40 = vadd.f32 %v5875_v1, %v1608_v43 }
 0x29e   : > { %v1623_v12 = vadd.f32 %v5875_v1, %v1609_v32 }
 0x29f   : > { %v5879_v27 = vmax.f32 %v1622_v40, 0.0 }
 0x2a0   : > { %v5886_v5 = vmax.f32 %v1623_v12, 0.0 }
 0x2a1   : > { %1856 = vrot.lane.b32.xlu0 %v5879_v27, %s4758_s13  ;;  %1640 = vrot.lane.b32.xlu1 %v5879_v27, %s4753_s26 }
 0x2a5   : > { %1642 = vrot.lane.b32.xlu0 %v5886_v5, %s4753_s26  ;;  %1688 = vrot.lane.b32.xlu1 %v5879_v27, %s4752_s25 }
 0x2a9   : > { %1690 = vrot.lane.b32.xlu0 %v5886_v5, %s4752_s25  ;;  %1736 = vrot.lane.b32.xlu1 %v5879_v27, %s4754_s15 }
 0x2ad   : > { %1738 = vrot.lane.b32.xlu0 %v5886_v5, %s4754_s15  ;;  %1784 = vrot.lane.b32.xlu1 %v5879_v27, %s4755_s24 }
 0x2b1   : > { %1786 = vrot.lane.b32.xlu0 %v5886_v5, %s4755_s24  ;;  %1904 = vrot.lane.b32.xlu1 %v5879_v27, %s4756_s11 }
 0x2b5   : > { %v1382_v55 = vpop.f32.mrb[16].mxu0  ;;  %1906 = vrot.lane.b32.xlu0 %v5886_v5, %s4756_s11  ;;  %1952 = vrot.lane.b32.xlu1 %v5879_v27, %s4759_s14 }
 0x2b6   : > { %v1384_v24 = vpop.f32.mrb[17].mxu0  ;;  %v1606_v34 = vmul.f32 %v5872_v19, %v1382_v55 }
 0x2b7   : > { %v1607_v47 = vmul.f32 %v5872_v19, %v1384_v24 }
 0x2b8   : > { %v1620_v39 = vadd.f32 %v5875_v1, %v1606_v34 }
 0x2b9   : > { %1954 = vrot.lane.b32.xlu0 %v5886_v5, %s4759_s14  ;;  %2000 = vrot.lane.b32.xlu1 %v5879_v27, %s4757_s12  ;;  %v1621_v21 = vadd.f32 %v5875_v1, %v1607_v47 }
 0x2ba   : > { %v5918_v10 = vmax.f32 %v1620_v39, 0.0 }
 0x2bb   : > { %v5930_v63 = vmax.f32 %v1621_v21, 0.0 }
 0x2bd   : > { %2002 = vrot.lane.b32.xlu0 %v5886_v5, %s4757_s12  ;;  %1858 = vrot.lane.b32.xlu1 %v5886_v5, %s4758_s13 }
 0x2c1   : > { %1900 = vrot.lane.b32.xlu0 %v5918_v10, %s4756_s11  ;;  %1636 = vrot.lane.b32.xlu1 %v5918_v10, %s4753_s26 }
 0x2c2   : > { %v1595_v8 = vpop.f32.mrb[18].mxu1 }
 0x2c3   : > { %v1597_v4 = vpop.f32.mrb[19].mxu1  ;;  %v1612_v50 = vmul.f32 %v5872_v19, %v1595_v8 }
 0x2c4   : > { %v1613_v32 = vmul.f32 %v5872_v19, %v1597_v4 }
 0x2c5   : > { %1996 = vrot.lane.b32.xlu0 %v5918_v10, %s4757_s12  ;;  %1684 = vrot.lane.b32.xlu1 %v5918_v10, %s4752_s25  ;;  %v1626_v43 = vadd.f32 %v5875_v1, %v1612_v50 }
 0x2c6   : > { %v1627_v40 = vadd.f32 %v5875_v1, %v1613_v32 }
 0x2c7   : > { %v5954_v20 = vmax.f32 %v1626_v43, 0.0 }
 0x2c8   : > { %v5970_v12 = vmax.f32 %v1627_v40, 0.0 }
 0x2c9   : > { %1638 = vrot.lane.b32.xlu0 %v5930_v63, %s4753_s26  ;;  %1732 = vrot.lane.b32.xlu1 %v5918_v10, %s4754_s15  ;;  %8045 = vst [vmem:[#allocation55_spill] sm:$0xff] %v5954_v20 }
 0x2ca   : > { %v1524_v2 = vpop.f32.mrb[18].mxu0  ;;  %8046 = vst [vmem:[#allocation56_spill] sm:$0xff] %v5970_v12 }
 0x2cb   : > { %v1526_v36 = vpop.f32.mrb[19].mxu0  ;;  %v1610_v55 = vmul.f32 %v5872_v19, %v1524_v2 }
 0x2cc   : > { %v1611_v39 = vmul.f32 %v5872_v19, %v1526_v36 }
 0x2cd   : > { %1686 = vrot.lane.b32.xlu0 %v5930_v63, %s4752_s25  ;;  %1780 = vrot.lane.b32.xlu1 %v5918_v10, %s4755_s24  ;;  %v1624_v24 = vadd.f32 %v5875_v1, %v1610_v55  ;;  %v4315_v55 = vld [vmem:[%s7875_s7 + $0x8] sm:$0xff] }
 0x2ce   : > { %v1625_v47 = vadd.f32 %v5875_v1, %v1611_v39 }
 0x2cf   : > { %v5986_v34 = vmax.f32 %v1624_v24, 0.0 }
 0x2d0   : > { %v6010_v8 = vmax.f32 %v1625_v47, 0.0 }
 0x2d1   : > { %1734 = vrot.lane.b32.xlu0 %v5930_v63, %s4754_s15  ;;  %1852 = vrot.lane.b32.xlu1 %v5918_v10, %s4758_s13  ;;  %8047 = vst [vmem:[#allocation57_spill] sm:$0xff] %v5986_v34 }
 0x2d2   : > { %8048 = vst [vmem:[#allocation58_spill] sm:$0xff] %v6010_v8 }
 0x2d5   : > { %1782 = vrot.lane.b32.xlu0 %v5930_v63, %s4755_s24  ;;  %1948 = vrot.lane.b32.xlu1 %v5918_v10, %s4759_s14 }
 0x2d9   : > { %1902 = vrot.lane.b32.xlu0 %v5930_v63, %s4756_s11  ;;  %1854 = vrot.lane.b32.xlu1 %v5930_v63, %s4758_s13 }
 0x2dd   : > { %1950 = vrot.lane.b32.xlu0 %v5930_v63, %s4759_s14  ;;  %1696 = vrot.lane.b32.xlu1 %v5954_v20, %s4752_s25 }
 0x2e1   : > { %1998 = vrot.lane.b32.xlu0 %v5930_v63, %s4757_s12  ;;  %1744 = vrot.lane.b32.xlu1 %v5954_v20, %s4754_s15 }
 0x2e5   : > { %1648 = vrot.lane.b32.xlu0 %v5954_v20, %s4753_s26  ;;  %1912 = vrot.lane.b32.xlu1 %v5954_v20, %s4756_s11 }
 0x2e9   : > { %1792 = vrot.lane.b32.xlu0 %v5954_v20, %s4755_s24  ;;  %1650 = vrot.lane.b32.xlu1 %v5970_v12, %s4753_s26 }
 0x2ed   : > { %1864 = vrot.lane.b32.xlu0 %v5954_v20, %s4758_s13  ;;  %1746 = vrot.lane.b32.xlu1 %v5970_v12, %s4754_s15 }
 0x2f1   : > { %1698 = vrot.lane.b32.xlu0 %v5970_v12, %s4752_s25  ;;  %1866 = vrot.lane.b32.xlu1 %v5970_v12, %s4758_s13 }
 0x2f5   : > { %1794 = vrot.lane.b32.xlu0 %v5970_v12, %s4755_s24  ;;  %1908 = vrot.lane.b32.xlu1 %v5986_v34, %s4756_s11 }
 0x2f9   : > { %1914 = vrot.lane.b32.xlu0 %v5970_v12, %s4756_s11  ;;  %1956 = vrot.lane.b32.xlu1 %v5986_v34, %s4759_s14 }
 0x2fd   : > { %1692 = vrot.lane.b32.xlu1 %v5986_v34, %s4752_s25  ;;  %1860 = vrot.lane.b32.xlu0 %v5986_v34, %s4758_s13 }
 0x301   : > { %2004 = vrot.lane.b32.xlu1 %v5986_v34, %s4757_s12  ;;  %1644 = vrot.lane.b32.xlu0 %v5986_v34, %s4753_s26 }
 0x305   : > { %1740 = vrot.lane.b32.xlu1 %v5986_v34, %s4754_s15  ;;  %1788 = vrot.lane.b32.xlu0 %v5986_v34, %s4755_s24  ;;  %v8050_v34 = vld [vmem:[#allocation3_spill] sm:$0xff] }
 0x309   : > { %1694 = vrot.lane.b32.xlu0 %v6010_v8, %s4752_s25  ;;  %1646 = vrot.lane.b32.xlu1 %v6010_v8, %s4753_s26 }
 0x30d   : > { %1742 = vrot.lane.b32.xlu0 %v6010_v8, %s4754_s15  ;;  %1790 = vrot.lane.b32.xlu1 %v6010_v8, %s4755_s24 }
 0x311   : > { %1960 = vrot.lane.b32.xlu0 %v5954_v20, %s4759_s14  ;;  %1862 = vrot.lane.b32.xlu1 %v6010_v8, %s4758_s13 }
 0x313   : > { %v6024_v19 = vpop.permute.xlu0 %1856  ;;  %v1641_v1 = vpop.permute.xlu1 %1640 }
 0x315   : > { %1910 = vrot.lane.b32.xlu0 %v6010_v8, %s4756_s11  ;;  %1958 = vrot.lane.b32.xlu1 %v6010_v8, %s4759_s14 }
 0x317   : > { %v6030_v21 = vpop.permute.xlu0 %1642  ;;  %v1689_v4 = vpop.permute.xlu1 %1688 }
 0x318   : > { %v1656_v2 = vsel %vm831_vm3, %v1641_v1, %v6030_v21 }
 0x319   : > { %2006 = vrot.lane.b32.xlu0 %v6010_v8, %s4757_s12  ;;  %1962 = vrot.lane.b32.xlu1 %v5970_v12, %s4759_s14  ;;  %v1671_v32 = vmul.f32 %v1656_v2, %v5183_v44  ;;  %v4314_v44 = vld [vmem:[%s7874_s6 + $0x8] sm:$0xff] }
 0x31b   : > { %v6039_v36 = vpop.permute.xlu0 %1690  ;;  %v1737_v50 = vpop.permute.xlu1 %1736 }
 0x31c   : > { %v1704_v43 = vsel %vm880_vm2, %v1689_v4, %v6039_v36 }
 0x31d   : > { %v1719_v40 = vmul.f32 %v5175_v42, %v1704_v43  ;;  %2010 = vrot.lane.b32.xlu0 %v5970_v12, %s4757_s12  ;;  %2008 = vrot.lane.b32.xlu1 %v5954_v20, %s4757_s12 }
 0x31f   : > { %v6053_v24 = vpop.permute.xlu0 %1738  ;;  %v1785_v39 = vpop.permute.xlu1 %1784  ;;  %v4542_v47 = vpack.c.bf16 %v1719_v40, %v1671_v32 }
 0x320   : > { %v1752_v53 = vsel %vm930_vm4, %v1737_v50, %v6053_v24 }
 0x321   : > { %4543 = vmatprep.subr.bf16.mxu1 %v4542_v47  ;;  %2424 = vperm.xlu0 %4736, %v4315_v55   ;;  %v1767_v20 = vmul.f32 %v8052_v60, %v1752_v53 }
 0x322   : > { %2409 = vperm.xlu1 %4737, %v4314_v44  }
 0x323   : > { %v6058_v42 = vpop.permute.xlu0 %1786  ;;  %v6060_v2 = vpop.permute.xlu1 %1904 }
 0x324   : > { %v1800_v23 = vsel %vm980_vm5, %v1785_v39, %v6058_v42 }
 0x325   : > { %v1815_v54 = vmul.f32 %v5223_v56, %v1800_v23 }
 0x327   : > { %v6062_v43 = vpop.permute.xlu0 %1906  ;;  %v6064_v31 = vpop.permute.xlu1 %1952  ;;  %v4546_v23 = vpack.c.bf16 %v1815_v54, %v1767_v20 }
 0x32b   : > { %v6066_v11 = vpop.permute.xlu0 %1954  ;;  %v6068_v6 = vpop.permute.xlu1 %2000 }
 0x32f   : > { %v6070_v32 = vpop.permute.xlu0 %2002  ;;  %v6072_v40 = vpop.permute.xlu1 %1858 }
 0x333   : > { %v6074_v35 = vpop.permute.xlu0 %1900  ;;  %v1637_v55 = vpop.permute.xlu1 %1636 }
 0x337   : > { %v6076_v47 = vpop.permute.xlu0 %1996  ;;  %v1685_v44 = vpop.permute.xlu1 %1684 }
 0x33b   : > { %v1639_v45 = vpop.permute.xlu0 %1638  ;;  %v1733_v18 = vpop.permute.xlu1 %1732 }
 0x33c   : > { %v1657_v26 = vsel %vm831_vm3, %v1639_v45, %v1641_v1  ;;  %v1658_v15 = vsel %vm831_vm3, %v1637_v55, %v1639_v45  ;;  %v8049_v1 = vld [vmem:[#allocation6_spill] sm:$0xff] }
 0x33d   : > { %v1669_v28 = vmul.f32 %v1658_v15, %v5228_v57  ;;  %v1670_v46 = vmul.f32 %v1657_v26, %v8049_v1 }
 0x33f   : > { %v1687_v13 = vpop.permute.xlu0 %1686  ;;  %v1781_v25 = vpop.permute.xlu1 %1780 }
 0x340   : > { %v1705_v8 = vsel %vm880_vm2, %v1687_v13, %v1689_v4  ;;  %v1706_v61 = vsel %vm880_vm2, %v1685_v44, %v1687_v13 }
 0x341   : > { %v1717_v45 = vmul.f32 %v8050_v34, %v1706_v61  ;;  %v1718_v12 = vmul.f32 %v8051_v16, %v1705_v8  ;;  %v8053_v61 = vld [vmem:[#allocation8_spill] sm:$0xff] }
 0x343   : > { %v4544_v52 = vpack.c.bf16 %v1718_v12, %v1670_v46  ;;  %v1735_v38 = vpop.permute.xlu0 %1734  ;;  %v6098_v62 = vpop.permute.xlu1 %1852  ;;  %v4526_v56 = vpack.c.bf16 %v1717_v45, %v1669_v28  ;;  %v8054_v46 = vld [vmem:[#allocation7_spill] sm:$0xff] }
 0x344   : > { %v1753_v13 = vsel %vm930_vm4, %v1735_v38, %v1737_v50 }
 0x345   : > { %4527 = vmatprep.subr.bf16.mxu0 %v4526_v56  ;;  %4545 = vmatpush1.bf16.msra.mxu1 %v4544_v52  ;;  %v1766_v60 = vmul.f32 %v8053_v61, %v1753_v13  ;;  %v1754_v13 = vsel %vm930_vm4, %v1733_v18, %v1735_v38 }
 0x346   : > { %4547 = vmatprep.subr.bf16.mxu1 %v4546_v23 }
 0x347   : > { %v1783_v57 = vpop.permute.xlu0 %1782  ;;  %v6102_v26 = vpop.permute.xlu1 %1948 }
 0x348   : > { %v1801_v16 = vsel %vm980_vm5, %v1783_v57, %v1785_v39  ;;  %v1802_v56 = vsel %vm980_vm5, %v1781_v25, %v1783_v57  ;;  %v8057_v57 = vld [vmem:[#allocation16_spill] sm:$0xff] }
 0x349   : > { %v1814_v53 = vmul.f32 %v8054_v46, %v1801_v16 }
 0x34b   : > { %v4548_v15 = vpack.c.bf16 %v1814_v53, %v1766_v60  ;;  %v1903_v12 = vpop.permute.xlu0 %1902  ;;  %v1855_v28 = vpop.permute.xlu1 %1854  ;;  %v8056_v60 = vld [vmem:[#allocation14_spill] sm:$0xff] }
 0x34c   : > { %v1813_v46 = vmul.f32 %v8056_v60, %v1802_v56  ;;  %v8060_v60 = vld [vmem:[#allocation20_spill] sm:$0xff] }
 0x34d   : > { %4549 = vmatpush1.bf16.msra.mxu1 %v4548_v15  ;;  %v1873_v15 = vsel %vm1055_vm6, %v1855_v28, %v6024_v19 }
 0x34e   : > { %v1885_v41 = vmul.f32 %v8060_v60, %v1873_v15  ;;  %v1921_v15 = vsel %vm1105_vm8, %v1903_v12, %v6060_v2 }
 0x34f   : > { %v1951_v54 = vpop.permute.xlu0 %1950  ;;  %v6108_v52 = vpop.permute.xlu1 %1696 }
 0x353   : > { %v6110_v20 = vpop.permute.xlu0 %1998  ;;  %v6112_v34 = vpop.permute.xlu1 %1744 }
 0x357   : > { %v6114_v8 = vpop.permute.xlu0 %1648  ;;  %v6116_v4 = vpop.permute.xlu1 %1912 }
 0x358   : > { %8055 = vst [vmem:[#allocation6_spill] sm:$0xff] %v6116_v4 }
 0x35b   : > { %v6118_v50 = vpop.permute.xlu0 %1792  ;;  %v6120_v39 = vpop.permute.xlu1 %1650 }
 0x35c   : > { %v1659_v23 = vsel %vm831_vm3, %v6120_v39, %v1637_v55  ;;  %v8059_v55 = vld [vmem:[#allocation15_spill] sm:$0xff] }
 0x35d   : > { %v1668_v4 = vmul.f32 %v1659_v23, %v8057_v57  ;;  %v1765_v59 = vmul.f32 %v8059_v55, %v1754_v13  ;;  %v8062_v13 = vld [vmem:[#allocation22_spill] sm:$0xff]  ;;  %v8063_v57 = vld [vmem:[#allocation24_spill] sm:$0xff]  ;;  %v8064_v55 = vld [vmem:[#allocation23_spill] sm:$0xff] }
 0x35f   : > { %v6122_v1 = vpop.permute.xlu0 %1864  ;;  %v6124_v45 = vpop.permute.xlu1 %1746  ;;  %v4530_v23 = vpack.c.bf16 %v1813_v46, %v1765_v59 }
 0x360   : > { %v1755_v38 = vsel %vm930_vm4, %v6124_v45, %v1733_v18  ;;  %v1969_v18 = vsel %vm1155_vm7, %v1951_v54, %v6064_v31 }
 0x363   : > { %v1699_v16 = vpop.permute.xlu0 %1698  ;;  %v6133_v61 = vpop.permute.xlu1 %1866 }
 0x364   : > { %v1707_v53 = vsel %vm880_vm2, %v1699_v16, %v1685_v44  ;;  %v1874_v44 = vsel %vm1055_vm6, %v6098_v62, %v1855_v28  ;;  %v1837_v28 = vmul.f32 %v8063_v57, %v5930_v63  ;;  %v8065_v63 = vld [vmem:[#allocation25_spill] sm:$0xff] }
 0x365   : > { %v1716_v9 = vmul.f32 %v8058_v49, %v1707_v53 }
 0x367   : > { %v4528_v7 = vpack.c.bf16 %v1716_v9, %v1668_v4  ;;  %v6147_v29 = vpop.permute.xlu0 %1794  ;;  %v6149_v56 = vpop.permute.xlu1 %1908  ;;  %v8061_v9 = vld [vmem:[#allocation21_spill] sm:$0xff] }
 0x368   : > { %v1803_v49 = vsel %vm980_vm5, %v6147_v29, %v1781_v25  ;;  %v1764_v4 = vmul.f32 %v8061_v9, %v1755_v38  ;;  %v1884_v25 = vmul.f32 %v8064_v55, %v1874_v44  ;;  %v6176_v38 = vld [vmem:[%s7873_s5 + $0x118] sm:$0xff]  ;;  %v1872_v44 = vsel %vm1055_vm6, %v6024_v19, %v6072_v40 }
 0x369   : > { %v1812_v53 = vmul.f32 %v8062_v13, %v1803_v49  ;;  %4529 = vmatpush1.bf16.msra.mxu0 %v4528_v7  ;;  %v1970_v7 = vsel %vm1155_vm7, %v6102_v26, %v1951_v54  ;;  %v1981_v49 = vmul.f32 %v8065_v63, %v1969_v18  ;;  %v1836_v9 = vmul.f32 %v5503_v51, %v5918_v10  ;;  %v6195_v54 = vld [vmem:[%s7873_s5 + $0x1d8] sm:$0xff] }
 0x36a   : > { %4531 = vmatprep.subr.bf16.mxu0 %v4530_v23  ;;  %v4534_v23 = vpack.c.bf16 %v1885_v41, %v1837_v28  ;;  %v1933_v13 = vmul.f32 %v5518_v33, %v1921_v15  ;;  %v6204_v51 = vld [vmem:[%s7873_s5 + $0x158] sm:$0xff]  ;;  %v1839_v10 = vmul.f32 %v6176_v38, %v5886_v5  ;;  %v1920_v33 = vsel %vm1105_vm8, %v6060_v2, %v6062_v43  ;;  %v8066_v28 = vld [vmem:[#allocation9_spill] sm:$0xff] }
 0x36b   : > { %v4532_v59 = vpack.c.bf16 %v1812_v53, %v1764_v4  ;;  %v6169_v46 = vpop.permute.xlu0 %1914  ;;  %v6171_v60 = vpop.permute.xlu1 %1956  ;;  %v1922_v4 = vsel %vm1105_vm8, %v6074_v35, %v1903_v12  ;;  %v1968_v19 = vsel %vm1155_vm7, %v6064_v31, %v6066_v11  ;;  %v4536_v12 = vpack.c.bf16 %v1884_v25, %v1836_v9  ;;  %v6225_v5 = vld [vmem:[%s7873_s5 + $0x198] sm:$0xff] }
 0x36c   : > { %v1967_v41 = vsel %vm1155_vm7, %v6066_v11, %v6171_v60  ;;  %v1980_v18 = vmul.f32 %v5544_v17, %v1970_v7  ;;  %v1886_v15 = vmul.f32 %v8066_v28, %v1872_v44  ;;  %v1919_v2 = vsel %vm1105_vm8, %v6062_v43, %v6149_v56  ;;  %v8067_v7 = vld [vmem:[#allocation12_spill] sm:$0xff]  ;;  %v8068_v63 = vld [vmem:[#allocation10_spill] sm:$0xff] }
 0x36d   : > { %4533 = vmatpush1.bf16.msra.mxu0 %v4532_v59  ;;  %v4538_v31 = vpack.c.bf16 %v1981_v49, %v1933_v13  ;;  %v1932_v11 = vmul.f32 %v5562_v22, %v1922_v4  ;;  %v2017_v55 = vsel %vm1205_vm9, %v6110_v20, %v6068_v6  ;;  %v1983_v25 = vmul.f32 %v6195_v54, %v1967_v41  ;;  %v8069_v13 = vld [vmem:[#allocation11_spill] sm:$0xff] }
 0x36e   : > { %4535 = vmatprep.subr.bf16.mxu0 %v4534_v23  ;;  %v1934_v43 = vmul.f32 %v8067_v7, %v1920_v33  ;;  %v1838_v23 = vmul.f32 %v8068_v63, %v5879_v27  ;;  %v1700_v22 = vsel %vm880_vm2, %v6108_v52, %v1699_v16  ;;  %v1935_v49 = vmul.f32 %v6225_v5, %v1919_v2 }
 0x36f   : > { %v6217_v53 = vpop.permute.xlu1 %1692  ;;  %v6219_v57 = vpop.permute.xlu0 %1860  ;;  %v1982_v41 = vmul.f32 %v8069_v13, %v1968_v19  ;;  %v2018_v27 = vsel %vm1205_vm9, %v6076_v47, %v6110_v20  ;;  %v2029_v33 = vmul.f32 %v5620_v48, %v2017_v55  ;;  %v2016_v16 = vsel %vm1205_vm9, %v6068_v6, %v6070_v32  ;;  %v8072_v55 = vld [vmem:[#allocation17_spill] sm:$0xff] }
 0x370   : > { %v1871_v17 = vsel %vm1055_vm6, %v6072_v40, %v6219_v57  ;;  %v4540_v40 = vpack.c.bf16 %v1980_v18, %v1932_v11  ;;  %v4554_v19 = vpack.c.bf16 %v1983_v25, %v1935_v49  ;;  %v1748_v20 = vsel %vm930_vm4, %v6112_v34, %v6124_v45  ;;  %v8070_v18 = vld [vmem:[#allocation19_spill] sm:$0xff]  ;;  %v8071_v11 = vld [vmem:[#allocation13_spill] sm:$0xff] }
 0x371   : > { %v1887_v59 = vmul.f32 %v6204_v51, %v1871_v17  ;;  %4537 = vmatpush1.bf16.msra.mxu0 %v4536_v12  ;;  %v4552_v12 = vpack.c.bf16 %v1886_v15, %v1838_v23  ;;  %v1723_v48 = vmul.f32 %v8070_v18, %v1700_v22  ;;  %v2028_v28 = vmul.f32 %v5663_v58, %v2018_v27  ;;  %v6287_v15 = vld [vmem:[%s7873_s5 + $0x20] sm:$0xff]  ;;  %v6295_v58 = vld [vmem:[%s7872_s4 + $0x8] sm:$0xff]  ;;  %v8073_v23 = vld [vmem:[#allocation26_spill] sm:$0xff] }
 0x372   : > { %4539 = vmatprep.subr.bf16.mxu0 %v4538_v31  ;;  %v1796_v45 = vsel %vm980_vm5, %v6118_v50, %v6147_v29  ;;  %v4556_v31 = vpack.c.bf16 %v1982_v41, %v1934_v43  ;;  %v2030_v29 = vmul.f32 %v8071_v11, %v2016_v16  ;;  %v1868_v7 = vsel %vm1055_vm6, %v6122_v1, %v6133_v61  ;;  %v6321_v49 = vld [vmem:[%s7873_s5 + $0xa0] sm:$0xff] }
 0x373   : > { %v6249_v44 = vpop.permute.xlu1 %2004  ;;  %v1645_v9 = vpop.permute.xlu0 %1644  ;;  %v4550_v4 = vpack.c.bf16 %v1887_v59, %v1839_v10  ;;  %v1652_v10 = vsel %vm831_vm3, %v6114_v8, %v6120_v39  ;;  %v6277_v39 = vld [vmem:[%s7873_s5 + $0x218] sm:$0xff]  ;;  %v1703_v59 = vsel %vm880_vm2, %v6039_v36, %v6217_v53  ;;  %v1875_v43 = vsel %vm1055_vm6, %v6133_v61, %v6098_v62  ;;  %v8074_v27 = vld [vmem:[#allocation27_spill] sm:$0xff] }
 0x374   : > { %v2015_v6 = vsel %vm1205_vm9, %v6070_v32, %v6249_v44  ;;  %v1655_v32 = vsel %vm831_vm3, %v6030_v21, %v1645_v9  ;;  %v1675_v25 = vmul.f32 %v1652_v10, %v8072_v55  ;;  %v1771_v21 = vmul.f32 %v5554_v30, %v1748_v20  ;;  %v8075_v16 = vld [vmem:[#allocation31_spill] sm:$0xff] }
 0x375   : > { %4541 = vmatpush1.bf16.msra.mxu0 %v4540_v40  ;;  %4551 = vmatprep.subr.bf16.mxu1 %v4550_v4  ;;  %v2031_v63 = vmul.f32 %v6277_v39, %v2015_v6  ;;  %v1819_v40 = vmul.f32 %v8073_v23, %v1796_v45  ;;  %v1672_v22 = vmul.f32 %v6287_v15, %v1655_v32 }
 0x376   : > { %2137 = vmatprep.subr.mxu0 %v2029_v33  ;;  %4553 = vmatpush1.bf16.msra.mxu1 %v4552_v12  ;;  %v4574_v30 = vpack.c.bf16 %v1723_v48, %v1675_v25  ;;  %v1720_v36 = vmul.f32 %v5625_v0, %v1703_v59  ;;  %v8079_v25 = vld [vmem:[#allocation32_spill] sm:$0xff] }
 0x377   : > { %v1741_v2 = vpop.permute.xlu1 %1740  ;;  %4555 = vmatprep.subr.bf16.mxu1 %v4554_v19  ;;  %v1789_v17 = vpop.permute.xlu0 %1788  ;;  %v8076_v19 = vld [vmem:[#allocation28_spill] sm:$0xff]  ;;  %v4578_v6 = vpack.c.bf16 %v1819_v40, %v1771_v21  ;;  %v8080_v21 = vld [vmem:[#allocation29_spill] sm:$0xff]  ;;  %v8082_v40 = vld [vmem:[#allocation30_spill] sm:$0xff] }
 0x378   : > { %v1751_v62 = vsel %vm930_vm4, %v6053_v24, %v1741_v2  ;;  %v1799_v61 = vsel %vm980_vm5, %v6058_v42, %v1789_v17  ;;  %v4560_v48 = vpack.c.bf16 %v1720_v36, %v1672_v22  ;;  %v8083_v22 = vld [vmem:[#allocation55_spill] sm:$0xff] }
 0x379   : > { %2138 = vmatpush1.msra.mxu0 %v2028_v28  ;;  %v8078_v28 = vld [vmem:[#allocation36_spill] sm:$0xff] }
 0x37a   : > { %4310 = vmatmul.mubr.msk.f32.vlgmr.msra.gmra.mrb[20].mxu0 %vm1312_vm10, %v6295_v58  ;;  %4557 = vmatpush1.bf16.msra.mxu1 %v4556_v31 }
 0x37b   : > { %2208 = vmatprep.subr.mxu1 %v2031_v63  ;;  %v1695_v4 = vpop.permute.xlu0 %1694  ;;  %v1647_v13 = vpop.permute.xlu1 %1646  ;;  %2327 = vmatprep.mubr.f32.mxu0 %v8009_v3  ;;  %v8081_v63 = vld [vmem:[#allocation33_spill] sm:$0xff] }
 0x37c   : > { %v1701_v0 = vsel %vm880_vm2, %v1695_v4, %v6108_v52  ;;  %v1702_v41 = vsel %vm880_vm2, %v6217_v53, %v1695_v4  ;;  %v1653_v24 = vsel %vm831_vm3, %v1647_v13, %v6114_v8  ;;  %v1654_v42 = vsel %vm831_vm3, %v1645_v9, %v1647_v13  ;;  %v8077_v52 = vld [vmem:[#allocation38_spill] sm:$0xff]  ;;  %v8086_v13 = vld [vmem:[#allocation56_spill] sm:$0xff] }
 0x37d   : > { %v1721_v12 = vmul.f32 %v5602_v14, %v1702_v41  ;;  %v1722_v33 = vmul.f32 %v8074_v27, %v1701_v0  ;;  %v1673_v10 = vmul.f32 %v1654_v42, %v8075_v16  ;;  %v1674_v20 = vmul.f32 %v1653_v24, %v8076_v19  ;;  %v8087_v0 = vld [vmem:[#allocation35_spill] sm:$0xff]  ;;  %v8088_v42 = vld [vmem:[#allocation57_spill] sm:$0xff]  ;;  %v8091_v19 = vld [vmem:[#allocation46_spill] sm:$0xff] }
 0x37e   : > { %v1891_v18 = vmul.f32 %v8077_v52, %v1875_v43  ;;  %v1768_v53 = vmul.f32 %v6321_v49, %v1751_v62  ;;  %2209 = vmatpush1.msra.mxu1 %v2030_v29  ;;  %v1816_v8 = vmul.f32 %v8078_v28, %v1799_v61  ;;  %v1843_v41 = vmul.f32 %v8087_v0, %v8086_v13  ;;  %v8090_v16 = vld [vmem:[#allocation45_spill] sm:$0xff] }
 0x37f   : > { %v4576_v45 = vpack.c.bf16 %v1722_v33, %v1674_v20  ;;  %4311 = vmatmul.mubr.msk.f32.vlgmr.msra.gmra.mrb[20].mxu1 %vm1312_vm10, %v6295_v58  ;;  %4575 = vmatprep.subr.bf16.mxu1 %v4574_v30  ;;  %v1743_v14 = vpop.permute.xlu0 %1742  ;;  %v1791_v9 = vpop.permute.xlu1 %1790  ;;  %v4558_v32 = vpack.c.bf16 %v1721_v12, %v1673_v10  ;;  %v8089_v12 = vld [vmem:[#allocation43_spill] sm:$0xff] }
 0x380   : > { %v1749_v31 = vsel %vm930_vm4, %v1743_v14, %v6112_v34  ;;  %v1750_v11 = vsel %vm930_vm4, %v1741_v2, %v1743_v14  ;;  %v1797_v29 = vsel %vm980_vm5, %v1791_v9, %v6118_v50  ;;  %v1798_v55 = vsel %vm980_vm5, %v1789_v17, %v1791_v9  ;;  %2398 = vmatprep.mubr.f32.mxu1 %v8009_v3  ;;  %v8084_v2 = vld [vmem:[#allocation34_spill] sm:$0xff]  ;;  %v8085_v50 = vld [vmem:[#allocation37_spill] sm:$0xff] }
 0x381   : > { %v1769_v59 = vmul.f32 %v8079_v25, %v1750_v11  ;;  %v1770_v43 = vmul.f32 %v8080_v21, %v1749_v31  ;;  %v1817_v23 = vmul.f32 %v8081_v63, %v1798_v55  ;;  %v1818_v34 = vmul.f32 %v8082_v40, %v1797_v29  ;;  %4559 = vmatprep.subr.bf16.mxu0 %v4558_v32  ;;  %v8094_v9 = vld [vmem:[#allocation6_spill] sm:$0xff]  ;;  %v8095_v11 = vld [vmem:[#allocation49_spill] sm:$0xff] }
 0x382   : > { %v1842_v30 = vmul.f32 %v8084_v2, %v8083_v22  ;;  %4577 = vmatpush1.bf16.msra.mxu1 %v4576_v45  ;;  %4561 = vmatpush1.bf16.msra.mxu0 %v4560_v48  ;;  %v1890_v36 = vmul.f32 %v8085_v50, %v1868_v7  ;;  %v4564_v24 = vpack.c.bf16 %v1816_v8, %v1768_v53  ;;  %v8092_v48 = vld [vmem:[#allocation58_spill] sm:$0xff]  ;;  %v8099_v50 = vld [vmem:[#allocation41_spill] sm:$0xff] }
 0x383   : > { %v4580_v62 = vpack.c.bf16 %v1818_v34, %v1770_v43  ;;  %4579 = vmatprep.subr.bf16.mxu1 %v4578_v6  ;;  %v1961_v17 = vpop.permute.xlu0 %1960  ;;  %v1863_v61 = vpop.permute.xlu1 %1862  ;;  %v4562_v4 = vpack.c.bf16 %v1817_v23, %v1769_v59  ;;  %v1840_v27 = vmul.f32 %v8089_v12, %v8088_v42  ;;  %v4582_v52 = vpack.c.bf16 %v1891_v18, %v1843_v41  ;;  %v8093_v6 = vld [vmem:[#allocation44_spill] sm:$0xff]  ;;  %v8096_v55 = vld [vmem:[#allocation50_spill] sm:$0xff]  ;;  %v8097_v59 = vld [vmem:[#allocation51_spill] sm:$0xff] }
 0x384   : > { %v1869_v33 = vsel %vm1055_vm6, %v1863_v61, %v6122_v1  ;;  %v1870_v7 = vsel %vm1055_vm6, %v6219_v57, %v1863_v61  ;;  %v1841_v53 = vmul.f32 %v8093_v6, %v8092_v48  ;;  %v4584_v28 = vpack.c.bf16 %v1890_v36, %v1842_v30  ;;  %v8098_v43 = vld [vmem:[#allocation52_spill] sm:$0xff] }
 0x385   : > { %v1888_v10 = vmul.f32 %v8090_v16, %v1870_v7  ;;  %v1889_v20 = vmul.f32 %v8091_v19, %v1869_v33  ;;  %4563 = vmatprep.subr.bf16.mxu0 %v4562_v4  ;;  %v1923_v23 = vsel %vm1105_vm8, %v6169_v46, %v6074_v35  ;;  %v8101_v4 = vld [vmem:[#allocation39_spill] sm:$0xff]  ;;  %v8102_v35 = vld [vmem:[#allocation40_spill] sm:$0xff]  ;;  %v8103_v33 = vld [vmem:[#allocation53_spill] sm:$0xff] }
 0x386   : > { %4581 = vmatpush1.bf16.msra.mxu1 %v4580_v62  ;;  %4565 = vmatpush1.bf16.msra.mxu0 %v4564_v24  ;;  %v8100_v62 = vld [vmem:[#allocation42_spill] sm:$0xff]  ;;  %v8104_v16 = vld [vmem:[#allocation47_spill] sm:$0xff] }
 0x387   : > { %v4568_v8 = vpack.c.bf16 %v1888_v10, %v1840_v27  ;;  %4583 = vmatprep.subr.bf16.mxu1 %v4582_v52  ;;  %v1911_v45 = vpop.permute.xlu0 %1910  ;;  %v1959_v1 = vpop.permute.xlu1 %1958  ;;  %v4566_v14 = vpack.c.bf16 %v1889_v20, %v1841_v53  ;;  %v1939_v61 = vmul.f32 %v8100_v62, %v1923_v23  ;;  %v8106_v20 = vld [vmem:[#allocation48_spill] sm:$0xff] }
 0x388   : > { %v1917_v57 = vsel %vm1105_vm8, %v1911_v45, %v8094_v9  ;;  %v1918_v32 = vsel %vm1105_vm8, %v6149_v56, %v1911_v45  ;;  %v1965_v18 = vsel %vm1155_vm7, %v1959_v1, %v1961_v17  ;;  %v1966_v31 = vsel %vm1155_vm7, %v6171_v60, %v1959_v1 }
 0x389   : > { %v1936_v29 = vmul.f32 %v8095_v11, %v1918_v32  ;;  %v1937_v25 = vmul.f32 %v8096_v55, %v1917_v57  ;;  %v1984_v21 = vmul.f32 %v8097_v59, %v1966_v31  ;;  %v1985_v63 = vmul.f32 %v8098_v43, %v1965_v18  ;;  %4567 = vmatprep.subr.bf16.mxu0 %v4566_v14 }
 0x38a   : > { %v1916_v56 = vsel %vm1105_vm8, %v8094_v9, %v6169_v46  ;;  %4585 = vmatpush1.bf16.msra.mxu1 %v4584_v28  ;;  %4569 = vmatpush1.bf16.msra.mxu0 %v4568_v8 }
 0x38b   : > { %v4572_v60 = vpack.c.bf16 %v1984_v21, %v1936_v29  ;;  %v2007_v40 = vpop.permute.xlu0 %2006  ;;  %v1963_v34 = vpop.permute.xlu1 %1962  ;;  %v4570_v22 = vpack.c.bf16 %v1985_v63, %v1937_v25  ;;  %v1938_v36 = vmul.f32 %v8099_v50, %v1916_v56 }
 0x38c   : > { %v1964_v2 = vsel %vm1155_vm7, %v1961_v17, %v1963_v34  ;;  %v1971_v30 = vsel %vm1155_vm7, %v1963_v34, %v6102_v26  ;;  %v2014_v0 = vsel %vm1205_vm9, %v6249_v44, %v2007_v40  ;;  %v8105_v44 = vld [vmem:[#allocation54_spill] sm:$0xff] }
 0x38d   : > { %v1986_v13 = vmul.f32 %v8101_v4, %v1964_v2  ;;  %v1987_v46 = vmul.f32 %v8102_v35, %v1971_v30  ;;  %4571 = vmatprep.subr.bf16.mxu0 %v4570_v22  ;;  %v2032_v19 = vmul.f32 %v8105_v44, %v2014_v0  ;;  %v4386_v0 = vld [vmem:[%s7875_s7 + $0x10] sm:$0xff]  ;;  %v6633_v44 = vld [vmem:[%s7873_s5 + $0x58] sm:$0xff] }
 0x38e   : > { %4573 = vmatpush1.bf16.msra.mxu0 %v4572_v60  ;;  %8108 = vst [vmem:[#allocation4_spill] sm:$0xff] %v6633_v44 }
 0x38f   : > { %v4588_v41 = vpack.c.bf16 %v1986_v13, %v1938_v36  ;;  %v2011_v17 = vpop.permute.xlu0 %2010  ;;  %v2009_v24 = vpop.permute.xlu1 %2008  ;;  %v4586_v42 = vpack.c.bf16 %v1987_v46, %v1939_v61 }
 0x390   : > { %v2019_v26 = vsel %vm1205_vm9, %v2011_v17, %v6076_v47  ;;  %v2013_v12 = vsel %vm1205_vm9, %v2007_v40, %v2009_v24  ;;  %v2012_v27 = vsel %vm1205_vm9, %v2009_v24, %v2011_v17 }
 0x391   : > { %4587 = vmatprep.subr.bf16.mxu1 %v4586_v42  ;;  %v2033_v7 = vmul.f32 %v8103_v33, %v2013_v12  ;;  %v2035_v10 = vmul.f32 %v8104_v16, %v2019_v26  ;;  %v2034_v52 = vmul.f32 %v8106_v20, %v2012_v27  ;;  %v4385_v42 = vld [vmem:[%s7874_s6 + $0x10] sm:$0xff]  ;;  %v6625_v16 = vld [vmem:[%s7873_s5 + $0x18] sm:$0xff] }
 0x392   : > { %4589 = vmatpush1.bf16.msra.mxu1 %v4588_v41  ;;  %8107 = vst [vmem:[#allocation3_spill] sm:$0xff] %v6625_v16 }
 0x393   : > { %2279 = vmatprep.subr.mxu0 %v2033_v7  ;;  %2350 = vmatprep.subr.mxu1 %v2035_v10 }
 0x394   : > { %2280 = vmatpush1.msra.mxu0 %v2032_v19 }
 0x395   : > { %4312 = vmatmul.mubr.msk.f32.vlgmr.msra.gmra.mrb[22].mxu0 %vm1312_vm10, %v6295_v58 }
 0x396   : > { %2351 = vmatpush1.msra.mxu1 %v2034_v52  ;;  %2992 = vmatprep.mubr.f32.mxu0 %v8009_v3 }
 0x397   : > { %4313 = vmatmul.mubr.msk.f32.vlgmr.msra.gmra.mrb[22].mxu1 %vm1312_vm10, %v6295_v58 }
 0x398   : > { %3063 = vmatprep.mubr.f32.mxu1 %v8009_v3 }
 0x3a0   : > { %v6437_v28 = vpop.permute.xlu0 %2424 }
 0x3a1   : > { %v6434_v47 = vpop.permute.xlu1 %2409 }
 0x44d   : > { %v2187_v48 = vpop.f32.mrb[20].mxu0 }
 0x44e   : > { %v2412_v6 = vmul.f32 %v6434_v47, %v2187_v48  ;;  %v2189_v53 = vpop.f32.mrb[21].mxu0 }
 0x44f   : > { %v2413_v29 = vmul.f32 %v6434_v47, %v2189_v53 }
 0x450   : > { %v2427_v8 = vadd.f32 %v6437_v28, %v2412_v6 }
 0x451   : > { %v2428_v21 = vadd.f32 %v6437_v28, %v2413_v29 }
 0x452   : > { %v6440_v45 = vmax.f32 %v2427_v8, 0.0  ;;  %v2258_v1 = vpop.f32.mrb[20].mxu1 }
 0x453   : > { %v2414_v14 = vmul.f32 %v6434_v47, %v2258_v1  ;;  %v2260_v9 = vpop.f32.mrb[21].mxu1  ;;  %v6482_v43 = vmax.f32 %v2428_v21, 0.0  ;;  %v6687_v21 = vld [vmem:[%s7873_s5 + $0x10] sm:$0xff] }
 0x454   : > { %2491 = vrot.lane.b32.xlu0 %v6440_v45, %s4752_s25  ;;  %v2415_v32 = vmul.f32 %v6434_v47, %v2260_v9  ;;  %8113 = vst [vmem:[#allocation16_spill] sm:$0xff] %v6687_v21 }
 0x455   : > { %v2429_v58 = vadd.f32 %v6437_v28, %v2414_v14 }
 0x456   : > { %v2430_v18 = vadd.f32 %v6437_v28, %v2415_v32  ;;  %v6662_v32 = vld [vmem:[%s7873_s5 + $0xd8] sm:$0xff] }
 0x457   : > { %v6446_v57 = vmax.f32 %v2429_v58, 0.0  ;;  %v6657_v58 = vld [vmem:[%s7873_s5 + $0x48] sm:$0xff]  ;;  %8110 = vst [vmem:[#allocation8_spill] sm:$0xff] %v6662_v32 }
 0x458   : > { %2539 = vrot.lane.b32.xlu0 %v6440_v45, %s4754_s15  ;;  %v6471_v55 = vmax.f32 %v2430_v18, 0.0  ;;  %8109 = vst [vmem:[#allocation5_spill] sm:$0xff] %v6657_v58 }
 0x459   : > { %2447 = vrot.lane.b32.xlu1 %v6446_v57, %s4753_s26 }
 0x45c   : > { %2711 = vrot.lane.b32.xlu0 %v6446_v57, %s4756_s11 }
 0x45d   : > { %2495 = vrot.lane.b32.xlu1 %v6446_v57, %s4752_s25 }
 0x460   : > { %2807 = vrot.lane.b32.xlu0 %v6446_v57, %s4757_s12 }
 0x461   : > { %2543 = vrot.lane.b32.xlu1 %v6446_v57, %s4754_s15 }
 0x464   : > { %2755 = vrot.lane.b32.xlu0 %v6440_v45, %s4759_s14 }
 0x465   : > { %2591 = vrot.lane.b32.xlu1 %v6446_v57, %s4755_s24 }
 0x468   : > { %2803 = vrot.lane.b32.xlu0 %v6440_v45, %s4757_s12  ;;  %v2329_v31 = vpop.f32.mrb[22].mxu0 }
 0x469   : > { %2443 = vrot.lane.b32.xlu1 %v6440_v45, %s4753_s26  ;;  %v2331_v11 = vpop.f32.mrb[23].mxu0  ;;  %v2416_v63 = vmul.f32 %v6434_v47, %v2329_v31  ;;  %v6670_v31 = vld [vmem:[%s7873_s5 + $0x50] sm:$0xff] }
 0x46a   : > { %v2400_v25 = vpop.f32.mrb[22].mxu1  ;;  %v2417_v50 = vmul.f32 %v6434_v47, %v2331_v11  ;;  %8111 = vst [vmem:[#allocation7_spill] sm:$0xff] %v6670_v31 }
 0x46b   : > { %v2402_v59 = vpop.f32.mrb[23].mxu1  ;;  %v2431_v56 = vadd.f32 %v6437_v28, %v2416_v63  ;;  %v2418_v60 = vmul.f32 %v6434_v47, %v2400_v25  ;;  %v6692_v63 = vld [vmem:[%s7873_s5 + $0x98] sm:$0xff] }
 0x46c   : > { %2449 = vrot.lane.b32.xlu0 %v6471_v55, %s4753_s26  ;;  %v2419_v22 = vmul.f32 %v6434_v47, %v2402_v59  ;;  %v2432_v36 = vadd.f32 %v6437_v28, %v2417_v50  ;;  %v6682_v59 = vld [vmem:[%s7873_s5 + $0x8] sm:$0xff]  ;;  %8114 = vst [vmem:[#allocation18_spill] sm:$0xff] %v6692_v63 }
 0x46d   : > { %2663 = vrot.lane.b32.xlu1 %v6446_v57, %s4758_s13  ;;  %v6514_v23 = vmax.f32 %v2431_v56, 0.0  ;;  %v2433_v40 = vadd.f32 %v6437_v28, %v2418_v60  ;;  %8112 = vst [vmem:[#allocation14_spill] sm:$0xff] %v6682_v59 }
 0x46e   : > { %v2434_v2 = vadd.f32 %v6437_v28, %v2419_v22  ;;  %v6566_v62 = vmax.f32 %v2432_v36, 0.0 }
 0x46f   : > { %v6526_v34 = vmax.f32 %v2433_v40, 0.0 }
 0x470   : > { %2497 = vrot.lane.b32.xlu0 %v6471_v55, %s4752_s25  ;;  %v6550_v30 = vmax.f32 %v2434_v2, 0.0 }
 0x471   : > { %2587 = vrot.lane.b32.xlu1 %v6440_v45, %s4755_s24 }
 0x474   : > { %2493 = vrot.lane.b32.xlu0 %v6482_v43, %s4752_s25 }
 0x475   : > { %2759 = vrot.lane.b32.xlu1 %v6446_v57, %s4759_s14 }
 0x478   : > { %2545 = vrot.lane.b32.xlu0 %v6471_v55, %s4754_s15 }
 0x479   : > { %2659 = vrot.lane.b32.xlu1 %v6440_v45, %s4758_s13 }
 0x47c   : > { %2593 = vrot.lane.b32.xlu0 %v6471_v55, %s4755_s24 }
 0x47d   : > { %2707 = vrot.lane.b32.xlu1 %v6440_v45, %s4756_s11 }
 0x480   : > { %2589 = vrot.lane.b32.xlu0 %v6482_v43, %s4755_s24 }
 0x481   : > { %2445 = vrot.lane.b32.xlu1 %v6482_v43, %s4753_s26 }
 0x484   : > { %2713 = vrot.lane.b32.xlu0 %v6471_v55, %s4756_s11 }
 0x485   : > { %2541 = vrot.lane.b32.xlu1 %v6482_v43, %s4754_s15 }
 0x488   : > { %2761 = vrot.lane.b32.xlu0 %v6471_v55, %s4759_s14 }
 0x489   : > { %2665 = vrot.lane.b32.xlu1 %v6471_v55, %s4758_s13 }
 0x48c   : > { %2661 = vrot.lane.b32.xlu0 %v6482_v43, %s4758_s13 }
 0x48d   : > { %2709 = vrot.lane.b32.xlu1 %v6482_v43, %s4756_s11 }
 0x490   : > { %2809 = vrot.lane.b32.xlu0 %v6471_v55, %s4757_s12 }
 0x491   : > { %2715 = vrot.lane.b32.xlu1 %v6514_v23, %s4756_s11 }
 0x494   : > { %2757 = vrot.lane.b32.xlu0 %v6482_v43, %s4759_s14 }
 0x495   : > { %2763 = vrot.lane.b32.xlu1 %v6514_v23, %s4759_s14 }
 0x498   : > { %2805 = vrot.lane.b32.xlu0 %v6482_v43, %s4757_s12 }
 0x499   : > { %2503 = vrot.lane.b32.xlu1 %v6526_v34, %s4752_s25 }
 0x49c   : > { %2667 = vrot.lane.b32.xlu0 %v6514_v23, %s4758_s13 }
 0x49d   : > { %2811 = vrot.lane.b32.xlu1 %v6514_v23, %s4757_s12 }
 0x4a0   : > { %2455 = vrot.lane.b32.xlu0 %v6526_v34, %s4753_s26 }
 0x4a1   : > { %2551 = vrot.lane.b32.xlu1 %v6526_v34, %s4754_s15 }
 0x4a4   : > { %2599 = vrot.lane.b32.xlu0 %v6526_v34, %s4755_s24 }
 0x4a5   : > { %2451 = vrot.lane.b32.xlu1 %v6514_v23, %s4753_s26 }
 0x4a8   : > { %2499 = vrot.lane.b32.xlu0 %v6514_v23, %s4752_s25 }
 0x4a9   : > { %2671 = vrot.lane.b32.xlu1 %v6526_v34, %s4758_s13 }
 0x4ac   : > { %2505 = vrot.lane.b32.xlu0 %v6550_v30, %s4752_s25 }
 0x4ad   : > { %2547 = vrot.lane.b32.xlu1 %v6514_v23, %s4754_s15 }
 0x4b0   : > { %2553 = vrot.lane.b32.xlu0 %v6550_v30, %s4754_s15 }
 0x4b1   : > { %2457 = vrot.lane.b32.xlu1 %v6550_v30, %s4753_s26 }
 0x4b4   : > { %2595 = vrot.lane.b32.xlu0 %v6514_v23, %s4755_s24 }
 0x4b5   : > { %2719 = vrot.lane.b32.xlu1 %v6526_v34, %s4756_s11 }
 0x4b8   : > { %2453 = vrot.lane.b32.xlu0 %v6566_v62, %s4753_s26 }
 0x4b9   : > { %2601 = vrot.lane.b32.xlu1 %v6550_v30, %s4755_s24 }
 0x4bc   : > { %2597 = vrot.lane.b32.xlu0 %v6566_v62, %s4755_s24 }
 0x4bd   : > { %2501 = vrot.lane.b32.xlu1 %v6566_v62, %s4752_s25 }
 0x4c0   : > { %2767 = vrot.lane.b32.xlu0 %v6526_v34, %s4759_s14 }
 0x4c1   : > { %2549 = vrot.lane.b32.xlu1 %v6566_v62, %s4754_s15 }
 0x4c4   : > { %2769 = vrot.lane.b32.xlu0 %v6550_v30, %s4759_s14 }
 0x4c5   : > { %2815 = vrot.lane.b32.xlu1 %v6526_v34, %s4757_s12 }
 0x4c6   : > { %v6584_v61 = vpop.permute.xlu0 %2491 }
 0x4c8   : > { %2817 = vrot.lane.b32.xlu0 %v6550_v30, %s4757_s12 }
 0x4c9   : > { %2673 = vrot.lane.b32.xlu1 %v6550_v30, %s4758_s13 }
 0x4ca   : > { %v6590_v4 = vpop.permute.xlu0 %2539 }
 0x4cb   : > { %v2448_v13 = vpop.permute.xlu1 %2447 }
 0x4cc   : > { %2717 = vrot.lane.b32.xlu0 %v6566_v62, %s4756_s11 }
 0x4cd   : > { %2721 = vrot.lane.b32.xlu1 %v6550_v30, %s4756_s11 }
 0x4ce   : > { %v6596_v35 = vpop.permute.xlu0 %2711 }
 0x4cf   : > { %v2496_v46 = vpop.permute.xlu1 %2495 }
 0x4d0   : > { %2813 = vrot.lane.b32.xlu0 %v6566_v62, %s4757_s12 }
 0x4d1   : > { %2669 = vrot.lane.b32.xlu1 %v6566_v62, %s4758_s13 }
 0x4d2   : > { %v6605_v41 = vpop.permute.xlu0 %2807 }
 0x4d3   : > { %v2544_v17 = vpop.permute.xlu1 %2543 }
 0x4d4   : > { %3231 = vperm.xlu0 %4736, %v4386_v0  }
 0x4d5   : > { %2765 = vrot.lane.b32.xlu1 %v6566_v62, %s4759_s14 }
 0x4d6   : > { %v6609_v24 = vpop.permute.xlu0 %2755 }
 0x4d7   : > { %v2592_v26 = vpop.permute.xlu1 %2591 }
 0x4d9   : > { %3216 = vperm.xlu1 %4737, %v4385_v42  }
 0x4da   : > { %v6614_v12 = vpop.permute.xlu0 %2803 }
 0x4db   : > { %v6616_v27 = vpop.permute.xlu1 %2443 }
 0x4de   : > { %v6618_v33 = vpop.permute.xlu0 %2449 }
 0x4df   : > { %v6620_v7 = vpop.permute.xlu1 %2663  ;;  %v2463_v10 = vsel %vm831_vm3, %v2448_v13, %v6618_v33 }
 0x4e0   : > { %v2478_v47 = vmul.f32 %v6625_v16, %v2463_v10  ;;  %v6711_v10 = vld [vmem:[%s7873_s5 + $0xd0] sm:$0xff] }
 0x4e1   : > { %8115 = vst [vmem:[#allocation15_spill] sm:$0xff] %v6711_v10 }
 0x4e2   : > { %v6635_v19 = vpop.permute.xlu0 %2497 }
 0x4e3   : > { %v2511_v20 = vsel %vm880_vm2, %v2496_v46, %v6635_v19  ;;  %v6640_v52 = vpop.permute.xlu1 %2587 }
 0x4e4   : > { %v2526_v48 = vmul.f32 %v6633_v44, %v2511_v20 }
 0x4e6   : > { %v2494_v6 = vpop.permute.xlu0 %2493  ;;  %v4606_v53 = vpack.c.bf16 %v2526_v48, %v2478_v47  ;;  %v6719_v47 = vld [vmem:[%s7873_s5 + $0x90] sm:$0xff] }
 0x4e7   : > { %v6644_v28 = vpop.permute.xlu1 %2759  ;;  %v2512_v11 = vsel %vm880_vm2, %v2494_v6, %v2496_v46  ;;  %v2513_v29 = vsel %vm880_vm2, %v6584_v61, %v2494_v6  ;;  %8116 = vst [vmem:[#allocation20_spill] sm:$0xff] %v6719_v47 }
 0x4e8   : > { %4607 = vmatprep.subr.bf16.mxu1 %v4606_v53  ;;  %v2524_v50 = vmul.f32 %v6657_v58, %v2513_v29  ;;  %v2525_v36 = vmul.f32 %v6670_v31, %v2512_v11  ;;  %v2646_v58 = vmul.f32 %v6176_v38, %v6471_v55 }
 0x4ea   : > { %v6646_v8 = vpop.permute.xlu0 %2545 }
 0x4eb   : > { %v6648_v1 = vpop.permute.xlu1 %2659  ;;  %v2559_v56 = vsel %vm930_vm4, %v2544_v17, %v6646_v8 }
 0x4ec   : > { %v2574_v42 = vmul.f32 %v6692_v63, %v2559_v56 }
 0x4ee   : > { %v6650_v14 = vpop.permute.xlu0 %2593 }
 0x4ef   : > { %v6652_v9 = vpop.permute.xlu1 %2707  ;;  %v2607_v18 = vsel %vm980_vm5, %v2592_v26, %v6650_v14 }
 0x4f0   : > { %v2622_v40 = vmul.f32 %v6662_v32, %v2607_v18 }
 0x4f2   : > { %v6677_v25 = vpop.permute.xlu0 %2589  ;;  %v4610_v11 = vpack.c.bf16 %v2622_v40, %v2574_v42 }
 0x4f3   : > { %v2446_v60 = vpop.permute.xlu1 %2445 }
 0x4f4   : > { %v2464_v22 = vsel %vm831_vm3, %v2446_v60, %v2448_v13  ;;  %v2465_v2 = vsel %vm831_vm3, %v6616_v27, %v2446_v60  ;;  %v2608_v13 = vsel %vm980_vm5, %v6677_v25, %v2592_v26 }
 0x4f5   : > { %v2476_v46 = vmul.f32 %v6682_v59, %v2465_v2  ;;  %v2477_v0 = vmul.f32 %v6687_v21, %v2464_v22  ;;  %v2621_v29 = vmul.f32 %v6711_v10, %v2608_v13  ;;  %v6745_v13 = vld [vmem:[%s7873_s5 + $0x150] sm:$0xff] }
 0x4f6   : > { %v2714_v20 = vpop.permute.xlu0 %2713  ;;  %8117 = vst [vmem:[#allocation21_spill] sm:$0xff] %v6745_v13  ;;  %v6786_v21 = vld [vmem:[%s7873_s5 + $0x190] sm:$0xff] }
 0x4f7   : > { %v4608_v48 = vpack.c.bf16 %v2525_v36, %v2477_v0  ;;  %v6721_v6 = vpop.permute.xlu1 %2541  ;;  %v4590_v53 = vpack.c.bf16 %v2524_v50, %v2476_v46  ;;  %8121 = vst [vmem:[#allocation25_spill] sm:$0xff] %v6786_v21  ;;  %v2727_v59 = vsel %vm1105_vm8, %v6596_v35, %v2714_v20 }
 0x4f8   : > { %v2560_v18 = vsel %vm930_vm4, %v6721_v6, %v2544_v17 }
 0x4f9   : > { %v2573_v56 = vmul.f32 %v6719_v47, %v2560_v18  ;;  %4591 = vmatprep.subr.bf16.mxu0 %v4590_v53  ;;  %4609 = vmatpush1.bf16.msra.mxu1 %v4608_v48  ;;  %v6756_v18 = vld [vmem:[%s7873_s5 + $0x110] sm:$0xff] }
 0x4fa   : > { %v2762_v26 = vpop.permute.xlu0 %2761  ;;  %4611 = vmatprep.subr.bf16.mxu1 %v4610_v11  ;;  %8118 = vst [vmem:[#allocation22_spill] sm:$0xff] %v6756_v18  ;;  %v6772_v47 = vld [vmem:[%s7873_s5 + $0x1d0] sm:$0xff] }
 0x4fb   : > { %v4612_v60 = vpack.c.bf16 %v2621_v29, %v2573_v56  ;;  %v2666_v22 = vpop.permute.xlu1 %2665  ;;  %8120 = vst [vmem:[#allocation23_spill] sm:$0xff] %v6772_v47  ;;  %v2775_v63 = vsel %vm1155_vm7, %v6644_v28, %v2762_v26 }
 0x4fc   : > { %v2679_v48 = vsel %vm1055_vm6, %v6620_v7, %v2666_v22 }
 0x4fd   : > { %4613 = vmatpush1.bf16.msra.mxu1 %v4612_v60  ;;  %v2693_v29 = vmul.f32 %v6745_v13, %v2679_v48 }
 0x4fe   : > { %v6728_v2 = vpop.permute.xlu0 %2661 }
 0x4ff   : > { %v6730_v36 = vpop.permute.xlu1 %2709 }
 0x502   : > { %v2810_v50 = vpop.permute.xlu0 %2809 }
 0x503   : > { %v6732_v46 = vpop.permute.xlu1 %2715 }
 0x504   : > { %v2726_v56 = vsel %vm1105_vm8, %v2714_v20, %v6732_v46 }
 0x506   : > { %v6734_v17 = vpop.permute.xlu0 %2757 }
 0x507   : > { %v6736_v40 = vpop.permute.xlu1 %2763 }
 0x508   : > { %v2774_v53 = vsel %vm1155_vm7, %v2762_v26, %v6736_v40  ;;  %v2742_v26 = vmul.f32 %v6225_v5, %v2726_v56 }
 0x509   : > { %v2790_v48 = vmul.f32 %v6195_v54, %v2774_v53  ;;  %v2789_v53 = vmul.f32 %v6772_v47, %v2775_v63 }
 0x50a   : > { %v6738_v0 = vpop.permute.xlu0 %2805 }
 0x50b   : > { %v6740_v42 = vpop.permute.xlu1 %2503 }
 0x50e   : > { %v6758_v11 = vpop.permute.xlu0 %2667 }
 0x50f   : > { %v2678_v60 = vsel %vm1055_vm6, %v2666_v22, %v6758_v11  ;;  %v6767_v10 = vpop.permute.xlu1 %2811  ;;  %v2645_v22 = vmul.f32 %v6756_v18, %v6446_v57  ;;  %v4618_v57 = vpack.c.bf16 %v2790_v48, %v2742_v26 }
 0x510   : > { %8119 = vst [vmem:[#allocation24_spill] sm:$0xff] %v6767_v10  ;;  %v2694_v31 = vmul.f32 %v6204_v51, %v2678_v60  ;;  %v2741_v60 = vmul.f32 %v6786_v21, %v2727_v59  ;;  %v2822_v32 = vsel %vm1205_vm9, %v2810_v50, %v6767_v10 }
 0x511   : > { %v4616_v38 = vpack.c.bf16 %v2693_v29, %v2645_v22  ;;  %v2838_v59 = vmul.f32 %v6277_v39, %v2822_v32  ;;  %v6822_v22 = vld [vmem:[%s7872_s4 + $0x10] sm:$0xff]  ;;  %v6832_v39 = vld [vmem:[%s7873_s5 + $0x88] sm:$0xff]  ;;  %v2561_v32 = vsel %vm930_vm4, %v6590_v4, %v6721_v6  ;;  %v6857_v6 = vld [vmem:[%s7873_s5] sm:$0xff] }
 0x512   : > { %v6792_v54 = vpop.permute.xlu0 %2455  ;;  %v4614_v51 = vpack.c.bf16 %v2694_v31, %v2646_v58  ;;  %v4620_v5 = vpack.c.bf16 %v2789_v53, %v2741_v60  ;;  %v6808_v58 = vld [vmem:[%s7873_s5 + $0x210] sm:$0xff]  ;;  %v2823_v31 = vsel %vm1205_vm9, %v6605_v41, %v2810_v50  ;;  %8123 = vst [vmem:[#allocation12_spill] sm:$0xff] %v6832_v39  ;;  %v6846_v53 = vld [vmem:[%s7873_s5 + $0x78] sm:$0xff]  ;;  %8126 = vst [vmem:[#allocation19_spill] sm:$0xff] %v6857_v6 }
 0x513   : > { %v6795_v55 = vpop.permute.xlu1 %2551  ;;  %8122 = vst [vmem:[#allocation9_spill] sm:$0xff] %v6808_v58  ;;  %v2837_v29 = vmul.f32 %v6808_v58, %v2823_v31  ;;  %8125 = vst [vmem:[#allocation11_spill] sm:$0xff] %v6846_v53  ;;  %v6867_v31 = vld [vmem:[%s7873_s5 + $0xc8] sm:$0xff] }
 0x514   : > { %4615 = vmatprep.subr.bf16.mxu1 %v4614_v51  ;;  %v6841_v51 = vld [vmem:[%s7873_s5 + $0x40] sm:$0xff]  ;;  %8128 = vst [vmem:[#allocation17_spill] sm:$0xff] %v6867_v31 }
 0x515   : > { %4617 = vmatpush1.bf16.msra.mxu1 %v4616_v38  ;;  %8124 = vst [vmem:[#allocation10_spill] sm:$0xff] %v6841_v51 }
 0x516   : > { %4619 = vmatprep.subr.bf16.mxu1 %v4618_v57  ;;  %v6801_v20 = vpop.permute.xlu0 %2599 }
 0x517   : > { %v6803_v56 = vpop.permute.xlu1 %2451 }
 0x519   : > { %4621 = vmatpush1.bf16.msra.mxu1 %v4620_v5  ;;  %v6862_v5 = vld [vmem:[%s7873_s5 + $0x38] sm:$0xff] }
 0x51a   : > { %3015 = vmatprep.subr.mxu1 %v2838_v59  ;;  %v6814_v63 = vpop.permute.xlu0 %2499  ;;  %8127 = vst [vmem:[#allocation13_spill] sm:$0xff] %v6862_v5 }
 0x51b   : > { %v6817_v48 = vpop.permute.xlu1 %2671 }
 0x51d   : > { %3016 = vmatpush1.msra.mxu1 %v2837_v29  ;;  %v2572_v29 = vmul.f32 %v6832_v39, %v2561_v32 }
 0x51e   : > { %4382 = vmatmul.mubr.msk.f32.vlgmr.msra.gmra.mrb[24].mxu1 %vm1312_vm10, %v6822_v22  ;;  %v2506_v50 = vpop.permute.xlu0 %2505 }
 0x51f   : > { %v6826_v26 = vpop.permute.xlu1 %2547  ;;  %3205 = vmatprep.mubr.f32.mxu1 %v8009_v3  ;;  %v2507_v38 = vsel %vm880_vm2, %v6740_v42, %v2506_v50  ;;  %v2514_v57 = vsel %vm880_vm2, %v2506_v50, %v6584_v61  ;;  %v2609_v61 = vsel %vm980_vm5, %v6640_v52, %v6677_v25 }
 0x520   : > { %v2523_v13 = vmul.f32 %v6841_v51, %v2514_v57  ;;  %v2530_v18 = vmul.f32 %v6846_v53, %v2507_v38  ;;  %v2620_v25 = vmul.f32 %v6867_v31, %v2609_v61  ;;  %v6934_v61 = vld [vmem:[%s7873_s5 + $0x1c8] sm:$0xff]  ;;  %v6999_v53 = vld [vmem:[%s7873_s5 + $0xb8] sm:$0xff] }
 0x522   : > { %v2554_v60 = vpop.permute.xlu0 %2553  ;;  %v4594_v10 = vpack.c.bf16 %v2620_v25, %v2572_v29  ;;  %v6944_v29 = vld [vmem:[%s7873_s5 + $0xf8] sm:$0xff]  ;;  %v6953_v25 = vld [vmem:[%s7873_s5 + $0x100] sm:$0xff] }
 0x523   : > { %v2458_v59 = vpop.permute.xlu1 %2457 }
 0x524   : > { %v2459_v50 = vsel %vm831_vm3, %v6792_v54, %v2458_v59  ;;  %v2466_v58 = vsel %vm831_vm3, %v2458_v59, %v6616_v27  ;;  %v6892_v27 = vld [vmem:[%s7873_s5 + $0x148] sm:$0xff] }
 0x525   : > { %v2475_v47 = vmul.f32 %v6857_v6, %v2466_v58  ;;  %v2482_v21 = vmul.f32 %v6862_v5, %v2459_v50  ;;  %8129 = vst [vmem:[#allocation26_spill] sm:$0xff] %v6892_v27  ;;  %v2680_v58 = vsel %vm1055_vm6, %v6728_v2, %v6620_v7  ;;  %v6916_v7 = vld [vmem:[%s7873_s5 + $0x140] sm:$0xff] }
 0x526   : > { %v6885_v44 = vpop.permute.xlu0 %2595  ;;  %8132 = vst [vmem:[#allocation28_spill] sm:$0xff] %v6916_v7  ;;  %v6990_v5 = vld [vmem:[%s7873_s5 + $0x1c0] sm:$0xff] }
 0x527   : > { %v4592_v32 = vpack.c.bf16 %v2523_v13, %v2475_v47  ;;  %v6887_v39 = vpop.permute.xlu1 %2719  ;;  %v4638_v16 = vpack.c.bf16 %v2530_v18, %v2482_v21  ;;  %v6901_v47 = vld [vmem:[%s7873_s5 + $0x80] sm:$0xff]  ;;  %v2562_v21 = vsel %vm930_vm4, %v2554_v60, %v6590_v4  ;;  %v6925_v4 = vld [vmem:[%s7873_s5 + $0x108] sm:$0xff] }
 0x528   : > { %8130 = vst [vmem:[#allocation27_spill] sm:$0xff] %v6901_v47  ;;  %v6911_v18 = vld [vmem:[%s7873_s5 + $0xc0] sm:$0xff]  ;;  %8133 = vst [vmem:[#allocation38_spill] sm:$0xff] %v6925_v4  ;;  %v2571_v59 = vmul.f32 %v6901_v47, %v2562_v21 }
 0x529   : > { %4593 = vmatpush1.bf16.msra.mxu0 %v4592_v32  ;;  %4639 = vmatprep.subr.bf16.mxu1 %v4638_v16  ;;  %8131 = vst [vmem:[#allocation31_spill] sm:$0xff] %v6911_v18  ;;  %v2681_v16 = vsel %vm1055_vm6, %v6648_v1, %v6728_v2  ;;  %v2776_v2 = vsel %vm1155_vm7, %v6734_v17, %v6644_v28  ;;  %v7007_v47 = vld [vmem:[%s7873_s5 + $0x180] sm:$0xff] }
 0x52a   : > { %4595 = vmatprep.subr.bf16.mxu0 %v4594_v10  ;;  %v6906_v13 = vpop.permute.xlu0 %2453  ;;  %v2692_v10 = vmul.f32 %v6892_v27, %v2680_v58  ;;  %v2691_v28 = vmul.f32 %v6916_v7, %v2681_v16  ;;  %v2728_v32 = vsel %vm1105_vm8, %v6730_v36, %v6596_v35  ;;  %v6963_v58 = vld [vmem:[%s7873_s5 + $0x30] sm:$0xff]  ;;  %v2644_v35 = vmul.f32 %v6925_v4, %v6482_v43 }
 0x52b   : > { %v2602_v38 = vpop.permute.xlu1 %2601  ;;  %8134 = vst [vmem:[#allocation36_spill] sm:$0xff] %v6963_v58  ;;  %v2460_v21 = vsel %vm831_vm3, %v6906_v13, %v6792_v54  ;;  %v6974_v16 = vld [vmem:[%s7873_s5 + $0x70] sm:$0xff]  ;;  %v2729_v54 = vsel %vm1105_vm8, %v6652_v9, %v6730_v36  ;;  %v2777_v43 = vsel %vm1155_vm7, %v6609_v24, %v6734_v17  ;;  %v2555_v7 = vsel %vm930_vm4, %v6795_v55, %v2554_v60 }
 0x52c   : > { %v2610_v57 = vsel %vm980_vm5, %v2602_v38, %v6640_v52  ;;  %v2603_v52 = vsel %vm980_vm5, %v6801_v20, %v2602_v38  ;;  %8135 = vst [vmem:[#allocation32_spill] sm:$0xff] %v6974_v16  ;;  %v2788_v51 = vmul.f32 %v6934_v61, %v2776_v2  ;;  %v4598_v31 = vpack.c.bf16 %v2692_v10, %v2644_v35 }
 0x52d   : > { %v2619_v50 = vmul.f32 %v6911_v18, %v2610_v57  ;;  %v6981_v57 = vld [vmem:[%s7873_s5 + $0x188] sm:$0xff]  ;;  %v2626_v17 = vmul.f32 %v6944_v29, %v2603_v52  ;;  %v2643_v4 = vmul.f32 %v6953_v25, %v6440_v45  ;;  %v2481_v60 = vmul.f32 %v6963_v58, %v2460_v21  ;;  %v7024_v52 = vld [vmem:[%s7873_s5 + $0xf0] sm:$0xff] }
 0x52e   : > { %v6969_v38 = vpop.permute.xlu0 %2597  ;;  %v2787_v27 = vmul.f32 %v6990_v5, %v2777_v43  ;;  %v2578_v2 = vmul.f32 %v6999_v53, %v2555_v7  ;;  %8136 = vst [vmem:[#allocation29_spill] sm:$0xff] %v7024_v52  ;;  %v2739_v7 = vmul.f32 %v7007_v47, %v2729_v54  ;;  %v2824_v35 = vsel %vm1205_vm9, %v6738_v0, %v6605_v41  ;;  %v7063_v54 = vld [vmem:[%s7873_s5 + $0x60] sm:$0xff] }
 0x52f   : > { %v4596_v36 = vpack.c.bf16 %v2619_v50, %v2571_v59  ;;  %v2502_v18 = vpop.permute.xlu1 %2501  ;;  %v2740_v50 = vmul.f32 %v6981_v57, %v2728_v32  ;;  %v2604_v45 = vsel %vm980_vm5, %v6969_v38, %v6801_v20  ;;  %v4600_v10 = vpack.c.bf16 %v2691_v28, %v2643_v4  ;;  %v7054_v28 = vld [vmem:[%s7873_s5 + $0x68] sm:$0xff] }
 0x530   : > { %v2508_v6 = vsel %vm880_vm2, %v2502_v18, %v6740_v42  ;;  %v4642_v43 = vpack.c.bf16 %v2626_v17, %v2578_v2  ;;  %v2625_v4 = vmul.f32 %v7024_v52, %v2604_v45  ;;  %v2509_v41 = vsel %vm880_vm2, %v6814_v63, %v2502_v18  ;;  %v7072_v18 = vld [vmem:[%s7873_s5 + $0x130] sm:$0xff]  ;;  %v7100_v45 = vld [vmem:[%s7873_s5 + $0x138] sm:$0xff] }
 0x531   : > { %v2529_v59 = vmul.f32 %v6974_v16, %v2508_v6  ;;  %4597 = vmatpush1.bf16.msra.mxu0 %v4596_v36  ;;  %v7035_v6 = vld [vmem:[%s7873_s5 + $0xb0] sm:$0xff]  ;;  %v7048_v36 = vld [vmem:[%s7873_s5 + $0x208] sm:$0xff]  ;;  %v2510_v17 = vsel %vm880_vm2, %v6635_v19, %v6814_v63  ;;  %8138 = vst [vmem:[#allocation30_spill] sm:$0xff] %v7072_v18  ;;  %v2461_v19 = vsel %vm831_vm3, %v6803_v56, %v6906_v13  ;;  %8141 = vst [vmem:[#allocation37_spill] sm:$0xff] %v7100_v45 }
 0x532   : > { %4599 = vmatprep.subr.bf16.mxu0 %v4598_v31  ;;  %v7030_v42 = vpop.permute.xlu0 %2767  ;;  %8137 = vst [vmem:[#allocation33_spill] sm:$0xff] %v7035_v6  ;;  %v4602_v31 = vpack.c.bf16 %v2788_v51, %v2740_v50  ;;  %v4604_v51 = vpack.c.bf16 %v2787_v27, %v2739_v7  ;;  %v2825_v27 = vsel %vm1205_vm9, %v6614_v12, %v6738_v0  ;;  %v7090_v63 = vld [vmem:[%s7873_s5 + $0xa8] sm:$0xff]  ;;  %v7105_v13 = vld [vmem:[%s7873_s5 + $0x200] sm:$0xff]  ;;  %v8172_v52 = vld [vmem:[#allocation5_spill] sm:$0xff] }
 0x533   : > { %v4640_v32 = vpack.c.bf16 %v2529_v59, %v2481_v60  ;;  %v2550_v21 = vpop.permute.xlu1 %2549  ;;  %v7081_v59 = vld [vmem:[%s7873_s5 + $0x28] sm:$0xff]  ;;  %8140 = vst [vmem:[#allocation34_spill] sm:$0xff] %v7090_v63  ;;  %v2462_v7 = vsel %vm831_vm3, %v6618_v33, %v6803_v56  ;;  %v2605_v33 = vsel %vm980_vm5, %v6885_v44, %v6969_v38  ;;  %v2835_v38 = vmul.f32 %v7105_v13, %v2825_v27 }
 0x534   : > { %v2556_v20 = vsel %vm930_vm4, %v2550_v21, %v6795_v55  ;;  %8139 = vst [vmem:[#allocation55_spill] sm:$0xff] %v7081_v59  ;;  %v2557_v50 = vsel %vm930_vm4, %v6826_v26, %v2550_v21  ;;  %v2606_v21 = vsel %vm980_vm5, %v6650_v14, %v6885_v44  ;;  %v2480_v56 = vmul.f32 %v7081_v59, %v2461_v19 }
 0x535   : > { %v2577_v55 = vmul.f32 %v7035_v6, %v2556_v20  ;;  %4601 = vmatpush1.bf16.msra.mxu0 %v4600_v10  ;;  %4641 = vmatpush1.bf16.msra.mxu1 %v4640_v32  ;;  %v2836_v10 = vmul.f32 %v7048_v36, %v2824_v35  ;;  %v7115_v32 = vld [vmem:[%s7873_s5 + $0xe0] sm:$0xff]  ;;  %v2528_v20 = vmul.f32 %v7054_v28, %v2509_v41  ;;  %v7126_v35 = vld [vmem:[%s7873_s5 + $0xe8] sm:$0xff]  ;;  %v7144_v41 = vld [vmem:[%s7873_s5 + $0x178] sm:$0xff] }
 0x536   : > { %4603 = vmatprep.subr.bf16.mxu0 %v4602_v31  ;;  %4643 = vmatprep.subr.bf16.mxu1 %v4642_v43  ;;  %v2770_v60 = vpop.permute.xlu0 %2769  ;;  %8142 = vst [vmem:[#allocation56_spill] sm:$0xff] %v7115_v32  ;;  %v2527_v31 = vmul.f32 %v7063_v54, %v2510_v17  ;;  %8143 = vst [vmem:[#allocation35_spill] sm:$0xff] %v7126_v35  ;;  %v2576_v14 = vmul.f32 %v7090_v63, %v2557_v50  ;;  %v8174_v63 = vld [vmem:[#allocation18_spill] sm:$0xff] }
 0x537   : > { %v4644_v0 = vpack.c.bf16 %v2625_v4, %v2577_v55  ;;  %v7095_v2 = vpop.permute.xlu1 %2815  ;;  %v2649_v43 = vmul.f32 %v7072_v18, %v6526_v34  ;;  %v7139_v4 = vld [vmem:[%s7873_s5 + $0x170] sm:$0xff]  ;;  %8145 = vst [vmem:[#allocation43_spill] sm:$0xff] %v7144_v41  ;;  %v2650_v44 = vmul.f32 %v7100_v45, %v6550_v30  ;;  %v2479_v55 = vmul.f32 %v2462_v7, %v6287_v15 }
 0x538   : > { %8144 = vst [vmem:[#allocation57_spill] sm:$0xff] %v7139_v4  ;;  %v2558_v34 = vsel %vm930_vm4, %v6646_v8, %v6826_v26  ;;  %v2624_v50 = vmul.f32 %v7126_v35, %v2605_v33  ;;  %v4622_v15 = vpack.c.bf16 %v2528_v20, %v2480_v56  ;;  %v4370_v8 = vld [vmem:[%s7873_s5 + $0x1f0] sm:$0xff]  ;;  %v2771_v26 = vsel %vm1155_vm7, %v7030_v42, %v2770_v60  ;;  %v8173_v35 = vld [vmem:[#allocation7_spill] sm:$0xff] }
 0x539   : > { %4605 = vmatpush1.bf16.msra.mxu0 %v4604_v51  ;;  %4645 = vmatpush1.bf16.msra.mxu1 %v4644_v0  ;;  %v2623_v51 = vmul.f32 %v7115_v32, %v2606_v21  ;;  %v4624_v27 = vpack.c.bf16 %v2527_v31, %v2479_v55  ;;  %v2575_v21 = vmul.f32 %v6321_v49, %v2558_v34  ;;  %v7182_v31 = vld [vmem:[%s7873_s5 + $0x1b0] sm:$0xff]  ;;  %v7187_v49 = vld [vmem:[%s7873_s5 + $0x1b8] sm:$0xff] }
 0x53a   : > { %2944 = vmatprep.subr.mxu0 %v2836_v10  ;;  %v2818_v17 = vpop.permute.xlu0 %2817  ;;  %v2778_v20 = vsel %vm1155_vm7, %v2770_v60, %v6609_v24  ;;  %8146 = vst [vmem:[#allocation45_spill] sm:$0xff] %v7182_v31  ;;  %8147 = vst [vmem:[#allocation46_spill] sm:$0xff] %v7187_v49  ;;  %v4626_v33 = vpack.c.bf16 %v2624_v50, %v2576_v14  ;;  %v2793_v60 = vmul.f32 %v4370_v8, %v2771_v26  ;;  %v7217_v50 = vld [vmem:[%s7873_s5 + $0x160] sm:$0xff] }
 0x53b   : > { %v2674_v19 = vpop.permute.xlu1 %2673  ;;  %v4628_v24 = vpack.c.bf16 %v2623_v51, %v2575_v21  ;;  %v2826_v51 = vsel %vm1205_vm9, %v2818_v17, %v6614_v12  ;;  %8150 = vst [vmem:[#allocation6_spill] sm:$0xff] %v7217_v50 }
 0x53c   : > { %v2675_v0 = vsel %vm1055_vm6, %v6817_v48, %v2674_v19  ;;  %v2682_v30 = vsel %vm1055_vm6, %v2674_v19, %v6648_v1  ;;  %v4371_v1 = vld [vmem:[%s7873_s5 + $0x1f8] sm:$0xff] }
 0x53d   : > { %v2697_v10 = vmul.f32 %v7139_v4, %v2675_v0  ;;  %v2698_v7 = vmul.f32 %v7144_v41, %v2682_v30  ;;  %2945 = vmatpush1.msra.mxu0 %v2835_v38  ;;  %v2794_v0 = vmul.f32 %v4371_v1, %v2778_v20  ;;  %v4378_v20 = vld [vmem:[%s7873_s5 + $0x230] sm:$0xff]  ;;  %v8170_v4 = vld [vmem:[#allocation14_spill] sm:$0xff] }
 0x53e   : > { %4381 = vmatmul.mubr.msk.f32.vlgmr.msra.gmra.mrb[24].mxu0 %vm1312_vm10, %v6822_v22  ;;  %4623 = vmatprep.subr.bf16.mxu0 %v4622_v15  ;;  %v2718_v30 = vpop.permute.xlu0 %2717 }
 0x53f   : > { %v4648_v56 = vpack.c.bf16 %v2697_v10, %v2649_v43  ;;  %v2722_v38 = vpop.permute.xlu1 %2721  ;;  %4625 = vmatpush1.bf16.msra.mxu0 %v4624_v27  ;;  %v4646_v55 = vpack.c.bf16 %v2698_v7, %v2650_v44  ;;  %v7200_v43 = vld [vmem:[%s7873_s5 + $0x120] sm:$0xff]  ;;  %v7205_v44 = vld [vmem:[%s7873_s5 + $0x128] sm:$0xff]  ;;  %3134 = vmatprep.mubr.f32.mxu0 %v8009_v3 }
 0x540   : > { %v2723_v34 = vsel %vm1105_vm8, %v6887_v39, %v2722_v38  ;;  %v2730_v19 = vsel %vm1105_vm8, %v2722_v38, %v6652_v9  ;;  %4627 = vmatprep.subr.bf16.mxu0 %v4626_v33  ;;  %8148 = vst [vmem:[#allocation58_spill] sm:$0xff] %v7200_v43  ;;  %8149 = vst [vmem:[#allocation44_spill] sm:$0xff] %v7205_v44  ;;  %v4379_v9 = vld [vmem:[%s7873_s5 + $0x238] sm:$0xff]  ;;  %v7222_v27 = vld [vmem:[%s7873_s5 + $0x168] sm:$0xff]  ;;  %v2647_v7 = vmul.f32 %v7200_v43, %v6514_v23 }
 0x541   : > { %v2745_v15 = vmul.f32 %v7182_v31, %v2723_v34  ;;  %v2746_v14 = vmul.f32 %v7187_v49, %v2730_v19  ;;  %4647 = vmatprep.subr.bf16.mxu1 %v4646_v55  ;;  %8151 = vst [vmem:[#allocation49_spill] sm:$0xff] %v7222_v27  ;;  %v2648_v1 = vmul.f32 %v7205_v44, %v6566_v62  ;;  %v7250_v62 = vld [vmem:[%s7873_s5 + $0x1a8] sm:$0xff]  ;;  %v7261_v55 = vld [vmem:[%s7873_s5 + $0x1e0] sm:$0xff] }
 0x542   : > { %4649 = vmatpush1.bf16.msra.mxu1 %v4648_v56  ;;  %v2819_v33 = vsel %vm1205_vm9, %v7095_v2, %v2818_v17  ;;  %v2842_v23 = vmul.f32 %v4379_v9, %v2826_v51  ;;  %8153 = vst [vmem:[#allocation51_spill] sm:$0xff] %v7250_v62  ;;  %v2724_v17 = vsel %vm1105_vm8, %v2718_v30, %v6887_v39  ;;  %8154 = vst [vmem:[#allocation52_spill] sm:$0xff] %v7261_v55  ;;  %v8169_v43 = vld [vmem:[#allocation8_spill] sm:$0xff] }
 0x543   : > { %v4652_v8 = vpack.c.bf16 %v2793_v60, %v2745_v15  ;;  %v2670_v26 = vpop.permute.xlu1 %2669  ;;  %4629 = vmatpush1.bf16.msra.mxu0 %v4628_v24  ;;  %v4650_v10 = vpack.c.bf16 %v2794_v0, %v2746_v14  ;;  %v2725_v38 = vsel %vm1105_vm8, %v6732_v46, %v2718_v30  ;;  %v7266_v24 = vld [vmem:[%s7873_s5 + $0x1e8] sm:$0xff]  ;;  %v2814_v60 = vpop.permute.xlu0 %2813  ;;  %v2841_v0 = vmul.f32 %v4378_v20, %v2819_v33 }
 0x544   : > { %v2676_v12 = vsel %vm1055_vm6, %v2670_v26, %v6817_v48  ;;  %v2677_v21 = vsel %vm1055_vm6, %v6758_v11, %v2670_v26  ;;  %v7243_v48 = vld [vmem:[%s7873_s5 + $0x1a0] sm:$0xff]  ;;  %8155 = vst [vmem:[#allocation41_spill] sm:$0xff] %v7266_v24  ;;  %v2744_v14 = vmul.f32 %v7250_v62, %v2724_v17 }
 0x545   : > { %8152 = vst [vmem:[#allocation50_spill] sm:$0xff] %v7243_v48  ;;  %v2695_v56 = vmul.f32 %v7217_v50, %v2677_v21  ;;  %v2696_v11 = vmul.f32 %v7222_v27, %v2676_v12  ;;  %4651 = vmatprep.subr.bf16.mxu1 %v4650_v10  ;;  %v2743_v15 = vmul.f32 %v7243_v48, %v2725_v38  ;;  %v7292_v10 = vld [vmem:[%s7873_s5 + $0x220] sm:$0xff] }
 0x546   : > { %4653 = vmatpush1.bf16.msra.mxu1 %v4652_v8  ;;  %v7281_v8 = vld [vmem:[%s7873_s5 + $0x228] sm:$0xff]  ;;  %8157 = vst [vmem:[#allocation39_spill] sm:$0xff] %v7292_v10 }
 0x547   : > { %v4632_v34 = vpack.c.bf16 %v2695_v56, %v2647_v7  ;;  %v2766_v19 = vpop.permute.xlu1 %2765  ;;  %3157 = vmatprep.subr.mxu1 %v2842_v23  ;;  %v4630_v39 = vpack.c.bf16 %v2696_v11, %v2648_v1  ;;  %8156 = vst [vmem:[#allocation42_spill] sm:$0xff] %v7281_v8  ;;  %v8158_v7 = vld [vmem:[#allocation24_spill] sm:$0xff] }
 0x548   : > { %v2772_v46 = vsel %vm1155_vm7, %v2766_v19, %v7030_v42  ;;  %v2773_v30 = vsel %vm1155_vm7, %v6736_v40, %v2766_v19  ;;  %v2820_v42 = vsel %vm1205_vm9, %v2814_v60, %v7095_v2  ;;  %v2821_v12 = vsel %vm1205_vm9, %v8158_v7, %v2814_v60 }
 0x549   : > { %v2791_v9 = vmul.f32 %v7261_v55, %v2773_v30  ;;  %v2792_v51 = vmul.f32 %v7266_v24, %v2772_v46  ;;  %4631 = vmatprep.subr.bf16.mxu0 %v4630_v39  ;;  %v2840_v2 = vmul.f32 %v7281_v8, %v2820_v42  ;;  %v2839_v21 = vmul.f32 %v7292_v10, %v2821_v12  ;;  %v8167_v55 = vld [vmem:[#allocation22_spill] sm:$0xff] }
 0x54a   : > { %4633 = vmatpush1.bf16.msra.mxu0 %v4632_v34  ;;  %3158 = vmatpush1.msra.mxu1 %v2841_v0 }
 0x54b   : > { %v4636_v40 = vpack.c.bf16 %v2791_v9, %v2743_v15  ;;  %4384 = vmatmul.mubr.msk.f32.vlgmr.msra.gmra.mrb[26].mxu1 %vm1312_vm10, %v6822_v22  ;;  %v4634_v26 = vpack.c.bf16 %v2792_v51, %v2744_v14 }
 0x54c   : > { %3870 = vmatprep.mubr.f32.mxu1 %v8009_v3 }
 0x54d   : > { %4635 = vmatprep.subr.bf16.mxu0 %v4634_v26 }
 0x54e   : > { %4637 = vmatpush1.bf16.msra.mxu0 %v4636_v40 }
 0x54f   : > { %3086 = vmatprep.subr.mxu0 %v2840_v2 }
 0x552   : > { %3087 = vmatpush1.msra.mxu0 %v2839_v21 }
 0x553   : > { %4383 = vmatmul.mubr.msk.f32.vlgmr.msra.gmra.mrb[26].mxu0 %vm1312_vm10, %v6822_v22  ;;  %v7305_v56 = vpop.permute.xlu0 %3231 }
 0x554   : > { %3799 = vmatprep.mubr.f32.mxu0 %v8009_v3 }
 0x558   : > { %v7302_v1 = vpop.permute.xlu1 %3216 }
 0x5f1   : > { %v3065_v20 = vpop.f32.mrb[24].mxu1 }
 0x5f2   : > { %v3221_v33 = vmul.f32 %v7302_v1, %v3065_v20  ;;  %v3067_v23 = vpop.f32.mrb[25].mxu1 }
 0x5f3   : > { %v3222_v11 = vmul.f32 %v7302_v1, %v3067_v23 }
 0x5f4   : > { %v3236_v17 = vadd.f32 %v7305_v56, %v3221_v33 }
 0x5f5   : > { %v3237_v60 = vadd.f32 %v7305_v56, %v3222_v11 }
 0x5f6   : > { %v7309_v38 = vmax.f32 %v3236_v17, 0.0 }
 0x5f7   : > { %v7316_v22 = vmax.f32 %v3237_v60, 0.0 }
 0x5f8   : > { %3470 = vrot.lane.b32.xlu0 %v7309_v38, %s4758_s13  ;;  %3254 = vrot.lane.b32.xlu1 %v7309_v38, %s4753_s26  ;;  %v7520_v62 = vmul.f32 %v8167_v55, %v7309_v38 }
 0x5fc   : > { %3256 = vrot.lane.b32.xlu0 %v7316_v22, %s4753_s26  ;;  %3302 = vrot.lane.b32.xlu1 %v7309_v38, %s4752_s25 }
 0x600   : > { %3304 = vrot.lane.b32.xlu0 %v7316_v22, %s4752_s25  ;;  %3350 = vrot.lane.b32.xlu1 %v7309_v38, %s4754_s15 }
 0x604   : > { %3352 = vrot.lane.b32.xlu0 %v7316_v22, %s4754_s15  ;;  %3398 = vrot.lane.b32.xlu1 %v7309_v38, %s4755_s24 }
 0x608   : > { %3400 = vrot.lane.b32.xlu0 %v7316_v22, %s4755_s24  ;;  %3518 = vrot.lane.b32.xlu1 %v7309_v38, %s4756_s11 }
 0x60c   : > { %3520 = vrot.lane.b32.xlu0 %v7316_v22, %s4756_s11  ;;  %3566 = vrot.lane.b32.xlu1 %v7309_v38, %s4759_s14 }
 0x610   : > { %3568 = vrot.lane.b32.xlu0 %v7316_v22, %s4759_s14  ;;  %3614 = vrot.lane.b32.xlu1 %v7309_v38, %s4757_s12 }
 0x611   : > { %v2994_v34 = vpop.f32.mrb[24].mxu0 }
 0x612   : > { %v3219_v19 = vmul.f32 %v7302_v1, %v2994_v34  ;;  %v2996_v39 = vpop.f32.mrb[25].mxu0 }
 0x613   : > { %v3220_v30 = vmul.f32 %v7302_v1, %v2996_v39 }
 0x614   : > { %v3234_v0 = vadd.f32 %v7305_v56, %v3219_v19  ;;  %3616 = vrot.lane.b32.xlu0 %v7316_v22, %s4757_s12  ;;  %3472 = vrot.lane.b32.xlu1 %v7316_v22, %s4758_s13 }
 0x615   : > { %v3235_v15 = vadd.f32 %v7305_v56, %v3220_v30 }
 0x616   : > { %v7348_v46 = vmax.f32 %v3234_v0, 0.0 }
 0x617   : > { %v7360_v14 = vmax.f32 %v3235_v15, 0.0 }
 0x618   : > { %3514 = vrot.lane.b32.xlu0 %v7348_v46, %s4756_s11  ;;  %3250 = vrot.lane.b32.xlu1 %v7348_v46, %s4753_s26 }
 0x61c   : > { %3610 = vrot.lane.b32.xlu0 %v7348_v46, %s4757_s12  ;;  %3298 = vrot.lane.b32.xlu1 %v7348_v46, %s4752_s25 }
 0x61e   : > { %v3207_v9 = vpop.f32.mrb[26].mxu1 }
 0x61f   : > { %v3209_v51 = vpop.f32.mrb[27].mxu1  ;;  %v3225_v26 = vmul.f32 %v7302_v1, %v3207_v9 }
 0x620   : > { %3252 = vrot.lane.b32.xlu0 %v7360_v14, %s4753_s26  ;;  %3346 = vrot.lane.b32.xlu1 %v7348_v46, %s4754_s15  ;;  %v3226_v2 = vmul.f32 %v7302_v1, %v3209_v51  ;;  %v8163_v51 = vld [vmem:[#allocation3_spill] sm:$0xff] }
 0x621   : > { %v3240_v7 = vadd.f32 %v7305_v56, %v3225_v26 }
 0x622   : > { %v3241_v21 = vadd.f32 %v7305_v56, %v3226_v2 }
 0x623   : > { %v7384_v12 = vmax.f32 %v3240_v7, 0.0  ;;  %v4457_v7 = vld [vmem:[%s7875_s7 + $0x18] sm:$0xff] }
 0x624   : > { %3300 = vrot.lane.b32.xlu0 %v7360_v14, %s4752_s25  ;;  %3394 = vrot.lane.b32.xlu1 %v7348_v46, %s4755_s24  ;;  %v7400_v20 = vmax.f32 %v3241_v21, 0.0 }
 0x625   : > { %8159 = vst [vmem:[#allocation40_spill] sm:$0xff] %v7384_v12 }
 0x626   : > { %v3136_v42 = vpop.f32.mrb[26].mxu0  ;;  %8160 = vst [vmem:[#allocation53_spill] sm:$0xff] %v7400_v20 }
 0x627   : > { %v3138_v40 = vpop.f32.mrb[27].mxu0  ;;  %v3223_v33 = vmul.f32 %v7302_v1, %v3136_v42 }
 0x628   : > { %3348 = vrot.lane.b32.xlu0 %v7360_v14, %s4754_s15  ;;  %3466 = vrot.lane.b32.xlu1 %v7348_v46, %s4758_s13  ;;  %v3224_v17 = vmul.f32 %v7302_v1, %v3138_v40  ;;  %v8164_v40 = vld [vmem:[#allocation4_spill] sm:$0xff] }
 0x629   : > { %v3238_v23 = vadd.f32 %v7305_v56, %v3223_v33 }
 0x62a   : > { %v3239_v60 = vadd.f32 %v7305_v56, %v3224_v17 }
 0x62b   : > { %v7416_v11 = vmax.f32 %v3238_v23, 0.0  ;;  %v4456_v23 = vld [vmem:[%s7874_s6 + $0x18] sm:$0xff] }
 0x62c   : > { %3396 = vrot.lane.b32.xlu0 %v7360_v14, %s4755_s24  ;;  %3562 = vrot.lane.b32.xlu1 %v7348_v46, %s4759_s14  ;;  %v7440_v34 = vmax.f32 %v3239_v60, 0.0 }
 0x62d   : > { %8161 = vst [vmem:[#allocation47_spill] sm:$0xff] %v7416_v11 }
 0x62e   : > { %8162 = vst [vmem:[#allocation54_spill] sm:$0xff] %v7440_v34 }
 0x630   : > { %3516 = vrot.lane.b32.xlu0 %v7360_v14, %s4756_s11  ;;  %3468 = vrot.lane.b32.xlu1 %v7360_v14, %s4758_s13 }
 0x634   : > { %3564 = vrot.lane.b32.xlu0 %v7360_v14, %s4759_s14  ;;  %3310 = vrot.lane.b32.xlu1 %v7384_v12, %s4752_s25 }
 0x638   : > { %3612 = vrot.lane.b32.xlu0 %v7360_v14, %s4757_s12  ;;  %3358 = vrot.lane.b32.xlu1 %v7384_v12, %s4754_s15 }
 0x63c   : > { %3262 = vrot.lane.b32.xlu0 %v7384_v12, %s4753_s26  ;;  %3526 = vrot.lane.b32.xlu1 %v7384_v12, %s4756_s11 }
 0x640   : > { %3406 = vrot.lane.b32.xlu0 %v7384_v12, %s4755_s24  ;;  %3264 = vrot.lane.b32.xlu1 %v7400_v20, %s4753_s26 }
 0x644   : > { %3478 = vrot.lane.b32.xlu0 %v7384_v12, %s4758_s13  ;;  %3360 = vrot.lane.b32.xlu1 %v7400_v20, %s4754_s15 }
 0x648   : > { %3312 = vrot.lane.b32.xlu0 %v7400_v20, %s4752_s25  ;;  %3480 = vrot.lane.b32.xlu1 %v7400_v20, %s4758_s13 }
 0x64c   : > { %3408 = vrot.lane.b32.xlu0 %v7400_v20, %s4755_s24  ;;  %3522 = vrot.lane.b32.xlu1 %v7416_v11, %s4756_s11 }
 0x650   : > { %3528 = vrot.lane.b32.xlu0 %v7400_v20, %s4756_s11  ;;  %3570 = vrot.lane.b32.xlu1 %v7416_v11, %s4759_s14 }
 0x654   : > { %3306 = vrot.lane.b32.xlu1 %v7416_v11, %s4752_s25  ;;  %3474 = vrot.lane.b32.xlu0 %v7416_v11, %s4758_s13 }
 0x658   : > { %3618 = vrot.lane.b32.xlu1 %v7416_v11, %s4757_s12  ;;  %3258 = vrot.lane.b32.xlu0 %v7416_v11, %s4753_s26 }
 0x65c   : > { %3354 = vrot.lane.b32.xlu1 %v7416_v11, %s4754_s15  ;;  %3402 = vrot.lane.b32.xlu0 %v7416_v11, %s4755_s24 }
 0x660   : > { %3308 = vrot.lane.b32.xlu0 %v7440_v34, %s4752_s25  ;;  %3260 = vrot.lane.b32.xlu1 %v7440_v34, %s4753_s26 }
 0x664   : > { %3356 = vrot.lane.b32.xlu0 %v7440_v34, %s4754_s15  ;;  %3404 = vrot.lane.b32.xlu1 %v7440_v34, %s4755_s24 }
 0x668   : > { %3574 = vrot.lane.b32.xlu0 %v7384_v12, %s4759_s14  ;;  %3476 = vrot.lane.b32.xlu1 %v7440_v34, %s4758_s13 }
 0x66a   : > { %v7454_v1 = vpop.permute.xlu0 %3470  ;;  %v3255_v56 = vpop.permute.xlu1 %3254 }
 0x66c   : > { %3524 = vrot.lane.b32.xlu0 %v7440_v34, %s4756_s11  ;;  %3572 = vrot.lane.b32.xlu1 %v7440_v34, %s4759_s14 }
 0x66e   : > { %v7460_v19 = vpop.permute.xlu0 %3256  ;;  %v3303_v39 = vpop.permute.xlu1 %3302 }
 0x66f   : > { %v3270_v0 = vsel %vm831_vm3, %v3255_v56, %v7460_v19 }
 0x670   : > { %3620 = vrot.lane.b32.xlu0 %v7440_v34, %s4757_s12  ;;  %3576 = vrot.lane.b32.xlu1 %v7400_v20, %s4759_s14  ;;  %v3285_v42 = vmul.f32 %v3270_v0, %v8163_v51 }
 0x672   : > { %v7469_v30 = vpop.permute.xlu0 %3304  ;;  %v3351_v15 = vpop.permute.xlu1 %3350 }
 0x673   : > { %v3318_v9 = vsel %vm880_vm2, %v3303_v39, %v7469_v30 }
 0x674   : > { %v3333_v26 = vmul.f32 %v8164_v40, %v3318_v9  ;;  %3624 = vrot.lane.b32.xlu0 %v7400_v20, %s4757_s12  ;;  %3622 = vrot.lane.b32.xlu1 %v7384_v12, %s4757_s12 }
 0x676   : > { %v7483_v2 = vpop.permute.xlu0 %3352  ;;  %v3399_v21 = vpop.permute.xlu1 %3398  ;;  %v4670_v33 = vpack.c.bf16 %v3333_v26, %v3285_v42 }
 0x678   : > { %4671 = vmatprep.subr.bf16.mxu1 %v4670_v33  ;;  %4038 = vperm.xlu0 %4736, %v4457_v7   ;;  %v8165_v7 = vld [vmem:[#allocation25_spill] sm:$0xff] }
 0x679   : > { %4023 = vperm.xlu1 %4737, %v4456_v23   ;;  %v8166_v23 = vld [vmem:[#allocation23_spill] sm:$0xff] }
 0x67a   : > { %v7488_v17 = vpop.permute.xlu0 %3400  ;;  %v3519_v60 = vpop.permute.xlu1 %3518 }
 0x67b   : > { %v3414_v55 = vsel %vm980_vm5, %v3399_v21, %v7488_v17 }
 0x67c   : > { %v3429_v11 = vmul.f32 %v8169_v43, %v3414_v55 }
 0x67e   : > { %v7490_v0 = vpop.permute.xlu0 %3520  ;;  %v3567_v9 = vpop.permute.xlu1 %3566 }
 0x67f   : > { %v3534_v51 = vsel %vm1105_vm8, %v3519_v60, %v7490_v0 }
 0x680   : > { %v7503_v33 = vmul.f32 %v8165_v7, %v3534_v51  ;;  %v8168_v51 = vld [vmem:[#allocation21_spill] sm:$0xff] }
 0x682   : > { %v7495_v40 = vpop.permute.xlu0 %3568  ;;  %v7497_v42 = vpop.permute.xlu1 %3614 }
 0x683   : > { %v3582_v26 = vsel %vm1155_vm7, %v3567_v9, %v7495_v40 }
 0x684   : > { %v7506_v10 = vmul.f32 %v8166_v23, %v3582_v26 }
 0x686   : > { %v7510_v49 = vpop.permute.xlu0 %3616  ;;  %v7512_v31 = vpop.permute.xlu1 %3472 }
 0x687   : > { %v3486_v24 = vsel %vm1055_vm6, %v7454_v1, %v7512_v31 }
 0x688   : > { %v7523_v7 = vmul.f32 %v8168_v51, %v3486_v24  ;;  %v3366_v51 = vsel %vm930_vm4, %v3351_v15, %v7483_v2 }
 0x689   : > { %v3381_v32 = vmul.f32 %v8174_v63, %v3366_v51 }
 0x68a   : > { %v7527_v23 = vpop.permute.xlu0 %3514  ;;  %v3251_v8 = vpop.permute.xlu1 %3250 }
 0x68b   : > { %v4674_v55 = vpack.c.bf16 %v3429_v11, %v3381_v32 }
 0x68e   : > { %v7529_v48 = vpop.permute.xlu0 %3610  ;;  %v3299_v44 = vpop.permute.xlu1 %3298 }
 0x692   : > { %v3253_v34 = vpop.permute.xlu0 %3252  ;;  %v7531_v27 = vpop.permute.xlu1 %3346 }
 0x693   : > { %v3271_v24 = vsel %vm831_vm3, %v3253_v34, %v3255_v56  ;;  %v3272_v38 = vsel %vm831_vm3, %v3251_v8, %v3253_v34  ;;  %v8171_v56 = vld [vmem:[#allocation16_spill] sm:$0xff] }
 0x694   : > { %v3283_v18 = vmul.f32 %v3272_v38, %v8170_v4  ;;  %v3284_v12 = vmul.f32 %v3271_v24, %v8171_v56 }
 0x696   : > { %v3301_v26 = vpop.permute.xlu0 %3300  ;;  %v3395_v50 = vpop.permute.xlu1 %3394 }
 0x697   : > { %v3319_v45 = vsel %vm880_vm2, %v3301_v26, %v3303_v39  ;;  %v3320_v20 = vsel %vm880_vm2, %v3299_v44, %v3301_v26 }
 0x698   : > { %v3331_v34 = vmul.f32 %v8172_v52, %v3320_v20  ;;  %v3332_v6 = vmul.f32 %v8173_v35, %v3319_v45  ;;  %v8175_v45 = vld [vmem:[#allocation20_spill] sm:$0xff] }
 0x69a   : > { %v4672_v41 = vpack.c.bf16 %v3332_v6, %v3284_v12  ;;  %v3349_v58 = vpop.permute.xlu0 %3348  ;;  %v7553_v59 = vpop.permute.xlu1 %3466  ;;  %v4654_v43 = vpack.c.bf16 %v3331_v34, %v3283_v18  ;;  %v8176_v6 = vld [vmem:[#allocation15_spill] sm:$0xff] }
 0x69b   : > { %v3367_v39 = vsel %vm930_vm4, %v3349_v58, %v3351_v15  ;;  %v8178_v15 = vld [vmem:[#allocation38_spill] sm:$0xff] }
 0x69c   : > { %4655 = vmatprep.subr.bf16.mxu0 %v4654_v43  ;;  %4673 = vmatpush1.bf16.msra.mxu1 %v4672_v41  ;;  %v3380_v63 = vmul.f32 %v8175_v45, %v3367_v39  ;;  %v8177_v41 = vld [vmem:[#allocation26_spill] sm:$0xff]  ;;  %v3451_v24 = vmul.f32 %v8178_v15, %v7360_v14 }
 0x69d   : > { %4675 = vmatprep.subr.bf16.mxu1 %v4674_v55 }
 0x69e   : > { %v3397_v4 = vpop.permute.xlu0 %3396  ;;  %v7557_v26 = vpop.permute.xlu1 %3562 }
 0x69f   : > { %v3415_v52 = vsel %vm980_vm5, %v3397_v4, %v3399_v21 }
 0x6a0   : > { %v3428_v35 = vmul.f32 %v8176_v6, %v3415_v52 }
 0x6a2   : > { %v4676_v12 = vpack.c.bf16 %v3428_v35, %v3380_v63  ;;  %v3517_v20 = vpop.permute.xlu0 %3516  ;;  %v3469_v18 = vpop.permute.xlu1 %3468 }
 0x6a3   : > { %v3487_v32 = vsel %vm1055_vm6, %v3469_v18, %v7454_v1  ;;  %v3535_v21 = vsel %vm1105_vm8, %v3517_v20, %v3519_v60 }
 0x6a4   : > { %v3499_v11 = vmul.f32 %v8177_v41, %v3487_v32  ;;  %4677 = vmatpush1.bf16.msra.mxu1 %v4676_v12  ;;  %v3547_v43 = vmul.f32 %v6981_v57, %v3535_v21  ;;  %v3416_v57 = vsel %vm980_vm5, %v3395_v50, %v3397_v4  ;;  %v8180_v41 = vld [vmem:[#allocation17_spill] sm:$0xff]  ;;  %v8183_v4 = vld [vmem:[#allocation12_spill] sm:$0xff] }
 0x6a6   : > { %v3565_v38 = vpop.permute.xlu0 %3564  ;;  %v7571_v51 = vpop.permute.xlu1 %3310  ;;  %v4662_v56 = vpack.c.bf16 %v3499_v11, %v3451_v24  ;;  %v3427_v11 = vmul.f32 %v8180_v41, %v3416_v57  ;;  %v8181_v24 = vld [vmem:[#allocation19_spill] sm:$0xff]  ;;  %v3488_v57 = vsel %vm1055_vm6, %v7553_v59, %v3469_v18  ;;  %v8186_v18 = vld [vmem:[#allocation28_spill] sm:$0xff] }
 0x6a7   : > { %v3583_v34 = vsel %vm1155_vm7, %v3565_v38, %v3567_v9  ;;  %v3368_v9 = vsel %vm930_vm4, %v7531_v27, %v3349_v58  ;;  %v8184_v41 = vld [vmem:[#allocation27_spill] sm:$0xff] }
 0x6a8   : > { %v3595_v1 = vmul.f32 %v6934_v61, %v3583_v34  ;;  %v8182_v34 = vld [vmem:[#allocation10_spill] sm:$0xff] }
 0x6aa   : > { %v7577_v55 = vpop.permute.xlu0 %3612  ;;  %v7579_v39 = vpop.permute.xlu1 %3358  ;;  %v4666_v52 = vpack.c.bf16 %v3595_v1, %v3547_v43  ;;  %v3379_v1 = vmul.f32 %v8183_v4, %v3368_v9  ;;  %v8185_v9 = vld [vmem:[#allocation31_spill] sm:$0xff] }
 0x6ae   : > { %v7581_v14 = vpop.permute.xlu0 %3262  ;;  %v7583_v45 = vpop.permute.xlu1 %3526 }
 0x6af   : > { %8179 = vst [vmem:[#allocation48_spill] sm:$0xff] %v7583_v45 }
 0x6b2   : > { %v7585_v60 = vpop.permute.xlu0 %3406  ;;  %v3265_v63 = vpop.permute.xlu1 %3264 }
 0x6b3   : > { %v3273_v61 = vsel %vm831_vm3, %v3265_v63, %v3251_v8 }
 0x6b4   : > { %v3282_v21 = vmul.f32 %v3273_v61, %v8181_v24  ;;  %v4658_v61 = vpack.c.bf16 %v3427_v11, %v3379_v1  ;;  %v3498_v11 = vmul.f32 %v8186_v18, %v3488_v57  ;;  %v3584_v1 = vsel %vm1155_vm7, %v7557_v26, %v3565_v38  ;;  %v4422_v38 = vld [vmem:[%s7873_s5 + $0x158] sm:$0xff] }
 0x6b5   : > { %v3536_v57 = vsel %vm1105_vm8, %v7527_v23, %v3517_v20 }
 0x6b6   : > { %v7587_v6 = vpop.permute.xlu0 %3478  ;;  %v7589_v35 = vpop.permute.xlu1 %3360 }
 0x6b7   : > { %v3369_v8 = vsel %vm930_vm4, %v7589_v35, %v7531_v27  ;;  %v4430_v27 = vld [vmem:[%s7873_s5 + $0x198] sm:$0xff] }
 0x6ba   : > { %v3313_v12 = vpop.permute.xlu0 %3312  ;;  %v7598_v32 = vpop.permute.xlu1 %3480 }
 0x6bb   : > { %v3321_v15 = vsel %vm880_vm2, %v3313_v12, %v3299_v44 }
 0x6bc   : > { %v3330_v43 = vmul.f32 %v8182_v34, %v3321_v15  ;;  %v3378_v15 = vmul.f32 %v8184_v41, %v3369_v8  ;;  %v3450_v8 = vmul.f32 %v6953_v25, %v7348_v46  ;;  %v3594_v41 = vmul.f32 %v6990_v5, %v3584_v1 }
 0x6be   : > { %v4656_v58 = vpack.c.bf16 %v3330_v43, %v3282_v21  ;;  %v3409_v45 = vpop.permute.xlu0 %3408  ;;  %v7610_v16 = vpop.permute.xlu1 %3522 }
 0x6bf   : > { %v3417_v44 = vsel %vm980_vm5, %v3409_v45, %v3395_v50  ;;  %v3533_v21 = vsel %vm1105_vm8, %v7490_v0, %v7610_v16  ;;  %v4438_v50 = vld [vmem:[%s7873_s5 + $0x1d8] sm:$0xff] }
 0x6c0   : > { %v3426_v24 = vmul.f32 %v8185_v9, %v3417_v44  ;;  %4657 = vmatpush1.bf16.msra.mxu0 %v4656_v58  ;;  %v3549_v58 = vmul.f32 %v4430_v27, %v3533_v21  ;;  %v3631_v9 = vsel %vm1205_vm9, %v7577_v55, %v7497_v42  ;;  %v3314_v21 = vsel %vm880_vm2, %v7571_v51, %v3313_v12 }
 0x6c1   : > { %4659 = vmatprep.subr.bf16.mxu0 %v4658_v61  ;;  %v4414_v61 = vld [vmem:[%s7873_s5 + $0x118] sm:$0xff]  ;;  %v3362_v12 = vsel %vm930_vm4, %v7579_v39, %v7589_v35  ;;  %v3410_v35 = vsel %vm980_vm5, %v7585_v60, %v3409_v45 }
 0x6c2   : > { %v4660_v34 = vpack.c.bf16 %v3426_v24, %v3378_v15  ;;  %v7630_v43 = vpop.permute.xlu0 %3528  ;;  %v7632_v4 = vpop.permute.xlu1 %3570  ;;  %v3453_v5 = vmul.f32 %v4414_v61, %v7316_v22  ;;  %v3630_v22 = vsel %vm1205_vm9, %v7497_v42, %v7510_v49  ;;  %v3489_v61 = vsel %vm1055_vm6, %v7598_v32, %v7553_v59 }
 0x6c3   : > { %v3581_v0 = vsel %vm1155_vm7, %v7495_v40, %v7632_v4  ;;  %v4664_v40 = vpack.c.bf16 %v3498_v11, %v3450_v8  ;;  %v3643_v11 = vmul.f32 %v7048_v36, %v3631_v9  ;;  %v4446_v36 = vld [vmem:[%s7873_s5 + $0x218] sm:$0xff] }
 0x6c4   : > { %v3597_v44 = vmul.f32 %v4438_v50, %v3581_v0  ;;  %4661 = vmatpush1.bf16.msra.mxu0 %v4660_v34  ;;  %v8187_v34 = vld [vmem:[#allocation11_spill] sm:$0xff] }
 0x6c5   : > { %4663 = vmatprep.subr.bf16.mxu0 %v4662_v56  ;;  %v3546_v56 = vmul.f32 %v7007_v47, %v3536_v57  ;;  %v3632_v47 = vsel %vm1205_vm9, %v7529_v48, %v7577_v55  ;;  %v3337_v55 = vmul.f32 %v8187_v34, %v3314_v21  ;;  %v3278_v0 = vld [vmem:[%s7873_s5 + $0x20] sm:$0xff] }
 0x6c6   : > { %v3307_v25 = vpop.permute.xlu1 %3306  ;;  %v7653_v46 = vpop.permute.xlu0 %3474  ;;  %v4682_v15 = vpack.c.bf16 %v3597_v44, %v3549_v58  ;;  %v3642_v1 = vmul.f32 %v7105_v13, %v3632_v47  ;;  %v8189_v13 = vld [vmem:[#allocation9_spill] sm:$0xff] }
 0x6c7   : > { %v3485_v20 = vsel %vm1055_vm6, %v7512_v31, %v7653_v46  ;;  %v4668_v27 = vpack.c.bf16 %v3594_v41, %v3546_v56  ;;  %v8190_v44 = vld [vmem:[#allocation13_spill] sm:$0xff]  ;;  %v3317_v57 = vsel %vm880_vm2, %v7469_v30, %v3307_v25  ;;  %v3433_v41 = vmul.f32 %v6944_v29, %v3410_v35  ;;  %v4399_v56 = vld [vmem:[%s7873_s5 + $0xa0] sm:$0xff]  ;;  %v8197_v35 = vld [vmem:[#allocation34_spill] sm:$0xff] }
 0x6c8   : > { %v3501_v24 = vmul.f32 %v4422_v38, %v3485_v20  ;;  %4665 = vmatpush1.bf16.msra.mxu0 %v4664_v40  ;;  %v3385_v38 = vmul.f32 %v6999_v53, %v3362_v12  ;;  %v8191_v53 = vpack.c.bf16 %v7506_v10, %v7503_v33  ;;  %v3334_v20 = vmul.f32 %v7063_v54, %v3317_v57  ;;  %v8196_v12 = vld [vmem:[#allocation56_spill] sm:$0xff] }
 0x6c9   : > { %4667 = vmatprep.subr.bf16.mxu0 %v4666_v52  ;;  %v3266_v52 = vsel %vm831_vm3, %v7581_v14, %v3265_v63  ;;  %v8188_v63 = vpack.c.bf16 %v7523_v7, %v7520_v62  ;;  %v7710_v62 = vld [vmem:[%s7872_s4 + $0x18] sm:$0xff]  ;;  %v3644_v7 = vmul.f32 %v8189_v13, %v3630_v22  ;;  %v8201_v57 = vld [vmem:[#allocation40_spill] sm:$0xff] }
 0x6ca   : > { %v7668_v50 = vpop.permute.xlu1 %3618  ;;  %v3259_v31 = vpop.permute.xlu0 %3258  ;;  %v4678_v18 = vpack.c.bf16 %v3501_v24, %v3453_v5  ;;  %v3289_v45 = vmul.f32 %v3266_v52, %v8190_v44  ;;  %v8192_v24 = vld [vmem:[#allocation32_spill] sm:$0xff] }
 0x6cb   : > { %v3629_v42 = vsel %vm1205_vm9, %v7510_v49, %v7668_v50  ;;  %v3269_v8 = vsel %vm831_vm3, %v7460_v19, %v3259_v31  ;;  %v3482_v19 = vsel %vm1055_vm6, %v7587_v6, %v7598_v32 }
 0x6cc   : > { %4669 = vmatpush1.bf16.msra.mxu0 %v4668_v27  ;;  %4679 = vmatprep.subr.bf16.mxu1 %v4678_v18  ;;  %v3645_v40 = vmul.f32 %v4446_v36, %v3629_v42  ;;  %v4702_v30 = vpack.c.bf16 %v3337_v55, %v3289_v45  ;;  %v8193_v27 = vld [vmem:[#allocation55_spill] sm:$0xff]  ;;  %v8194_v18 = vld [vmem:[#allocation36_spill] sm:$0xff]  ;;  %v8200_v45 = vld [vmem:[#allocation29_spill] sm:$0xff] }
 0x6cd   : > { %3751 = vmatprep.subr.mxu0 %v3643_v11  ;;  %4681 = vmatpush1.bf16.msra.mxu1 %v8188_v63  ;;  %v8195_v11 = vld [vmem:[#allocation43_spill] sm:$0xff] }
 0x6ce   : > { %v3355_v49 = vpop.permute.xlu1 %3354  ;;  %4683 = vmatprep.subr.bf16.mxu1 %v4682_v15  ;;  %v3403_v58 = vpop.permute.xlu0 %3402  ;;  %v3286_v15 = vmul.f32 %v3278_v0, %v3269_v8  ;;  %v8198_v8 = vld [vmem:[#allocation33_spill] sm:$0xff] }
 0x6cf   : > { %v3365_v59 = vsel %vm930_vm4, %v7483_v2, %v3355_v49  ;;  %v3413_v29 = vsel %vm980_vm5, %v7488_v17, %v3403_v58 }
 0x6d0   : > { %3752 = vmatpush1.msra.mxu0 %v3642_v1  ;;  %v4688_v22 = vpack.c.bf16 %v3334_v20, %v3286_v15  ;;  %v3382_v52 = vmul.f32 %v4399_v56, %v3365_v59  ;;  %v3430_v34 = vmul.f32 %v8196_v12, %v3413_v29  ;;  %v8204_v15 = vld [vmem:[#allocation53_spill] sm:$0xff]  ;;  %v8206_v56 = vld [vmem:[#allocation47_spill] sm:$0xff]  ;;  %v8207_v59 = vld [vmem:[#allocation58_spill] sm:$0xff] }
 0x6d1   : > { %4452 = vmatmul.mubr.msk.f32.vlgmr.msra.gmra.mrb[28].mxu0 %vm1312_vm10, %v7710_v62  ;;  %4685 = vmatpush1.bf16.msra.mxu1 %v8191_v53  ;;  %v8205_v53 = vld [vmem:[#allocation37_spill] sm:$0xff]  ;;  %v3454_v29 = vmul.f32 %v8207_v59, %v8206_v56 }
 0x6d2   : > { %3822 = vmatprep.subr.mxu1 %v3645_v40  ;;  %v3309_v32 = vpop.permute.xlu0 %3308  ;;  %v3261_v9 = vpop.permute.xlu1 %3260  ;;  %3941 = vmatprep.mubr.f32.mxu0 %v8009_v3  ;;  %v4692_v20 = vpack.c.bf16 %v3430_v34, %v3382_v52  ;;  %v8214_v34 = vld [vmem:[#allocation51_spill] sm:$0xff] }
 0x6d3   : > { %v3315_v54 = vsel %vm880_vm2, %v3309_v32, %v7571_v51  ;;  %v3316_v10 = vsel %vm880_vm2, %v3307_v25, %v3309_v32  ;;  %v3267_v2 = vsel %vm831_vm3, %v3261_v9, %v7581_v14  ;;  %v3268_v33 = vsel %vm831_vm3, %v3259_v31, %v3261_v9  ;;  %v8208_v9 = vld [vmem:[#allocation6_spill] sm:$0xff] }
 0x6d4   : > { %v3335_v17 = vmul.f32 %v7054_v28, %v3316_v10  ;;  %v3336_v5 = vmul.f32 %v8192_v24, %v3315_v54  ;;  %v3287_v21 = vmul.f32 %v3268_v33, %v8193_v27  ;;  %v3288_v47 = vmul.f32 %v3267_v2, %v8194_v18  ;;  %v8209_v10 = vld [vmem:[#allocation49_spill] sm:$0xff]  ;;  %v8211_v24 = vld [vmem:[#allocation44_spill] sm:$0xff] }
 0x6d5   : > { %v3505_v51 = vmul.f32 %v8195_v11, %v3489_v61  ;;  %3823 = vmatpush1.msra.mxu1 %v3644_v7  ;;  %v4706_v25 = vpack.c.bf16 %v3433_v41, %v3385_v38  ;;  %v8199_v7 = vld [vmem:[#allocation35_spill] sm:$0xff]  ;;  %v8212_v11 = vld [vmem:[#allocation48_spill] sm:$0xff] }
 0x6d6   : > { %v4704_v14 = vpack.c.bf16 %v3336_v5, %v3288_v47  ;;  %4453 = vmatmul.mubr.msk.f32.vlgmr.msra.gmra.mrb[28].mxu1 %vm1312_vm10, %v7710_v62  ;;  %4703 = vmatprep.subr.bf16.mxu1 %v4702_v30  ;;  %v3357_v28 = vpop.permute.xlu0 %3356  ;;  %v3405_v31 = vpop.permute.xlu1 %3404  ;;  %v4686_v55 = vpack.c.bf16 %v3335_v17, %v3287_v21  ;;  %v3457_v30 = vmul.f32 %v8205_v53, %v8204_v15  ;;  %v8210_v17 = vld [vmem:[#allocation54_spill] sm:$0xff]  ;;  %v4449_v15 = vld [vmem:[%s7873_s5 + $0x230] sm:$0xff] }
 0x6d7   : > { %v3363_v36 = vsel %vm930_vm4, %v3357_v28, %v7579_v39  ;;  %v3364_v42 = vsel %vm930_vm4, %v3355_v49, %v3357_v28  ;;  %v3411_v63 = vsel %vm980_vm5, %v3405_v31, %v7585_v60  ;;  %v3412_v1 = vsel %vm980_vm5, %v3403_v58, %v3405_v31  ;;  %4012 = vmatprep.mubr.f32.mxu1 %v8009_v3  ;;  %v8202_v49 = vld [vmem:[#allocation30_spill] sm:$0xff]  ;;  %v8203_v60 = vld [vmem:[#allocation57_spill] sm:$0xff]  ;;  %v8215_v28 = vld [vmem:[#allocation52_spill] sm:$0xff] }
 0x6d8   : > { %v3383_v0 = vmul.f32 %v8197_v35, %v3364_v42  ;;  %v3384_v13 = vmul.f32 %v8198_v8, %v3363_v36  ;;  %v3431_v44 = vmul.f32 %v8199_v7, %v3412_v1  ;;  %v3432_v39 = vmul.f32 %v8200_v45, %v3411_v63  ;;  %4687 = vmatprep.subr.bf16.mxu0 %v4686_v55  ;;  %v8216_v55 = vld [vmem:[#allocation41_spill] sm:$0xff]  ;;  %v4442_v63 = vld [vmem:[%s7873_s5 + $0x1f8] sm:$0xff] }
 0x6d9   : > { %v3456_v38 = vmul.f32 %v8202_v49, %v8201_v57  ;;  %4705 = vmatpush1.bf16.msra.mxu1 %v4704_v14  ;;  %4689 = vmatpush1.bf16.msra.mxu0 %v4688_v22  ;;  %v3504_v61 = vmul.f32 %v8203_v60, %v3482_v19  ;;  %v4710_v33 = vpack.c.bf16 %v3505_v51, %v3457_v30  ;;  %v4450_v49 = vld [vmem:[%s7873_s5 + $0x238] sm:$0xff] }
 0x6da   : > { %v4708_v40 = vpack.c.bf16 %v3432_v39, %v3384_v13  ;;  %4707 = vmatprep.subr.bf16.mxu1 %v4706_v25  ;;  %v3575_v58 = vpop.permute.xlu0 %3574  ;;  %v3477_v3 = vpop.permute.xlu1 %3476  ;;  %v4690_v41 = vpack.c.bf16 %v3431_v44, %v3383_v0  ;;  %v3455_v5 = vmul.f32 %v8211_v24, %v8210_v17  ;;  %v8213_v25 = vld [vmem:[#allocation50_spill] sm:$0xff]  ;;  %v3537_v42 = vsel %vm1105_vm8, %v7630_v43, %v7527_v23 }
 0x6db   : > { %v3483_v32 = vsel %vm1055_vm6, %v3477_v3, %v7587_v6  ;;  %v3484_v19 = vsel %vm1055_vm6, %v7653_v46, %v3477_v3  ;;  %v4712_v27 = vpack.c.bf16 %v3504_v61, %v3456_v38  ;;  %v8218_v44 = vld [vmem:[#allocation46_spill] sm:$0xff] }
 0x6dc   : > { %v3502_v54 = vmul.f32 %v8208_v9, %v3484_v19  ;;  %v3503_v2 = vmul.f32 %v8209_v10, %v3483_v32  ;;  %4691 = vmatprep.subr.bf16.mxu0 %v4690_v41  ;;  %v3553_v45 = vmul.f32 %v8218_v44, %v3537_v42  ;;  %v8219_v53 = vld [vmem:[#allocation42_spill] sm:$0xff] }
 0x6dd   : > { %4709 = vmatpush1.bf16.msra.mxu1 %v4708_v40  ;;  %4693 = vmatpush1.bf16.msra.mxu0 %v4692_v20  ;;  %v8220_v20 = vld [vmem:[#allocation39_spill] sm:$0xff] }
 0x6de   : > { %v4696_v21 = vpack.c.bf16 %v3502_v54, %v3454_v29  ;;  %4711 = vmatprep.subr.bf16.mxu1 %v4710_v33  ;;  %v3525_v18 = vpop.permute.xlu0 %3524  ;;  %v3573_v6 = vpop.permute.xlu1 %3572  ;;  %v4694_v47 = vpack.c.bf16 %v3503_v2, %v3455_v5 }
 0x6df   : > { %v3531_v46 = vsel %vm1105_vm8, %v3525_v18, %v8212_v11  ;;  %v3532_v22 = vsel %vm1105_vm8, %v7610_v16, %v3525_v18  ;;  %v3579_v51 = vsel %vm1155_vm7, %v3573_v6, %v3575_v58  ;;  %v3580_v52 = vsel %vm1155_vm7, %v7632_v4, %v3573_v6  ;;  %v4441_v4 = vld [vmem:[%s7873_s5 + $0x1f0] sm:$0xff] }
 0x6e0   : > { %v3550_v12 = vmul.f32 %v8213_v25, %v3532_v22  ;;  %v3551_v14 = vmul.f32 %v8214_v34, %v3531_v46  ;;  %v3598_v31 = vmul.f32 %v8215_v28, %v3580_v52  ;;  %v3599_v36 = vmul.f32 %v8216_v55, %v3579_v51  ;;  %4695 = vmatprep.subr.bf16.mxu0 %v4694_v47 }
 0x6e1   : > { %v3530_v16 = vsel %vm1105_vm8, %v8212_v11, %v7630_v43  ;;  %4713 = vmatpush1.bf16.msra.mxu1 %v4712_v27  ;;  %4697 = vmatpush1.bf16.msra.mxu0 %v4696_v21  ;;  %v8217_v43 = vld [vmem:[#allocation45_spill] sm:$0xff] }
 0x6e2   : > { %v4700_v1 = vpack.c.bf16 %v3598_v31, %v3550_v12  ;;  %v3621_v35 = vpop.permute.xlu0 %3620  ;;  %v3577_v0 = vpop.permute.xlu1 %3576  ;;  %v4698_v8 = vpack.c.bf16 %v3599_v36, %v3551_v14  ;;  %v3552_v7 = vmul.f32 %v8217_v43, %v3530_v16 }
 0x6e3   : > { %v3578_v13 = vsel %vm1155_vm7, %v3575_v58, %v3577_v0  ;;  %v3585_v23 = vsel %vm1155_vm7, %v3577_v0, %v7557_v26  ;;  %v3628_v38 = vsel %vm1205_vm9, %v7668_v50, %v3621_v35 }
 0x6e4   : > { %v3600_v39 = vmul.f32 %v4441_v4, %v3578_v13  ;;  %v3601_v57 = vmul.f32 %v4442_v63, %v3585_v23  ;;  %4699 = vmatprep.subr.bf16.mxu0 %v4698_v8  ;;  %v3646_v56 = vmul.f32 %v8220_v20, %v3628_v38 }
 0x6e5   : > { %4701 = vmatpush1.bf16.msra.mxu0 %v4700_v1 }
 0x6e6   : > { %v4716_v60 = vpack.c.bf16 %v3600_v39, %v3552_v7  ;;  %v3625_v61 = vpop.permute.xlu0 %3624  ;;  %v3623_v40 = vpop.permute.xlu1 %3622  ;;  %v4714_v26 = vpack.c.bf16 %v3601_v57, %v3553_v45 }
 0x6e7   : > { %v3633_v58 = vsel %vm1205_vm9, %v3625_v61, %v7529_v48  ;;  %v3627_v3 = vsel %vm1205_vm9, %v3621_v35, %v3623_v40  ;;  %v3626_v50 = vsel %vm1205_vm9, %v3623_v40, %v3625_v61 }
 0x6e8   : > { %v3649_v41 = vmul.f32 %v4450_v49, %v3633_v58  ;;  %v3647_v30 = vmul.f32 %v8219_v53, %v3627_v3  ;;  %4715 = vmatprep.subr.bf16.mxu1 %v4714_v26  ;;  %v3648_v48 = vmul.f32 %v4449_v15, %v3626_v50 }
 0x6e9   : > { %4717 = vmatpush1.bf16.msra.mxu1 %v4716_v60 }
 0x6ea   : > { %3893 = vmatprep.subr.mxu0 %v3647_v30  ;;  %3964 = vmatprep.subr.mxu1 %v3649_v41 }
 0x6eb   : > { %3894 = vmatpush1.msra.mxu0 %v3646_v56 }
 0x6ec   : > { %4454 = vmatmul.mubr.msk.f32.vlgmr.msra.gmra.mrb[30].mxu0 %vm1312_vm10, %v7710_v62 }
 0x6ed   : > { %3965 = vmatpush1.msra.mxu1 %v3648_v48 }
 0x6ee   : > { %4455 = vmatmul.mubr.msk.f32.vlgmr.msra.gmra.mrb[30].mxu1 %vm1312_vm10, %v7710_v62 }
 0x6f7   : > { %v4039_v19 = vpop.permute.xlu0 %4038 }
 0x6f8   : > { %v4024_v59 = vpop.permute.xlu1 %4023 }
 0x7a4   : > { %v3801_v37 = vpop.f32.mrb[28].mxu0 }
 0x7a5   : > { %v4026_v29 = vmul.f32 %v4024_v59, %v3801_v37  ;;  %v3803_v32 = vpop.f32.mrb[29].mxu0 }
 0x7a6   : > { %v4027_v9 = vmul.f32 %v4024_v59, %v3803_v32 }
 0x7a7   : > { %v4041_v54 = vadd.f32 %v4039_v19, %v4026_v29 }
 0x7a8   : > { %v4042_v10 = vadd.f32 %v4039_v19, %v4027_v9 }
 0x7a9   : > { %v4049_v2 = vmax.f32 %v4041_v54, 0.0  ;;  %v3872_v62 = vpop.f32.mrb[28].mxu1 }
 0x7aa   : > { %v4050_v33 = vmax.f32 %v4042_v10, 0.0  ;;  %v4028_v17 = vmul.f32 %v4024_v59, %v3872_v62  ;;  %v3874_v24 = vpop.f32.mrb[29].mxu1 }
 0x7ab   : > { %4057 = vst [vmem:[%s7855_s30] sm:$0xff] %v4049_v2  ;;  %v4029_v5 = vmul.f32 %v4024_v59, %v3874_v24 }
 0x7ac   : > { %4058 = vst [vmem:[%s7855_s30 + $0x8] sm:$0xff] %v4050_v33  ;;  %v4043_v27 = vadd.f32 %v4039_v19, %v4028_v17 }
 0x7ad   : > { %v4044_v21 = vadd.f32 %v4039_v19, %v4029_v5 }
 0x7ae   : > { %v4051_v18 = vmax.f32 %v4043_v27, 0.0 }
 0x7af   : > { %v4052_v6 = vmax.f32 %v4044_v21, 0.0 }
 0x7b0   : > { %4059 = vst [vmem:[%s7855_s30 + $0x10] sm:$0xff] %v4051_v18 }
 0x7b1   : > { %4060 = vst [vmem:[%s7855_s30 + $0x18] sm:$0xff] %v4052_v6 }
 0x7bf   : > { %v3943_v47 = vpop.f32.mrb[30].mxu0 }
 0x7c0   : > { %v4030_v11 = vmul.f32 %v4024_v59, %v3943_v47  ;;  %v3945_v46 = vpop.f32.mrb[31].mxu0 }
 0x7c1   : > { %v4031_v22 = vmul.f32 %v4024_v59, %v3945_v46  ;;  %v4014_v51 = vpop.f32.mrb[30].mxu1 }
 0x7c2   : > { %v4045_v52 = vadd.f32 %v4039_v19, %v4030_v11  ;;  %v4032_v25 = vmul.f32 %v4024_v59, %v4014_v51  ;;  %v4016_v12 = vpop.f32.mrb[31].mxu1 }
 0x7c3   : > { %v4046_v34 = vadd.f32 %v4039_v19, %v4031_v22  ;;  %v4033_v14 = vmul.f32 %v4024_v59, %v4016_v12 }
 0x7c4   : > { %v4053_v28 = vmax.f32 %v4045_v52, 0.0  ;;  %v4047_v31 = vadd.f32 %v4039_v19, %v4032_v25 }
 0x7c5   : > { %v4054_v55 = vmax.f32 %v4046_v34, 0.0  ;;  %v4048_v36 = vadd.f32 %v4039_v19, %v4033_v14 }
 0x7c6   : > { %4061 = vst [vmem:[%s7855_s30 + $0x20] sm:$0xff] %v4053_v28  ;;  %v4055_v16 = vmax.f32 %v4047_v31, 0.0 }
 0x7c7   : > { %4062 = vst [vmem:[%s7855_s30 + $0x28] sm:$0xff] %v4054_v55  ;;  %v4056_v42 = vmax.f32 %v4048_v36, 0.0 }
 0x7c8   : > { %4063 = vst [vmem:[%s7855_s30 + $0x30] sm:$0xff] %v4055_v16 }
 0x7c9   : > { %4064 = vst [vmem:[%s7855_s30 + $0x38] sm:$0xff] %v4056_v42 }
 0x7ca PF: > { %s18_s27 = sadd.s32 1, %s4748_s27  }
 0x7cb   : > { %p15_p4 = scmp.ge.s32.totalorder %s18_s27, 4  }
 0x7cd   :  { %17 = sbr.rel (!%p15_p4) target bundleno = 1 (0x1), region = 102 }

</bundles_post_ra>
